<compile_context>
chip_gen: v7x
topology: tpu7x:2x2x1
jax: 0.10.0
libtpu: 0.0.40
codegen_flags: <defaults>
</compile_context>

<pallas_src>
import functools

import numpy as np
import jax
import jax.numpy as jnp
from jax.experimental import pallas as pl
from jax.experimental.pallas import tpu as pltpu

BN_EPS = 1e-5
LEAKY_SLOPE = 0.1


# --------------------------------------------------------------------------
# Pass 1: 3x3 "SAME" conv (no bias) for one row band + BN batch statistics.
# --------------------------------------------------------------------------
def conv3x3_stats_kernel(xp_ref, w1_ref, y1_ref, stats_ref, *, row_tile, W, Cin):
    """xp_ref   : (H+2, W+2, Cin) bf16  zero-padded NHWC image (resident per batch)
       w1_ref   : (9*Cin, C1)     bf16  HWIO weights flattened over (ky, kx, Cin)
       y1_ref   : (row_tile*W,C1) bf16  conv output rows for this (batch, band)
       stats_ref: (2, C1)         f32   per-batch [sum, sum_sq], resident across bands
    """
    rt = pl.program_id(1)
    C1 = w1_ref.shape[-1]
    row0 = rt * row_tile
    if row_tile % 8 == 0:
        row0 = pl.multiple_of(row0, 8)

    # 3x3 conv on a row band with a 1-row halo: nine shifted taps, each a
    # (band_rows, Cin) x (Cin, C1) MXU matmul accumulated in f32 (no im2col
    # concat).  At production Cin >= 128 each tap already fills the MXU
    # contraction; K stays a multiple of 128.
    acc = jnp.zeros((row_tile * W, C1), jnp.float32)
    for dy in range(3):
        slab = xp_ref[pl.ds(row0 + dy, row_tile), :, :]        # (row_tile, W+2, Cin)
        for dx in range(3):
            tap = slab[:, dx:dx + W, :].reshape(row_tile * W, Cin)
            k0 = (dy * 3 + dx) * Cin
            acc = acc + jnp.dot(tap, w1_ref[k0:k0 + Cin, :],
                                preferred_element_type=jnp.float32)

    y1_ref[...] = acc.astype(y1_ref.dtype)                      # bf16 writeback

    # Per-batch BN statistics accumulated across the sequential band axis only
    # ("arbitrary"); the batch axis stays "parallel" (megacore on v7x).
    @pl.when(rt == 0)
    def _():
        stats_ref[...] = jnp.zeros_like(stats_ref)

    stats_ref[...] += jnp.concatenate(
        [jnp.sum(acc, axis=0, keepdims=True),
         jnp.sum(acc * acc, axis=0, keepdims=True)], axis=0)


# --------------------------------------------------------------------------
# Pass 2: BN normalize -> LeakyReLU(0.1) -> 1x1 conv (+bias), lane-dense out.
# --------------------------------------------------------------------------
def bn_leaky_conv1x1_kernel(y1_ref, scale_ref, shift_ref, w2_ref, b2_ref, out_ref):
    """y1_ref     : (band_rows, C1)  bf16 conv output rows
       scale/shift: (1, C1)          f32  precomputed BN scale / shift
       w2_ref     : (C1, C2p)        bf16 1x1 weights, columns zero-padded
       b2_ref     : (1, C2p)         f32  bias, zero-padded
       out_ref    : (band_rows, C2p) f32  lane-dense output
    """
    y = y1_ref[...].astype(jnp.float32) * scale_ref[...] + shift_ref[...]
    y = jnp.where(y > 0, y, LEAKY_SLOPE * y)
    out_ref[...] = jnp.dot(y.astype(jnp.bfloat16), w2_ref[...],
                           preferred_element_type=jnp.float32) + b2_ref[...]


# --------------------------------------------------------------------------
# Helpers
# --------------------------------------------------------------------------
def _make_spec(block_shape, index_map, buffers=None):
    """BlockSpec with optional pipeline_mode=pl.Buffered(n); falls back cleanly."""
    if buffers is not None and hasattr(pl, "Buffered"):
        try:
            return pl.BlockSpec(block_shape, index_map,
                                pipeline_mode=pl.Buffered(buffers))
        except TypeError:
            pass
    return pl.BlockSpec(block_shape, index_map)


def _vmem_limit_bytes():
    """~80% of per-core VMEM: ~51 MiB on v7x, ~102 MiB on v5e/v6e."""
    try:
        cap = pltpu.get_tpu_info().vmem_capacity_bytes
        return int(cap * 0.8)
    except Exception:
        return 48 * 1024 * 1024      # conservative: safe on every generation


def _choose_row_tile(H, W):
    """Largest row band that divides H, keeps band_rows a sublane multiple and
    the flattened band <= ~2K rows (plenty of pipeline steps at real sizes)."""
    for th in range(H - 1, 0, -1):
        if H % th == 0 and (th * W) % 8 == 0 and th * W <= 2048:
            return th
    return H


# --------------------------------------------------------------------------
# Forward wrapper (matches ScalePrediction.forward, training-mode BatchNorm)
# --------------------------------------------------------------------------
def scale_prediction(x_nchw, params, num_classes, row_tile=None):
    B, Cin, H, W = x_nchw.shape
    C1 = 2 * Cin
    C2 = 3 * (num_classes + 5)
    C2p = ((C2 + 127) // 128) * 128          # lane-dense output stores
    HW = H * W
    Hp, Wp = H + 2, W + 2

    if row_tile is None:
        row_tile = _choose_row_tile(H, W)
    assert H % row_tile == 0
    assert (row_tile * W) % 8 == 0 or row_tile == H
    n_bands = H // row_tile
    band_rows = row_tile * W

    # NCHW -> NHWC, zero-pad H/W by 1 for the SAME 3x3 conv, bf16 for the MXU.
    # TODO(synk): fold this transpose+pad into pass 1 (masked edge taps) to
    # avoid an extra HBM round trip of the activations.
    x_pad = jnp.pad(jnp.transpose(x_nchw, (0, 2, 3, 1)),
                    ((0, 0), (1, 1), (1, 1), (0, 0))).astype(jnp.bfloat16)

    w1_flat = params["w1"].reshape(9 * Cin, C1).astype(jnp.bfloat16)
    w2p = jnp.zeros((C1, C2p), jnp.bfloat16).at[:, :C2].set(
        params["w2"].astype(jnp.bfloat16))
    b2p = jnp.zeros((1, C2p), jnp.float32).at[:, :C2].set(params["b2"])

    vmem_limit = _vmem_limit_bytes()

    def run(use_buffered):
        def spec(shape, imap, buffers=None):
            return _make_spec(shape, imap, buffers if use_buffered else None)

        # ---- pass 1: row-band 3x3 conv + per-batch BN partial stats ----
        kernel1 = functools.partial(conv3x3_stats_kernel,
                                    row_tile=row_tile, W=W, Cin=Cin)
        y1, stats = pl.pallas_call(
            kernel1,
            grid=(B, n_bands),
            in_specs=[
                spec((None, Hp, Wp, Cin), lambda b, r: (b, 0, 0, 0)),
                spec((9 * Cin, C1), lambda b, r: (0, 0), buffers=1),
            ],
            out_specs=[
                spec((None, band_rows, C1), lambda b, r: (b, r, 0)),
                spec((None, 2, C1), lambda b, r: (b, 0, 0)),
            ],
            out_shape=[
                jax.ShapeDtypeStruct((B, HW, C1), jnp.bfloat16),
                jax.ShapeDtypeStruct((B, 2, C1), jnp.float32),
            ],
            compiler_params=pltpu.CompilerParams(
                dimension_semantics=("parallel", "arbitrary"),
                vmem_limit_bytes=vmem_limit),
        )(x_pad, w1_flat)

        # Tiny batch-level reduction + BN scale/shift precompute in XLA
        # (training-mode BN: biased variance, eps=1e-5).
        sums = jnp.sum(stats, axis=0)                 # (2, C1)
        inv_n = 1.0 / float(B * HW)
        mean = sums[0] * inv_n
        var = sums[1] * inv_n - mean * mean
        scale = params["gamma"][0] * jax.lax.rsqrt(var + BN_EPS)
        shift = params["beta"][0] - mean * scale
        scale = scale.reshape(1, C1).astype(jnp.float32)
        shift = shift.reshape(1, C1).astype(jnp.float32)

        # ---- pass 2: BN + LeakyReLU + 1x1 conv, lane-dense padded output ----
        out_p = pl.pallas_call(
            bn_leaky_conv1x1_kernel,
            grid=(B, n_bands),
            in_specs=[
                spec((None, band_rows, C1), lambda b, r: (b, r, 0), buffers=3),
                spec((1, C1), lambda b, r: (0, 0), buffers=1),
                spec((1, C1), lambda b, r: (0, 0), buffers=1),
                spec((C1, C2p), lambda b, r: (0, 0), buffers=1),
                spec((1, C2p), lambda b, r: (0, 0), buffers=1),
            ],
            out_specs=spec((None, band_rows, C2p), lambda b, r: (b, r, 0)),
            out_shape=jax.ShapeDtypeStruct((B, HW, C2p), jnp.float32),
            compiler_params=pltpu.CompilerParams(
                dimension_semantics=("parallel", "parallel"),
                vmem_limit_bytes=vmem_limit),
        )(y1, scale, shift, w2p, b2p)
        return out_p

    try:
        out_p = run(use_buffered=True)
    except Exception:
        # Fallback for JAX builds where BlockSpec pipeline_mode / pl.Buffered is
        # not supported by the grid pipeline.
        out_p = run(use_buffered=False)

    # Strip channel padding; reproduce the PyTorch
    # reshape(B, 3, nc+5, H, W).permute(0, 1, 3, 4, 2) from NHWC.
    # TODO(synk): fuse this permute into the downstream consumer to avoid the
    # extra HBM round trip of the output.
    out_nhwc = out_p[:, :, :C2].reshape(B, H, W, C2)
    return out_nhwc.reshape(B, H, W, 3, num_classes + 5).transpose(0, 3, 1, 2, 4)


# --------------------------------------------------------------------------
# Pure-JAX f32 reference + params
# --------------------------------------------------------------------------
def reference(x_nchw, params, num_classes):
    B, Cin, H, W = x_nchw.shape
    x = jnp.transpose(x_nchw, (0, 2, 3, 1)).astype(jnp.float32)
    y = jax.lax.conv_general_dilated(
        x, params["w1"], window_strides=(1, 1), padding="SAME",
        dimension_numbers=("NHWC", "HWIO", "NHWC"))
    mean = jnp.mean(y, axis=(0, 1, 2))
    var = jnp.mean((y - mean) ** 2, axis=(0, 1, 2))
    y = (y - mean) / jnp.sqrt(var + BN_EPS) * params["gamma"][0] + params["beta"][0]
    y = jnp.where(y > 0, y, LEAKY_SLOPE * y)
    out = jnp.einsum("bhwc,cd->bhwd", y, params["w2"]) + params["b2"][0]
    return out.reshape(B, H, W, 3, num_classes + 5).transpose(0, 3, 1, 2, 4)


def init_params(key, in_channels, num_classes):
    C1 = 2 * in_channels
    C2 = 3 * (num_classes + 5)
    k1, k2, k3, k4, k5 = jax.random.split(key, 5)
    return {
        # conv1 weight in HWIO (torch is (C1, Cin, 3, 3); same values, new layout)
        "w1": jax.random.normal(k1, (3, 3, in_channels, C1), jnp.float32) * 0.1,
        "gamma": 1.0 + 0.1 * jax.random.normal(k2, (1, C1), jnp.float32),
        "beta": 0.1 * jax.random.normal(k3, (1, C1), jnp.float32),
        # conv2 weight (torch (C2, C1, 1, 1)) stored as (C1, C2)
        "w2": jax.random.normal(k4, (C1, C2), jnp.float32) * 0.1,
        "b2": 0.1 * jax.random.normal(k5, (1, C2), jnp.float32),
    }


if __name__ == "__main__":
    B, Cin, H, W = 2, 4, 16, 16
    num_classes = 3

    key = jax.random.PRNGKey(0)
    kx, kp = jax.random.split(key)
    x = jax.random.normal(kx, (B, Cin, H, W), jnp.float32)
    params = init_params(kp, Cin, num_classes)

    out = jax.block_until_ready(scale_prediction(x, params, num_classes))
    ref = jax.block_until_ready(reference(x, params, num_classes))

    assert out.shape == (B, 3, H, W, num_classes + 5), out.shape
    # bf16 MXU operands + bf16 y1 intermediate -> slightly loose tolerance.
    assert np.allclose(np.asarray(out), np.asarray(ref), rtol=3e-2, atol=3e-2), (
        "mismatch vs reference: max abs err "
        f"{np.max(np.abs(np.asarray(out) - np.asarray(ref)))}")

    print("KERNEL_OK")
</pallas_src>

<mosaic_0001>
module attributes {stable_mosaic.version = 11 : i64} {
  func.func @conv3x3_stats_kernel(%arg0: i32, %arg1: i32, %arg2: memref<1x18x18x4xbf16, #tpu.memory_space<vmem>>, %arg3: memref<36x8xbf16, #tpu.memory_space<vmem>>, %arg4: memref<1x128x8xbf16, #tpu.memory_space<vmem>>, %arg5: memref<1x2x8xf32, #tpu.memory_space<vmem>>) attributes {dimension_semantics = [#tpu.dimension_semantics<parallel>, #tpu.dimension_semantics<arbitrary>], iteration_bounds = array<i64: 2, 2>, scalar_prefetch = 0 : i64, scratch_operands = 0 : i64, tpu.core_type = #tpu.core_type<tc>, window_params = [{transform_indices = @transform_0, window_bounds = array<i64: 1, 18, 18, 4>}, {pipeline_mode = #tpu.pipeline_mode<synchronous>, transform_indices = @transform_1, window_bounds = array<i64: 36, 8>}, {transform_indices = @transform_2, window_bounds = array<i64: 1, 128, 8>}, {transform_indices = @transform_3, window_bounds = array<i64: 1, 2, 8>}]} {
    %c8_i32 = arith.constant 8 : i32
    %0 = arith.muli %arg1, %c8_i32 : i32
    %1 = tpu.assume_multiple %0, 8 : i32
    %cst = arith.constant 0.000000e+00 : f32
    %2 = vector.broadcast %cst : f32 to vector<128x8xf32>
    %c0_i32 = arith.constant 0 : i32
    %3 = arith.addi %1, %c0_i32 : i32
    %c0 = arith.constant 0 : index
    %4 = arith.index_cast %3 : i32 to index
    %c0_0 = arith.constant 0 : index
    %c0_1 = arith.constant 0 : index
    %5 = vector.load %arg2[%c0, %4, %c0_0, %c0_1] : memref<1x18x18x4xbf16, #tpu.memory_space<vmem>>, vector<1x8x18x4xbf16>
    %6 = vector.shape_cast %5 : vector<1x8x18x4xbf16> to vector<8x18x4xbf16>
    %7 = vector.extract_strided_slice %6 {offsets = [0, 0, 0], sizes = [8, 16, 4], strides = [1, 1, 1]} : vector<8x18x4xbf16> to vector<8x16x4xbf16>
    %8 = vector.shape_cast %7 : vector<8x16x4xbf16> to vector<128x4xbf16>
    %c0_2 = arith.constant 0 : index
    %c0_3 = arith.constant 0 : index
    %9 = vector.load %arg3[%c0_2, %c0_3] : memref<36x8xbf16, #tpu.memory_space<vmem>>, vector<4x8xbf16>
    %cst_4 = arith.constant dense<0.000000e+00> : vector<128x8xf32>
    %10 = tpu.matmul %8, %9, %cst_4 {dimension_numbers = #tpu.dot_dimension_numbers<[1], [0], [0], [1], [0, 0, 1, 1], [], []>} : vector<128x4xbf16>, vector<4x8xbf16>, vector<128x8xf32> -> vector<128x8xf32>
    %11 = arith.addf %2, %10 : vector<128x8xf32>
    %12 = vector.extract_strided_slice %6 {offsets = [0, 1, 0], sizes = [8, 16, 4], strides = [1, 1, 1]} : vector<8x18x4xbf16> to vector<8x16x4xbf16>
    %13 = vector.shape_cast %12 : vector<8x16x4xbf16> to vector<128x4xbf16>
    %c4 = arith.constant 4 : index
    %c0_5 = arith.constant 0 : index
    %14 = vector.load %arg3[%c4, %c0_5] : memref<36x8xbf16, #tpu.memory_space<vmem>>, vector<4x8xbf16>
    %cst_6 = arith.constant dense<0.000000e+00> : vector<128x8xf32>
    %15 = tpu.matmul %13, %14, %cst_6 {dimension_numbers = #tpu.dot_dimension_numbers<[1], [0], [0], [1], [0, 0, 1, 1], [], []>} : vector<128x4xbf16>, vector<4x8xbf16>, vector<128x8xf32> -> vector<128x8xf32>
    %16 = arith.addf %11, %15 : vector<128x8xf32>
    %17 = vector.extract_strided_slice %6 {offsets = [0, 2, 0], sizes = [8, 16, 4], strides = [1, 1, 1]} : vector<8x18x4xbf16> to vector<8x16x4xbf16>
    %18 = vector.shape_cast %17 : vector<8x16x4xbf16> to vector<128x4xbf16>
    %c8 = arith.constant 8 : index
    %c0_7 = arith.constant 0 : index
    %19 = vector.load %arg3[%c8, %c0_7] : memref<36x8xbf16, #tpu.memory_space<vmem>>, vector<4x8xbf16>
    %cst_8 = arith.constant dense<0.000000e+00> : vector<128x8xf32>
    %20 = tpu.matmul %18, %19, %cst_8 {dimension_numbers = #tpu.dot_dimension_numbers<[1], [0], [0], [1], [0, 0, 1, 1], [], []>} : vector<128x4xbf16>, vector<4x8xbf16>, vector<128x8xf32> -> vector<128x8xf32>
    %21 = arith.addf %16, %20 : vector<128x8xf32>
    %c1_i32 = arith.constant 1 : i32
    %22 = arith.addi %1, %c1_i32 : i32
    %c0_9 = arith.constant 0 : index
    %23 = arith.index_cast %22 : i32 to index
    %c0_10 = arith.constant 0 : index
    %c0_11 = arith.constant 0 : index
    %24 = vector.load %arg2[%c0_9, %23, %c0_10, %c0_11] : memref<1x18x18x4xbf16, #tpu.memory_space<vmem>>, vector<1x8x18x4xbf16>
    %25 = vector.shape_cast %24 : vector<1x8x18x4xbf16> to vector<8x18x4xbf16>
    %26 = vector.extract_strided_slice %25 {offsets = [0, 0, 0], sizes = [8, 16, 4], strides = [1, 1, 1]} : vector<8x18x4xbf16> to vector<8x16x4xbf16>
    %27 = vector.shape_cast %26 : vector<8x16x4xbf16> to vector<128x4xbf16>
    %c12 = arith.constant 12 : index
    %c0_12 = arith.constant 0 : index
    %28 = vector.load %arg3[%c12, %c0_12] : memref<36x8xbf16, #tpu.memory_space<vmem>>, vector<4x8xbf16>
    %cst_13 = arith.constant dense<0.000000e+00> : vector<128x8xf32>
    %29 = tpu.matmul %27, %28, %cst_13 {dimension_numbers = #tpu.dot_dimension_numbers<[1], [0], [0], [1], [0, 0, 1, 1], [], []>} : vector<128x4xbf16>, vector<4x8xbf16>, vector<128x8xf32> -> vector<128x8xf32>
    %30 = arith.addf %21, %29 : vector<128x8xf32>
    %31 = vector.extract_strided_slice %25 {offsets = [0, 1, 0], sizes = [8, 16, 4], strides = [1, 1, 1]} : vector<8x18x4xbf16> to vector<8x16x4xbf16>
    %32 = vector.shape_cast %31 : vector<8x16x4xbf16> to vector<128x4xbf16>
    %c16 = arith.constant 16 : index
    %c0_14 = arith.constant 0 : index
    %33 = vector.load %arg3[%c16, %c0_14] : memref<36x8xbf16, #tpu.memory_space<vmem>>, vector<4x8xbf16>
    %cst_15 = arith.constant dense<0.000000e+00> : vector<128x8xf32>
    %34 = tpu.matmul %32, %33, %cst_15 {dimension_numbers = #tpu.dot_dimension_numbers<[1], [0], [0], [1], [0, 0, 1, 1], [], []>} : vector<128x4xbf16>, vector<4x8xbf16>, vector<128x8xf32> -> vector<128x8xf32>
    %35 = arith.addf %30, %34 : vector<128x8xf32>
    %36 = vector.extract_strided_slice %25 {offsets = [0, 2, 0], sizes = [8, 16, 4], strides = [1, 1, 1]} : vector<8x18x4xbf16> to vector<8x16x4xbf16>
    %37 = vector.shape_cast %36 : vector<8x16x4xbf16> to vector<128x4xbf16>
    %c20 = arith.constant 20 : index
    %c0_16 = arith.constant 0 : index
    %38 = vector.load %arg3[%c20, %c0_16] : memref<36x8xbf16, #tpu.memory_space<vmem>>, vector<4x8xbf16>
    %cst_17 = arith.constant dense<0.000000e+00> : vector<128x8xf32>
    %39 = tpu.matmul %37, %38, %cst_17 {dimension_numbers = #tpu.dot_dimension_numbers<[1], [0], [0], [1], [0, 0, 1, 1], [], []>} : vector<128x4xbf16>, vector<4x8xbf16>, vector<128x8xf32> -> vector<128x8xf32>
    %40 = arith.addf %35, %39 : vector<128x8xf32>
    %c2_i32 = arith.constant 2 : i32
    %41 = arith.addi %1, %c2_i32 : i32
    %c0_18 = arith.constant 0 : index
    %42 = arith.index_cast %41 : i32 to index
    %c0_19 = arith.constant 0 : index
    %c0_20 = arith.constant 0 : index
    %43 = vector.load %arg2[%c0_18, %42, %c0_19, %c0_20] : memref<1x18x18x4xbf16, #tpu.memory_space<vmem>>, vector<1x8x18x4xbf16>
    %44 = vector.shape_cast %43 : vector<1x8x18x4xbf16> to vector<8x18x4xbf16>
    %45 = vector.extract_strided_slice %44 {offsets = [0, 0, 0], sizes = [8, 16, 4], strides = [1, 1, 1]} : vector<8x18x4xbf16> to vector<8x16x4xbf16>
    %46 = vector.shape_cast %45 : vector<8x16x4xbf16> to vector<128x4xbf16>
    %c24 = arith.constant 24 : index
    %c0_21 = arith.constant 0 : index
    %47 = vector.load %arg3[%c24, %c0_21] : memref<36x8xbf16, #tpu.memory_space<vmem>>, vector<4x8xbf16>
    %cst_22 = arith.constant dense<0.000000e+00> : vector<128x8xf32>
    %48 = tpu.matmul %46, %47, %cst_22 {dimension_numbers = #tpu.dot_dimension_numbers<[1], [0], [0], [1], [0, 0, 1, 1], [], []>} : vector<128x4xbf16>, vector<4x8xbf16>, vector<128x8xf32> -> vector<128x8xf32>
    %49 = arith.addf %40, %48 : vector<128x8xf32>
    %50 = vector.extract_strided_slice %44 {offsets = [0, 1, 0], sizes = [8, 16, 4], strides = [1, 1, 1]} : vector<8x18x4xbf16> to vector<8x16x4xbf16>
    %51 = vector.shape_cast %50 : vector<8x16x4xbf16> to vector<128x4xbf16>
    %c28 = arith.constant 28 : index
    %c0_23 = arith.constant 0 : index
    %52 = vector.load %arg3[%c28, %c0_23] : memref<36x8xbf16, #tpu.memory_space<vmem>>, vector<4x8xbf16>
    %cst_24 = arith.constant dense<0.000000e+00> : vector<128x8xf32>
    %53 = tpu.matmul %51, %52, %cst_24 {dimension_numbers = #tpu.dot_dimension_numbers<[1], [0], [0], [1], [0, 0, 1, 1], [], []>} : vector<128x4xbf16>, vector<4x8xbf16>, vector<128x8xf32> -> vector<128x8xf32>
    %54 = arith.addf %49, %53 : vector<128x8xf32>
    %55 = vector.extract_strided_slice %44 {offsets = [0, 2, 0], sizes = [8, 16, 4], strides = [1, 1, 1]} : vector<8x18x4xbf16> to vector<8x16x4xbf16>
    %56 = vector.shape_cast %55 : vector<8x16x4xbf16> to vector<128x4xbf16>
    %c32 = arith.constant 32 : index
    %c0_25 = arith.constant 0 : index
    %57 = vector.load %arg3[%c32, %c0_25] : memref<36x8xbf16, #tpu.memory_space<vmem>>, vector<4x8xbf16>
    %cst_26 = arith.constant dense<0.000000e+00> : vector<128x8xf32>
    %58 = tpu.matmul %56, %57, %cst_26 {dimension_numbers = #tpu.dot_dimension_numbers<[1], [0], [0], [1], [0, 0, 1, 1], [], []>} : vector<128x4xbf16>, vector<4x8xbf16>, vector<128x8xf32> -> vector<128x8xf32>
    %59 = arith.addf %54, %58 : vector<128x8xf32>
    %60 = arith.truncf %59 : vector<128x8xf32> to vector<128x8xbf16>
    %c0_27 = arith.constant 0 : index
    %c0_28 = arith.constant 0 : index
    %c0_29 = arith.constant 0 : index
    %61 = vector.load %arg4[%c0_27, %c0_28, %c0_29] : memref<1x128x8xbf16, #tpu.memory_space<vmem>>, vector<1x128x8xbf16>
    %62 = vector.shape_cast %61 : vector<1x128x8xbf16> to vector<128x8xbf16>
    %63 = vector.shape_cast %60 : vector<128x8xbf16> to vector<1x128x8xbf16>
    tpu.vector_store %arg4[%c0_27, %c0_28, %c0_29], %63 {strides = array<i32>} : memref<1x128x8xbf16, #tpu.memory_space<vmem>>, vector<1x128x8xbf16>,
    %c0_i32_30 = arith.constant 0 : i32
    %64 = arith.cmpi eq, %arg1, %c0_i32_30 : i32
    %65 = arith.extui %64 : i1 to i32
    %c0_i32_31 = arith.constant 0 : i32
    %66 = arith.cmpi ne, %65, %c0_i32_31 : i32
    scf.if %66 {
      %cst_40 = arith.constant 0.000000e+00 : f32
      %79 = vector.broadcast %cst_40 : f32 to vector<2x8xf32>
      %c0_41 = arith.constant 0 : index
      %c0_42 = arith.constant 0 : index
      %c0_43 = arith.constant 0 : index
      %80 = vector.load %arg5[%c0_41, %c0_42, %c0_43] : memref<1x2x8xf32, #tpu.memory_space<vmem>>, vector<1x2x8xf32>
      %81 = vector.shape_cast %80 : vector<1x2x8xf32> to vector<2x8xf32>
      %82 = vector.shape_cast %79 : vector<2x8xf32> to vector<1x2x8xf32>
      tpu.vector_store %arg5[%c0_41, %c0_42, %c0_43], %82 {strides = array<i32>} : memref<1x2x8xf32, #tpu.memory_space<vmem>>, vector<1x2x8xf32>,
    } else {
    }
    %c0_32 = arith.constant 0 : index
    %c0_33 = arith.constant 0 : index
    %c0_34 = arith.constant 0 : index
    %67 = vector.load %arg5[%c0_32, %c0_33, %c0_34] : memref<1x2x8xf32, #tpu.memory_space<vmem>>, vector<1x2x8xf32>
    %68 = vector.shape_cast %67 : vector<1x2x8xf32> to vector<2x8xf32>
    %cst_35 = arith.constant dense<0.000000e+00> : vector<8xf32>
    %69 = vector.multi_reduction <add>, %59, %cst_35 [0] : vector<128x8xf32> to vector<8xf32>
    %70 = vector.shape_cast %69 : vector<8xf32> to vector<1x8xf32>
    %71 = arith.mulf %59, %59 : vector<128x8xf32>
    %cst_36 = arith.constant dense<0.000000e+00> : vector<8xf32>
    %72 = vector.multi_reduction <add>, %71, %cst_36 [0] : vector<128x8xf32> to vector<8xf32>
    %73 = vector.shape_cast %72 : vector<8xf32> to vector<1x8xf32>
    %74 = tpu.concatenate %70, %73 in 0 : vector<1x8xf32>, vector<1x8xf32> -> vector<2x8xf32>
    %75 = arith.addf %68, %74 : vector<2x8xf32>
    %c0_37 = arith.constant 0 : index
    %c0_38 = arith.constant 0 : index
    %c0_39 = arith.constant 0 : index
    %76 = vector.load %arg5[%c0_37, %c0_38, %c0_39] : memref<1x2x8xf32, #tpu.memory_space<vmem>>, vector<1x2x8xf32>
    %77 = vector.shape_cast %76 : vector<1x2x8xf32> to vector<2x8xf32>
    %78 = vector.shape_cast %75 : vector<2x8xf32> to vector<1x2x8xf32>
    tpu.vector_store %arg5[%c0_37, %c0_38, %c0_39], %78 {strides = array<i32>} : memref<1x2x8xf32, #tpu.memory_space<vmem>>, vector<1x2x8xf32>,
    return
  }
  func.func @transform_0(%arg0: i32, %arg1: i32) -> (i32, i32, i32, i32) {
    %c0_i32 = arith.constant 0 : i32
    %c0_i32_0 = arith.constant 0 : i32
    %c0_i32_1 = arith.constant 0 : i32
    %c0_i32_2 = arith.constant 0 : i32
    return %arg0, %c0_i32, %c0_i32_0, %c0_i32_1 : i32, i32, i32, i32
  }
  func.func @transform_1(%arg0: i32, %arg1: i32) -> (i32, i32) {
    %c0_i32 = arith.constant 0 : i32
    %c0_i32_0 = arith.constant 0 : i32
    %c0_i32_1 = arith.constant 0 : i32
    return %c0_i32, %c0_i32_0 : i32, i32
  }
  func.func @transform_2(%arg0: i32, %arg1: i32) -> (i32, i32, i32) {
    %c0_i32 = arith.constant 0 : i32
    %c0_i32_0 = arith.constant 0 : i32
    return %arg0, %arg1, %c0_i32 : i32, i32, i32
  }
  func.func @transform_3(%arg0: i32, %arg1: i32) -> (i32, i32, i32) {
    %c0_i32 = arith.constant 0 : i32
    %c0_i32_0 = arith.constant 0 : i32
    %c0_i32_1 = arith.constant 0 : i32
    return %arg0, %c0_i32, %c0_i32_0 : i32, i32, i32
  }
}

module attributes {stable_mosaic.version = 11 : i64} {
  func.func @conv3x3_stats_kernel(%arg0: i32, %arg1: i32, %arg2: memref<1x18x18x4xbf16, #tpu.memory_space<vmem>>, %arg3: memref<36x8xbf16, #tpu.memory_space<vmem>>, %arg4: memref<1x128x8xbf16, #tpu.memory_space<vmem>>, %arg5: memref<1x2x8xf32, #tpu.memory_space<vmem>>) attributes {dimension_semantics = [#tpu.dimension_semantics<parallel>, #tpu.dimension_semantics<arbitrary>], iteration_bounds = array<i64: 2, 2>, scalar_prefetch = 0 : i64, scratch_operands = 0 : i64, tpu.core_type = #tpu.core_type<tc>, window_params = [{transform_indices = @transform_0, window_bounds = array<i64: 1, 18, 18, 4>}, {pipeline_mode = #tpu.pipeline_mode<synchronous>, transform_indices = @transform_1, window_bounds = array<i64: 36, 8>}, {transform_indices = @transform_2, window_bounds = array<i64: 1, 128, 8>}, {transform_indices = @transform_3, window_bounds = array<i64: 1, 2, 8>}]} {
    %c8_i32 = arith.constant 8 : i32
    %0 = arith.muli %arg1, %c8_i32 : i32
    %1 = tpu.assume_multiple %0, 8 : i32
    %cst = arith.constant 0.000000e+00 : f32
    %2 = vector.broadcast %cst : f32 to vector<128x8xf32>
    %c0_i32 = arith.constant 0 : i32
    %3 = arith.addi %1, %c0_i32 : i32
    %c0 = arith.constant 0 : index
    %4 = arith.index_cast %3 : i32 to index
    %c0_0 = arith.constant 0 : index
    %c0_1 = arith.constant 0 : index
    %5 = vector.load %arg2[%c0, %4, %c0_0, %c0_1] : memref<1x18x18x4xbf16, #tpu.memory_space<vmem>>, vector<1x8x18x4xbf16>
    %6 = vector.shape_cast %5 : vector<1x8x18x4xbf16> to vector<8x18x4xbf16>
    %7 = vector.extract_strided_slice %6 {offsets = [0, 0, 0], sizes = [8, 16, 4], strides = [1, 1, 1]} : vector<8x18x4xbf16> to vector<8x16x4xbf16>
    %8 = vector.shape_cast %7 : vector<8x16x4xbf16> to vector<128x4xbf16>
    %c0_2 = arith.constant 0 : index
    %c0_3 = arith.constant 0 : index
    %9 = vector.load %arg3[%c0_2, %c0_3] : memref<36x8xbf16, #tpu.memory_space<vmem>>, vector<4x8xbf16>
    %cst_4 = arith.constant dense<0.000000e+00> : vector<128x8xf32>
    %10 = tpu.matmul %8, %9, %cst_4 {dimension_numbers = #tpu.dot_dimension_numbers<[1], [0], [0], [1], [0, 0, 1, 1], [], []>} : vector<128x4xbf16>, vector<4x8xbf16>, vector<128x8xf32> -> vector<128x8xf32>
    %11 = arith.addf %2, %10 : vector<128x8xf32>
    %12 = vector.extract_strided_slice %6 {offsets = [0, 1, 0], sizes = [8, 16, 4], strides = [1, 1, 1]} : vector<8x18x4xbf16> to vector<8x16x4xbf16>
    %13 = vector.shape_cast %12 : vector<8x16x4xbf16> to vector<128x4xbf16>
    %c4 = arith.constant 4 : index
    %c0_5 = arith.constant 0 : index
    %14 = vector.load %arg3[%c4, %c0_5] : memref<36x8xbf16, #tpu.memory_space<vmem>>, vector<4x8xbf16>
    %cst_6 = arith.constant dense<0.000000e+00> : vector<128x8xf32>
    %15 = tpu.matmul %13, %14, %cst_6 {dimension_numbers = #tpu.dot_dimension_numbers<[1], [0], [0], [1], [0, 0, 1, 1], [], []>} : vector<128x4xbf16>, vector<4x8xbf16>, vector<128x8xf32> -> vector<128x8xf32>
    %16 = arith.addf %11, %15 : vector<128x8xf32>
    %17 = vector.extract_strided_slice %6 {offsets = [0, 2, 0], sizes = [8, 16, 4], strides = [1, 1, 1]} : vector<8x18x4xbf16> to vector<8x16x4xbf16>
    %18 = vector.shape_cast %17 : vector<8x16x4xbf16> to vector<128x4xbf16>
    %c8 = arith.constant 8 : index
    %c0_7 = arith.constant 0 : index
    %19 = vector.load %arg3[%c8, %c0_7] : memref<36x8xbf16, #tpu.memory_space<vmem>>, vector<4x8xbf16>
    %cst_8 = arith.constant dense<0.000000e+00> : vector<128x8xf32>
    %20 = tpu.matmul %18, %19, %cst_8 {dimension_numbers = #tpu.dot_dimension_numbers<[1], [0], [0], [1], [0, 0, 1, 1], [], []>} : vector<128x4xbf16>, vector<4x8xbf16>, vector<128x8xf32> -> vector<128x8xf32>
    %21 = arith.addf %16, %20 : vector<128x8xf32>
    %c1_i32 = arith.constant 1 : i32
    %22 = arith.addi %1, %c1_i32 : i32
    %c0_9 = arith.constant 0 : index
    %23 = arith.index_cast %22 : i32 to index
    %c0_10 = arith.constant 0 : index
    %c0_11 = arith.constant 0 : index
    %24 = vector.load %arg2[%c0_9, %23, %c0_10, %c0_11] : memref<1x18x18x4xbf16, #tpu.memory_space<vmem>>, vector<1x8x18x4xbf16>
    %25 = vector.shape_cast %24 : vector<1x8x18x4xbf16> to vector<8x18x4xbf16>
    %26 = vector.extract_strided_slice %25 {offsets = [0, 0, 0], sizes = [8, 16, 4], strides = [1, 1, 1]} : vector<8x18x4xbf16> to vector<8x16x4xbf16>
    %27 = vector.shape_cast %26 : vector<8x16x4xbf16> to vector<128x4xbf16>
    %c12 = arith.constant 12 : index
    %c0_12 = arith.constant 0 : index
    %28 = vector.load %arg3[%c12, %c0_12] : memref<36x8xbf16, #tpu.memory_space<vmem>>, vector<4x8xbf16>
    %cst_13 = arith.constant dense<0.000000e+00> : vector<128x8xf32>
    %29 = tpu.matmul %27, %28, %cst_13 {dimension_numbers = #tpu.dot_dimension_numbers<[1], [0], [0], [1], [0, 0, 1, 1], [], []>} : vector<128x4xbf16>, vector<4x8xbf16>, vector<128x8xf32> -> vector<128x8xf32>
    %30 = arith.addf %21, %29 : vector<128x8xf32>
    %31 = vector.extract_strided_slice %25 {offsets = [0, 1, 0], sizes = [8, 16, 4], strides = [1, 1, 1]} : vector<8x18x4xbf16> to vector<8x16x4xbf16>
    %32 = vector.shape_cast %31 : vector<8x16x4xbf16> to vector<128x4xbf16>
    %c16 = arith.constant 16 : index
    %c0_14 = arith.constant 0 : index
    %33 = vector.load %arg3[%c16, %c0_14] : memref<36x8xbf16, #tpu.memory_space<vmem>>, vector<4x8xbf16>
    %cst_15 = arith.constant dense<0.000000e+00> : vector<128x8xf32>
    %34 = tpu.matmul %32, %33, %cst_15 {dimension_numbers = #tpu.dot_dimension_numbers<[1], [0], [0], [1], [0, 0, 1, 1], [], []>} : vector<128x4xbf16>, vector<4x8xbf16>, vector<128x8xf32> -> vector<128x8xf32>
    %35 = arith.addf %30, %34 : vector<128x8xf32>
    %36 = vector.extract_strided_slice %25 {offsets = [0, 2, 0], sizes = [8, 16, 4], strides = [1, 1, 1]} : vector<8x18x4xbf16> to vector<8x16x4xbf16>
    %37 = vector.shape_cast %36 : vector<8x16x4xbf16> to vector<128x4xbf16>
    %c20 = arith.constant 20 : index
    %c0_16 = arith.constant 0 : index
    %38 = vector.load %arg3[%c20, %c0_16] : memref<36x8xbf16, #tpu.memory_space<vmem>>, vector<4x8xbf16>
    %cst_17 = arith.constant dense<0.000000e+00> : vector<128x8xf32>
    %39 = tpu.matmul %37, %38, %cst_17 {dimension_numbers = #tpu.dot_dimension_numbers<[1], [0], [0], [1], [0, 0, 1, 1], [], []>} : vector<128x4xbf16>, vector<4x8xbf16>, vector<128x8xf32> -> vector<128x8xf32>
    %40 = arith.addf %35, %39 : vector<128x8xf32>
    %c2_i32 = arith.constant 2 : i32
    %41 = arith.addi %1, %c2_i32 : i32
    %c0_18 = arith.constant 0 : index
    %42 = arith.index_cast %41 : i32 to index
    %c0_19 = arith.constant 0 : index
    %c0_20 = arith.constant 0 : index
    %43 = vector.load %arg2[%c0_18, %42, %c0_19, %c0_20] : memref<1x18x18x4xbf16, #tpu.memory_space<vmem>>, vector<1x8x18x4xbf16>
    %44 = vector.shape_cast %43 : vector<1x8x18x4xbf16> to vector<8x18x4xbf16>
    %45 = vector.extract_strided_slice %44 {offsets = [0, 0, 0], sizes = [8, 16, 4], strides = [1, 1, 1]} : vector<8x18x4xbf16> to vector<8x16x4xbf16>
    %46 = vector.shape_cast %45 : vector<8x16x4xbf16> to vector<128x4xbf16>
    %c24 = arith.constant 24 : index
    %c0_21 = arith.constant 0 : index
    %47 = vector.load %arg3[%c24, %c0_21] : memref<36x8xbf16, #tpu.memory_space<vmem>>, vector<4x8xbf16>
    %cst_22 = arith.constant dense<0.000000e+00> : vector<128x8xf32>
    %48 = tpu.matmul %46, %47, %cst_22 {dimension_numbers = #tpu.dot_dimension_numbers<[1], [0], [0], [1], [0, 0, 1, 1], [], []>} : vector<128x4xbf16>, vector<4x8xbf16>, vector<128x8xf32> -> vector<128x8xf32>
    %49 = arith.addf %40, %48 : vector<128x8xf32>
    %50 = vector.extract_strided_slice %44 {offsets = [0, 1, 0], sizes = [8, 16, 4], strides = [1, 1, 1]} : vector<8x18x4xbf16> to vector<8x16x4xbf16>
    %51 = vector.shape_cast %50 : vector<8x16x4xbf16> to vector<128x4xbf16>
    %c28 = arith.constant 28 : index
    %c0_23 = arith.constant 0 : index
    %52 = vector.load %arg3[%c28, %c0_23] : memref<36x8xbf16, #tpu.memory_space<vmem>>, vector<4x8xbf16>
    %cst_24 = arith.constant dense<0.000000e+00> : vector<128x8xf32>
    %53 = tpu.matmul %51, %52, %cst_24 {dimension_numbers = #tpu.dot_dimension_numbers<[1], [0], [0], [1], [0, 0, 1, 1], [], []>} : vector<128x4xbf16>, vector<4x8xbf16>, vector<128x8xf32> -> vector<128x8xf32>
    %54 = arith.addf %49, %53 : vector<128x8xf32>
    %55 = vector.extract_strided_slice %44 {offsets = [0, 2, 0], sizes = [8, 16, 4], strides = [1, 1, 1]} : vector<8x18x4xbf16> to vector<8x16x4xbf16>
    %56 = vector.shape_cast %55 : vector<8x16x4xbf16> to vector<128x4xbf16>
    %c32 = arith.constant 32 : index
    %c0_25 = arith.constant 0 : index
    %57 = vector.load %arg3[%c32, %c0_25] : memref<36x8xbf16, #tpu.memory_space<vmem>>, vector<4x8xbf16>
    %cst_26 = arith.constant dense<0.000000e+00> : vector<128x8xf32>
    %58 = tpu.matmul %56, %57, %cst_26 {dimension_numbers = #tpu.dot_dimension_numbers<[1], [0], [0], [1], [0, 0, 1, 1], [], []>} : vector<128x4xbf16>, vector<4x8xbf16>, vector<128x8xf32> -> vector<128x8xf32>
    %59 = arith.addf %54, %58 : vector<128x8xf32>
    %60 = arith.truncf %59 : vector<128x8xf32> to vector<128x8xbf16>
    %c0_27 = arith.constant 0 : index
    %c0_28 = arith.constant 0 : index
    %c0_29 = arith.constant 0 : index
    %61 = vector.load %arg4[%c0_27, %c0_28, %c0_29] : memref<1x128x8xbf16, #tpu.memory_space<vmem>>, vector<1x128x8xbf16>
    %62 = vector.shape_cast %61 : vector<1x128x8xbf16> to vector<128x8xbf16>
    %63 = vector.shape_cast %60 : vector<128x8xbf16> to vector<1x128x8xbf16>
    tpu.vector_store %arg4[%c0_27, %c0_28, %c0_29], %63 {strides = array<i32>} : memref<1x128x8xbf16, #tpu.memory_space<vmem>>, vector<1x128x8xbf16>,
    %c0_i32_30 = arith.constant 0 : i32
    %64 = arith.cmpi eq, %arg1, %c0_i32_30 : i32
    %65 = arith.extui %64 : i1 to i32
    %c0_i32_31 = arith.constant 0 : i32
    %66 = arith.cmpi ne, %65, %c0_i32_31 : i32
    scf.if %66 {
      %cst_40 = arith.constant 0.000000e+00 : f32
      %79 = vector.broadcast %cst_40 : f32 to vector<2x8xf32>
      %c0_41 = arith.constant 0 : index
      %c0_42 = arith.constant 0 : index
      %c0_43 = arith.constant 0 : index
      %80 = vector.load %arg5[%c0_41, %c0_42, %c0_43] : memref<1x2x8xf32, #tpu.memory_space<vmem>>, vector<1x2x8xf32>
      %81 = vector.shape_cast %80 : vector<1x2x8xf32> to vector<2x8xf32>
      %82 = vector.shape_cast %79 : vector<2x8xf32> to vector<1x2x8xf32>
      tpu.vector_store %arg5[%c0_41, %c0_42, %c0_43], %82 {strides = array<i32>} : memref<1x2x8xf32, #tpu.memory_space<vmem>>, vector<1x2x8xf32>,
    } else {
    }
    %c0_32 = arith.constant 0 : index
    %c0_33 = arith.constant 0 : index
    %c0_34 = arith.constant 0 : index
    %67 = vector.load %arg5[%c0_32, %c0_33, %c0_34] : memref<1x2x8xf32, #tpu.memory_space<vmem>>, vector<1x2x8xf32>
    %68 = vector.shape_cast %67 : vector<1x2x8xf32> to vector<2x8xf32>
    %cst_35 = arith.constant dense<0.000000e+00> : vector<8xf32>
    %69 = vector.multi_reduction <add>, %59, %cst_35 [0] : vector<128x8xf32> to vector<8xf32>
    %70 = vector.shape_cast %69 : vector<8xf32> to vector<1x8xf32>
    %71 = arith.mulf %59, %59 : vector<128x8xf32>
    %cst_36 = arith.constant dense<0.000000e+00> : vector<8xf32>
    %72 = vector.multi_reduction <add>, %71, %cst_36 [0] : vector<128x8xf32> to vector<8xf32>
    %73 = vector.shape_cast %72 : vector<8xf32> to vector<1x8xf32>
    %74 = tpu.concatenate %70, %73 in 0 : vector<1x8xf32>, vector<1x8xf32> -> vector<2x8xf32>
    %75 = arith.addf %68, %74 : vector<2x8xf32>
    %c0_37 = arith.constant 0 : index
    %c0_38 = arith.constant 0 : index
    %c0_39 = arith.constant 0 : index
    %76 = vector.load %arg5[%c0_37, %c0_38, %c0_39] : memref<1x2x8xf32, #tpu.memory_space<vmem>>, vector<1x2x8xf32>
    %77 = vector.shape_cast %76 : vector<1x2x8xf32> to vector<2x8xf32>
    %78 = vector.shape_cast %75 : vector<2x8xf32> to vector<1x2x8xf32>
    tpu.vector_store %arg5[%c0_37, %c0_38, %c0_39], %78 {strides = array<i32>} : memref<1x2x8xf32, #tpu.memory_space<vmem>>, vector<1x2x8xf32>,
    return
  }
  func.func @transform_0(%arg0: i32, %arg1: i32) -> (i32, i32, i32, i32) {
    %c0_i32 = arith.constant 0 : i32
    %c0_i32_0 = arith.constant 0 : i32
    %c0_i32_1 = arith.constant 0 : i32
    %c0_i32_2 = arith.constant 0 : i32
    return %arg0, %c0_i32, %c0_i32_0, %c0_i32_1 : i32, i32, i32, i32
  }
  func.func @transform_1(%arg0: i32, %arg1: i32) -> (i32, i32) {
    %c0_i32 = arith.constant 0 : i32
    %c0_i32_0 = arith.constant 0 : i32
    %c0_i32_1 = arith.constant 0 : i32
    return %c0_i32, %c0_i32_0 : i32, i32
  }
  func.func @transform_2(%arg0: i32, %arg1: i32) -> (i32, i32, i32) {
    %c0_i32 = arith.constant 0 : i32
    %c0_i32_0 = arith.constant 0 : i32
    return %arg0, %arg1, %c0_i32 : i32, i32, i32
  }
  func.func @transform_3(%arg0: i32, %arg1: i32) -> (i32, i32, i32) {
    %c0_i32 = arith.constant 0 : i32
    %c0_i32_0 = arith.constant 0 : i32
    %c0_i32_1 = arith.constant 0 : i32
    return %arg0, %c0_i32, %c0_i32_0 : i32, i32, i32
  }
}

</mosaic_0001>

<bundles_post_ra>
// kernel: tpu_custom_call.1
= control target key start
LH: loop header
LB: loop body
LE: loop exit
PB: predicated region body
PF: predicated region fallthrough
CT: control target
= control target key end

     0   :  { %9 = vsyncpa [#allocation3], 0  ;;  %s5088_s0 = inlined_call_operand.vmem [shape: bf16[2,18,18,4], index: 0, kind: input, shape index: {}]   ;;  %s5089_s1 = inlined_call_operand.vmem [shape: bf16[36,8], index: 1, kind: input, shape index: {}]   ;;  %s5090_s2 = inlined_call_operand.vmem [shape: bf16[2,256,8], index: 2, kind: output, shape index: {0}]   ;;  %s5091_s3 = inlined_call_operand.hbm [shape: f32[2,2,8], index: 3, kind: output, shape index: {1}]  }
   0x1   :  { %11 = vsyncpa [#allocation3 + $0x1], 0  ;;  %s3796_s12 = smov 0   ;;  %s3798_s13 = smov 0  }
   0x2   :  { %s3800_s14 = smov 0   ;;  %s3802_s15 = smov 0  }
   0x3   :  { %s3804_s16 = smov 0   ;;  %s3806_s17 = smov 0  }
   0x4   :  { %s3808_s18 = smov 0   ;;  %s3810_s19 = smov 0  }
   0x5 LB: > { %s2911_s20 = sadd.s32 4294967295, %s3772_s19   ;;  %s2912_s21 = sadd.s32 4294967294, %s3772_s19   ;;  %s3772_s19 = sphi %s3810_s19, %s17_s19   ;;  %s3768_s18 = sphi %s3808_s18, %s5181_s18   ;;  %s3764_s17 = sphi %s3806_s17, %s5180_s17   ;;  %s3760_s16 = sphi %s3804_s16, %s5179_s16   ;;  %s3756_s15 = sphi %s3802_s15, %s5178_s15   ;;  %s3752_s14 = sphi %s3800_s14, %s5177_s14   ;;  %s3748_s13 = sphi %s3798_s13, %s5176_s13   ;;  %s3744_s12 = sphi %s3796_s12, %s5175_s12  }
   0x6   : > { %s26_s22 = sadd.s32 1, %s3764_s17  ;;  %s29_s23 = sadd.s32 1, %s3768_s18 }
   0x7   : > { %p27_p0 = scmp.ge.s32.totalorder %s26_s22, 2  ;;  %p121_p1 = scmp.ne.s32.totalorder %s3752_s14, %s3748_s13 }
   0x8   : > { %p122_p2 = scmp.eq.s32.totalorder %s2911_s20, 3  ;;  %p127_p4 = scmp.ne.s32.totalorder %s3748_s13, %s3744_s12 }
   0x9   : > { %s5183_s22 = smov (%p27_p0, %s26_s22), 0  ;;  %s5185_s23 = smov (!%p27_p0, %s29_s23), %s3768_s18 }
   0xa   : > { %p3845_p3 = por %p122_p2, %p121_p1  ;;  %p31_p5 = scmp.ge.s32.totalorder %s5185_s23, 2 }
   0xb   : > { %p128_p6 = scmp.eq.s32.totalorder %s2912_s21, 3  ;;  %p2915_p7 = scmp.ge.s32.totalorder %s3772_s19, 1 }
   0xc   : > { %p157_p8 = scmp.lt.s32.totalorder %s3772_s19, 5  ;;  %s5187_s23 = smov (%p31_p5, %s5185_s23), 0 }
   0xd   : > { %p3855_p9 = por %p128_p6, %p127_p4  ;;  %s108_s26 = ssub.s32 %s3768_s18, %s5187_s23 }
   0xe   : > { %p158_p10 = pnand %p2915_p7, %p157_p8  ;;  %s111_s27 = sadd.s32 1, %s3752_s14 }
   0xf   : > { %p109_p11 = scmp.eq.s32.totalorder %s108_s26, 0 }
  0x10   : > { %161 = sbr.rel (%p158_p10) target bundleno = 490 (0x1ea), region = 28 }
  0x11   : > { %s3863_s28 = scalar_select %p109_p11, %s3752_s14, %s111_s27  }
  0x17   : > { %s187_s29 = sand.u32 1, %s3748_s13   ;;  %v3642_v0 = vld [vmem:[%s5089_s1] ss:$0 sps:$4 sm:$0xcc]   ;;  %vm484_vm0 = vcmask 1041408   ;;  %p190_p12 = scmp.lt.s32.totalorder %s3760_s16, 1 }
  0x18   : > { %s3871_s5 = sshll.u32 %s187_s29, 1  ;;  %v1386_v1 = vld [vmem:[%s5089_s1 + $0x8] sm:$0x3]  ;;  %v458_v2 = vrot.slane %v3642_v0, 2  ;;  %s3169_s8 = smul.u32 96, %s3756_s15  ;;  %vm459_vm3 = vcmask 31744  }
  0x19   : > { %3563 = vmatprep.subr.msk.bf16.mxu0 %vm484_vm0, %v1386_v1  ;;  %v3879_v3 = vsel %vm484_vm0, %v1386_v1, 0  ;;  %s3884_s9 = scalar_select %p190_p12, %s3760_s16, 1  ;;  %v234_v4 = vld [vmem:[%s5089_s1] sm:$0x3]  ;;  %vm235_vm1 = vsmask.f32 3328 }
  0x1a   : > { %5116 = vst [vmem:[#allocation5_spill] sm:$0xff] %v3879_v3  ;;  %3340 = vmatpush3.bf16.msra.mxu0 %v3879_v3  ;;  %3559 = vmatprep.subr.msk.bf16.mxu1 %vm484_vm0, %v458_v2  ;;  %v486_v5 = vsel %vm484_vm0, %v458_v2, 0  ;;  %v3894_v6 = vld [vmem:[%s5089_s1 + $0x8] ss:$0 sps:$4 sm:$0xcc]   ;;  %v3931_v19 = vsel %vm484_vm0, %v234_v4, 0 }
  0x1b   : > { %3268 = vmatpush3.bf16.msra.mxu1 %v486_v5  ;;  %s3569_s26 = smul.u32 216, %s3884_s9  ;;  %v1643_v7 = vrot.slane %v3894_v6, 2  ;;  %vm236_vm2 = vsmask.f32 7440  ;;  %v3936_v24 = vld [vmem:[%s5089_s1 + $0xc] sm:$0x3] }
  0x1c   : > { %3560 = vmatprep.subr.msk.bf16.mxu1 %vm484_vm0, %v234_v4  ;;  %vm3951_vm4 = vmor %vm235_vm1, %vm236_vm2  ;;  %v3957_v39 = vsel %vm484_vm0, %v3936_v24, 0  ;;  %vm757_vm5 = vcmask 1042432   ;;  %vm758_vm6 = vcmask 1046532   ;;  %s2919_s10 = sshll.u32 %s3884_s9, 5  ;;  %vm2647_vm8 = vcmask 60416   ;;  %s4942_s9 = scalar_lea.vmem [#allocation2], %s3871_s5 }
  0x1d   : > { %s194_s4 = scalar_lea.vmem %s5088_s0, %s3569_s26  ;;  %3565 = vmatprep.subr.msk.bf16.mxu0 %vm484_vm0, %v1643_v7  ;;  %v3987_v4 = vsel %vm484_vm0, %v1643_v7, 0  ;;  %vm4114_vm7 = vmor %vm757_vm5, %vm758_vm6  ;;  %p3164_p0 = scmp.ne.s32.totalorder %s3756_s15, 0 }
  0x1e   : > { %s3902_s6 = scalar_lea.vmem %s194_s4, %s3169_s8  ;;  %vm2668_vm9 = vcmask (!%p3164_p0), 58368  }
  0x1f   : > { %v3908_v8 = vld [vmem:[%s3902_s6] sm:$0xf]  ;;  %v3911_v9 = vld [vmem:[%s3902_s6 + $0x4] sm:$0xf]  ;;  %v3914_v10 = vld [vmem:[%s3902_s6 + $0x8] sm:$0x1] }
  0x20   : > { %v239_v11 = vshrl.u32 %v3908_v8, 16  ;;  %v242_v12 = vshll.u32 %v3908_v8, 16  ;;  %v248_v13 = vshll.u32 %v3911_v9, 16  ;;  %v252_v14 = vshrl.u32 %v3911_v9, 16  ;;  %v3921_v15 = vld [vmem:[%s3902_s6 + $0xc] sm:$0xf] }
  0x21   : > { %v258_v16 = vshll.u32 %v3914_v10, 16  ;;  %v3925_v17 = vld [vmem:[%s3902_s6 + $0x10] sm:$0xf]  ;;  %v3928_v18 = vld [vmem:[%s3902_s6 + $0x14] sm:$0x1]  ;;  %v1195_v26 = vshrl.u32 %v3921_v15, 16 }
  0x22   : > { %v241_v20 = vrot.slane %v239_v11, 4  ;;  %v244_v21 = vrot.slane %v242_v12, 5  ;;  %v250_v22 = vrot.slane %v248_v13, 5  ;;  %v254_v23 = vrot.slane %v252_v14, 4  ;;  %v3944_v33 = vld [vmem:[%s3902_s6 + $0xc] sm:$0xf] }
  0x23   : > { %v260_v25 = vrot.slane %v258_v16, 5  ;;  %v1198_v27 = vshll.u32 %v3921_v15, 16  ;;  %v1204_v28 = vshll.u32 %v3925_v17, 16  ;;  %v1208_v31 = vshrl.u32 %v3925_v17, 16  ;;  %v3947_v34 = vld [vmem:[%s3902_s6 + $0x10] sm:$0xf] }
  0x24   : > { %v245_v29 = vor.u32 %v244_v21, %v241_v20  ;;  %v255_v30 = vor.u32 %v254_v23, %v250_v22  ;;  %v1214_v32 = vshll.u32 %v3928_v18, 16  ;;  %v1197_v36 = vrot.slane %v1195_v26, 4  ;;  %v3960_v45 = vld [vmem:[%s3902_s6 + $0x14] sm:$0x1]  ;;  %v3971_v57 = vld [vmem:[%s3902_s6 + $0x18] sm:$0xf] }
  0x25   : > { %v1200_v37 = vrot.slane %v1198_v27, 5  ;;  %v1206_v38 = vrot.slane %v1204_v28, 5  ;;  %v1210_v42 = vrot.slane %v1208_v31, 4  ;;  %v263_v46 = vshrl.u32 %v3944_v33, 16  ;;  %v3975_v62 = vld [vmem:[%s3902_s6 + $0x1c] sm:$0xf] }
  0x26   : > { %v246_v40 = vrot.slane %v245_v29, 4  ;;  %v256_v41 = vrot.slane %v255_v30, 4  ;;  %v1216_v43 = vrot.slane %v1214_v32, 5  ;;  %v266_v47 = vshll.u32 %v3944_v33, 16  ;;  %v3982_v2 = vld [vmem:[%s3902_s6 + $0x20] sm:$0x1] }
  0x27   : > { %v1201_v44 = vor.u32 %v1200_v37, %v1197_v36  ;;  %v272_v48 = vshll.u32 %v3947_v34, 16  ;;  %v1211_v51 = vor.u32 %v1210_v42, %v1206_v38  ;;  %v276_v52 = vshrl.u32 %v3947_v34, 16  ;;  %v4000_v26 = vld [vmem:[%s3902_s6 + $0x1c] sm:$0xf]  ;;  %v4007_v31 = vld [vmem:[%s3902_s6 + $0x20] sm:$0x1] }
  0x28   : > { %v251_v49 = vsel %vm3951_vm4, %v246_v40, %v250_v22  ;;  %v261_v50 = vsel %vm3951_vm4, %v256_v41, %v260_v25  ;;  %v265_v55 = vrot.slane %v263_v46, 4  ;;  %v268_v56 = vrot.slane %v266_v47, 5  ;;  %v3995_v22 = vld [vmem:[%s3902_s6 + $0x18] sm:$0xf]  ;;  %v4013_v40 = vld [vmem:[%s3902_s6 + $0x24] sm:$0xf] }
  0x29   : > { %v2924_v53 = vcombine.low %v251_v49, %v261_v50  ;;  %v1202_v54 = vrot.slane %v1201_v44, 4  ;;  %v1212_v58 = vrot.slane %v1211_v51, 4  ;;  %v274_v59 = vrot.slane %v272_v48, 5  ;;  %v4023_v50 = vld [vmem:[%s5089_s1 + $0x4] sm:$0x3] }
  0x2a   : > { %v278_v60 = vrot.slane %v276_v52, 4  ;;  %v282_v61 = vshll.u32 %v3960_v45, 16  ;;  %v1564_v0 = vrot.slane %v3928_v18, 5  ;;  %v269_v1 = vor.u32 %v268_v56, %v265_v55 }
  0x2b   : > { %3269 = vmatprep.mubr.msk.bf16.mxu1 %vm459_vm3, %v2924_v53  ;;  %v1207_v63 = vsel %vm3951_vm4, %v1202_v54, %v1206_v38  ;;  %v1217_v5 = vsel %vm3951_vm4, %v1212_v58, %v1216_v43  ;;  %v1219_v13 = vshrl.u32 %v3971_v57, 16  ;;  %v1222_v20 = vshll.u32 %v3971_v57, 16  ;;  %v4027_v54 = vld [vmem:[%s3902_s6 + $0x28] sm:$0xf] }
  0x2c   : > { %v279_v11 = vor.u32 %v278_v60, %v274_v59  ;;  %v284_v12 = vrot.slane %v282_v61, 5  ;;  %v3024_v14 = vcombine.low %v1207_v63, %v1217_v5  ;;  %v270_v16 = vrot.slane %v269_v1, 4  ;;  %v4032_v61 = vld [vmem:[%s3902_s6 + $0x2c] sm:$0x1] }
  0x2d   : > { %v1228_v21 = vshll.u32 %v3975_v62, 16  ;;  %v1221_v7 = vrot.slane %v1219_v13, 4  ;;  %v1232_v23 = vshrl.u32 %v3975_v62, 16  ;;  %v1238_v25 = vshll.u32 %v3982_v2, 16 }
  0x2e   : > { %v280_v6 = vrot.slane %v279_v11, 4  ;;  %3341 = vmatprep.mubr.msk.bf16.mxu0 %vm459_vm3, %v3024_v14  ;;  %v275_v27 = vsel %vm3951_vm4, %v270_v16, %v274_v59  ;;  %v1224_v28 = vrot.slane %v1222_v20, 5  ;;  %v1568_v30 = vrot.slane %v3975_v62, 5 }
  0x2f   : > { %v1230_v29 = vrot.slane %v1228_v21, 5  ;;  %v1234_v36 = vrot.slane %v1232_v23, 4  ;;  %v1240_v37 = vrot.slane %v1238_v25, 5  ;;  %v1571_v38 = vrot.slane %v3982_v2, 5  ;;  %v4048_v23 = vld [vmem:[%s3902_s6 + $0x28] sm:$0xf] }
  0x30   : > { %v285_v32 = vsel %vm3951_vm4, %v280_v6, %v284_v12  ;;  %v1225_v42 = vor.u32 %v1224_v28, %v1221_v7  ;;  %v287_v43 = vshrl.u32 %v3995_v22, 16  ;;  %v290_v44 = vshll.u32 %v3995_v22, 16  ;;  %v4038_v12 = vld [vmem:[%s3902_s6 + $0x24] sm:$0xf] }
  0x31   : > { %v2925_v41 = vcombine.low %v275_v27, %v285_v32  ;;  %v1235_v46 = vor.u32 %v1234_v36, %v1230_v29  ;;  %v296_v47 = vshll.u32 %v4000_v26, 16  ;;  %v300_v48 = vshrl.u32 %v4000_v26, 16 }
  0x32   : > { %v306_v49 = vshll.u32 %v4007_v31, 16  ;;  %v1226_v51 = vrot.slane %v1225_v42, 4  ;;  %v289_v52 = vrot.slane %v287_v43, 4  ;;  %v292_v53 = vrot.slane %v290_v44, 5  ;;  %v4059_v43 = vld [vmem:[%s3902_s6 + $0x30] sm:$0xf] }
  0x33   : > { %3270 = vmatmul.mubr.msk.bf16.vlgmr.msra.gmra.mrb[0].mxu1 %vm459_vm3, %v2925_v41  ;;  %v1243_v55 = vshrl.u32 %v4013_v40, 16  ;;  %v1236_v56 = vrot.slane %v1235_v46, 4  ;;  %v298_v58 = vrot.slane %v296_v47, 5  ;;  %v302_v59 = vrot.slane %v300_v48, 4  ;;  %v4055_v41 = vld [vmem:[%s3902_s6 + $0x2c] sm:$0x1] }
  0x34   : > { %3286 = vmatpush3.bf16.msra.mxu1 %v3931_v19  ;;  %v308_v60 = vrot.slane %v306_v49, 5  ;;  %v1231_v63 = vsel %vm3951_vm4, %v1226_v51, %v1230_v29  ;;  %v293_v1 = vor.u32 %v292_v53, %v289_v52  ;;  %v1246_v11 = vshll.u32 %v4013_v40, 16 }
  0x35   : > { %v1245_v5 = vrot.slane %v1243_v55, 4  ;;  %3561 = vmatprep.subr.msk.bf16.mxu1 %vm484_vm0, %v4023_v50  ;;  %v1241_v19 = vsel %vm3951_vm4, %v1236_v56, %v1240_v37  ;;  %v303_v13 = vor.u32 %v302_v59, %v298_v58  ;;  %v1252_v14 = vshll.u32 %v4027_v54, 16  ;;  %v4067_v55 = vld [vmem:[%s3902_s6 + $0x34] sm:$0xf] }
  0x36   : > { %v1256_v16 = vshrl.u32 %v4027_v54, 16  ;;  %v3025_v20 = vcombine.low %v1231_v63, %v1241_v19  ;;  %v294_v21 = vrot.slane %v293_v1, 4  ;;  %v1248_v6 = vrot.slane %v1246_v11, 5  ;;  %5119 = vst [vmem:[#allocation6_spill] sm:$0xff] %v4067_v55  ;;  %v4081_v19 = vld [vmem:[%s3902_s6 + $0x30] sm:$0xf] }
  0x37   : > { %v1262_v7 = vshll.u32 %v4032_v61, 16  ;;  %v304_v25 = vrot.slane %v303_v13, 4  ;;  %v1254_v27 = vrot.slane %v1252_v14, 5  ;;  %v311_v29 = vshrl.u32 %v4038_v12, 16 }
  0x38   : > { %v1258_v28 = vrot.slane %v1256_v16, 4  ;;  %3342 = vmatmul.mubr.msk.bf16.vlgmr.msra.gmra.mrb[0].mxu0 %vm459_vm3, %v3025_v20  ;;  %v299_v32 = vsel %vm3951_vm4, %v294_v21, %v298_v58  ;;  %v1249_v36 = vor.u32 %v1248_v6, %v1245_v5  ;;  %v314_v42 = vshll.u32 %v4038_v12, 16  ;;  %v4077_v5 = vld [vmem:[%s3902_s6 + $0x38] sm:$0x1] }
  0x39   : > { %v1264_v37 = vrot.slane %v1262_v7, 5  ;;  %3358 = vmatpush3.bf16.msra.mxu0 %v3987_v4  ;;  %v309_v44 = vsel %vm3951_vm4, %v304_v25, %v308_v60  ;;  %v313_v47 = vrot.slane %v311_v29, 4  ;;  %v320_v48 = vshll.u32 %v4048_v23, 16  ;;  %v4087_v25 = vld [vmem:[%s3902_s6 + $0x34] sm:$0xf] }
  0x3a   : > { %v1259_v46 = vor.u32 %v1258_v28, %v1254_v27  ;;  %v2926_v49 = vcombine.low %v299_v32, %v309_v44  ;;  %v1250_v51 = vrot.slane %v1249_v36, 4  ;;  %v316_v52 = vrot.slane %v314_v42, 5  ;;  %3566 = vmatprep.subr.msk.bf16.mxu0 %vm484_vm0, %v3936_v24  ;;  %v4096_v44 = vld [vmem:[%s3902_s6 + $0x38] sm:$0x1] }
  0x3b   : > { %v324_v53 = vshrl.u32 %v4048_v23, 16  ;;  %v322_v56 = vrot.slane %v320_v48, 5  ;;  %v330_v58 = vshll.u32 %v4055_v41, 16  ;;  %v1267_v59 = vshrl.u32 %v4059_v43, 16 }
  0x3c   : > { %v1260_v4 = vrot.slane %v1259_v46, 4  ;;  %3273 = vmatprep.mubr.msk.bf16.mxu1 %vm459_vm3, %v2926_v49  ;;  %v1255_v60 = vsel %vm3951_vm4, %v1250_v51, %v1254_v27  ;;  %v317_v63 = vor.u32 %v316_v52, %v313_v47  ;;  %v1270_v11 = vshll.u32 %v4059_v43, 16 }
  0x3d   : > { %v326_v1 = vrot.slane %v324_v53, 4  ;;  %v332_v13 = vrot.slane %v330_v58, 5  ;;  %v1269_v14 = vrot.slane %v1267_v59, 4  ;;  %v1276_v16 = vshll.u32 %v4067_v55, 16 }
  0x3e   : > { %v1265_v24 = vsel %vm3951_vm4, %v1260_v4, %v1264_v37  ;;  %v318_v21 = vrot.slane %v317_v63, 4  ;;  %v1272_v7 = vrot.slane %v1270_v11, 5  ;;  %v1280_v28 = vshrl.u32 %v4067_v55, 16  ;;  %v4108_v11 = vld [vmem:[%s3902_s6 + $0x40] sm:$0xf] }
  0x3f   : > { %v3026_v20 = vcombine.low %v1255_v60, %v1265_v24  ;;  %v327_v6 = vor.u32 %v326_v1, %v322_v56  ;;  %v1278_v27 = vrot.slane %v1276_v16, 5  ;;  %v1286_v29 = vshll.u32 %v4077_v5, 16 }
  0x40   : > { %v335_v32 = vshrl.u32 %v4081_v19, 16  ;;  %v323_v36 = vsel %vm3951_vm4, %v318_v21, %v322_v56  ;;  %v1273_v42 = vor.u32 %v1272_v7, %v1269_v14  ;;  %v338_v46 = vshll.u32 %v4081_v19, 16  ;;  %v4104_v56 = vld [vmem:[%s3902_s6 + $0x3c] sm:$0xf] }
  0x41   : > { %3345 = vmatprep.mubr.msk.bf16.mxu0 %vm459_vm3, %v3026_v20  ;;  %v328_v37 = vrot.slane %v327_v6, 4  ;;  %v1282_v47 = vrot.slane %v1280_v28, 4  ;;  %v1288_v48 = vrot.slane %v1286_v29, 5  ;;  %v344_v51 = vshll.u32 %v4087_v25, 16 }
  0x42   : > { %v337_v49 = vrot.slane %v335_v32, 4  ;;  %v1274_v53 = vrot.slane %v1273_v42, 4  ;;  %v340_v4 = vrot.slane %v338_v46, 5  ;;  %v348_v58 = vshrl.u32 %v4087_v25, 16  ;;  %v4123_v32 = vld [vmem:[%s3902_s6 + $0x44] sm:$0x1] }
  0x43   : > { %v333_v52 = vsel %vm3951_vm4, %v328_v37, %v332_v13  ;;  %v1283_v60 = vor.u32 %v1282_v47, %v1278_v27  ;;  %v346_v63 = vrot.slane %v344_v51, 5  ;;  %v354_v1 = vshll.u32 %v4096_v44, 16 }
  0x44   : > { %v2927_v59 = vcombine.low %v323_v36, %v333_v52  ;;  %v1279_v24 = vsel %vm3951_vm4, %v1274_v53, %v1278_v27  ;;  %v341_v14 = vor.u32 %v340_v4, %v337_v49  ;;  %v350_v16 = vrot.slane %v348_v58, 4 }
  0x45   : > { %v3040_v20 = vrot.slane %v3921_v15, 9  ;;  %v1284_v21 = vrot.slane %v1283_v60, 4  ;;  %v356_v6 = vrot.slane %v354_v1, 5  ;;  %v1561_v7 = vrot.slane %v3925_v17, 5 }
  0x46   : > { %3274 = vmatmul.mubr.msk.bf16.gmra.mrb[4].mxu1 %vm459_vm3, %v2927_v59  ;;  %v359_v28 = vshrl.u32 %v4104_v56, 16  ;;  %v342_v29 = vrot.slane %v341_v14, 4  ;;  %v351_v27 = vor.u32 %v350_v16, %v346_v63  ;;  %v362_v36 = vshll.u32 %v4104_v56, 16  ;;  %v4140_v59 = vld [vmem:[%s3902_s6 + $0x48] sm:$0xf] }
  0x47   : > { %v368_v37 = vshll.u32 %v4108_v11, 16  ;;  %v1289_v15 = vsel %vm3951_vm4, %v1284_v21, %v1288_v48  ;;  %v1562_v42 = vsel %vm4114_vm7, %v3040_v20, %v1561_v7  ;;  %v1563_v46 = vrot.slane %v1561_v7, 4  ;;  %v4157_v7 = vld [vmem:[%s3902_s6 + $0x50] sm:$0x1] }
  0x48   : > { %v361_v17 = vrot.slane %v359_v28, 4  ;;  %v3027_v47 = vcombine.low %v1279_v24, %v1289_v15  ;;  %v347_v49 = vsel %vm3951_vm4, %v342_v29, %v346_v63  ;;  %v352_v51 = vrot.slane %v351_v27, 4  ;;  %v4147_v24 = vld [vmem:[%s3902_s6 + $0x4c] sm:$0xf] }
  0x49   : > { %v364_v52 = vrot.slane %v362_v36, 5  ;;  %v1565_v53 = vsel %vm4114_vm7, %v1563_v46, %v1564_v0  ;;  %v370_v4 = vrot.slane %v368_v37, 5  ;;  %v372_v48 = vshrl.u32 %v4108_v11, 16  ;;  %v4171_v46 = vld [vmem:[%s3902_s6 + $0x54] sm:$0xf] }
  0x4a   : > { %v378_v58 = vshll.u32 %v4123_v32, 16  ;;  %3346 = vmatmul.mubr.msk.bf16.gmra.mrb[4].mxu0 %vm459_vm3, %v3027_v47  ;;  %v357_v60 = vsel %vm3951_vm4, %v352_v51, %v356_v6  ;;  %v3048_v63 = vcombine.low %v1562_v42, %v1565_v53  ;;  %v3041_v18 = vrot.slane %v3971_v57, 9 }
  0x4b   : > { %v365_v1 = vor.u32 %v364_v52, %v361_v17  ;;  %v2928_v0 = vcombine.low %v347_v49, %v357_v60  ;;  %v374_v14 = vrot.slane %v372_v48, 4  ;;  %v1570_v20 = vrot.slane %v1568_v30, 4  ;;  %v4178_v48 = vld [vmem:[%s3902_s6 + $0x58] sm:$0xf] }
  0x4c   : > { %v380_v16 = vrot.slane %v378_v58, 5  ;;  %3359 = vmatprep.mubr.msk.bf16.mxu0 %vm459_vm3, %v3048_v63  ;;  %v1569_v6 = vsel %vm4114_vm7, %v3041_v18, %v1568_v30  ;;  %v383_v57 = vshrl.u32 %v4140_v59, 16  ;;  %v386_v28 = vshll.u32 %v4140_v59, 16  ;;  %v4183_v63 = vld [vmem:[%s3902_s6 + $0x5c] sm:$0x1] }
  0x4d   : > { %v366_v21 = vrot.slane %v365_v1, 4  ;;  %3277 = vmatprep.mubr.msk.bf16.mxu1 %vm459_vm3, %v2928_v0  ;;  %v375_v29 = vor.u32 %v374_v14, %v370_v4  ;;  %v1572_v27 = vsel %vm4114_vm7, %v1570_v20, %v1571_v38  ;;  %v392_v62 = vshll.u32 %v4147_v24, 16 }
  0x4e   : > { %v396_v36 = vshrl.u32 %v4147_v24, 16  ;;  %v3049_v37 = vcombine.low %v1569_v6, %v1572_v27  ;;  %v385_v15 = vrot.slane %v383_v57, 4  ;;  %v388_v42 = vrot.slane %v386_v28, 5 }
  0x4f   : > { %v371_v30 = vsel %vm3951_vm4, %v366_v21, %v370_v4  ;;  %v376_v17 = vrot.slane %v375_v29, 4  ;;  %v394_v47 = vrot.slane %v392_v62, 5  ;;  %v402_v49 = vshll.u32 %v4157_v7, 16 }
  0x50   : > { %v398_v2 = vrot.slane %v396_v36, 4  ;;  %v389_v38 = vor.u32 %v388_v42, %v385_v15  ;;  %v3042_v51 = vrot.slane %v4013_v40, 9  ;;  %v1575_v52 = vrot.slane %v4027_v54, 5 }
  0x51   : > { %v1578_v53 = vrot.slane %v4032_v61, 5  ;;  %v381_v4 = vsel %vm3951_vm4, %v376_v17, %v380_v16  ;;  %v404_v60 = vrot.slane %v402_v49, 5  ;;  %v407_v1 = vshrl.u32 %v4171_v46, 16 }
  0x52   : > { %v399_v58 = vor.u32 %v398_v2, %v394_v47  ;;  %v2929_v18 = vcombine.low %v371_v30, %v381_v4  ;;  %3360 = vmatmul.mubr.msk.bf16.vlgmr.msra.gmra.mrb[0].mxu0 %vm459_vm3, %v3049_v37  ;;  %v390_v40 = vrot.slane %v389_v38, 4  ;;  %v1576_v54 = vsel %vm4114_vm7, %v3042_v51, %v1575_v52  ;;  %v4205_v30 = vld [vmem:[%s3902_s6 + $0x40] sm:$0xf]  ;;  %v4208_v37 = vld [vmem:[%s3902_s6 + $0x44] sm:$0x1] }
  0x53   : > { %v1577_v61 = vrot.slane %v1575_v52, 4  ;;  %3376 = vmatpush3.bf16.msra.mxu0 %v3957_v39  ;;  %v409_v14 = vrot.slane %v407_v1, 4  ;;  %v410_v16 = vshll.u32 %v4171_v46, 16  ;;  %v416_v20 = vshll.u32 %v4178_v48, 16  ;;  %v4200_v39 = vld [vmem:[%s3902_s6 + $0x3c] sm:$0xf] }
  0x54   : > { %v400_v0 = vrot.slane %v399_v58, 4  ;;  %3278 = vmatmul.mubr.msk.bf16.gmra.mrb[8].mxu1 %vm459_vm3, %v2929_v18  ;;  %v395_v21 = vsel %vm3951_vm4, %v390_v40, %v394_v47  ;;  %v420_v57 = vshrl.u32 %v4178_v48, 16  ;;  %v426_v28 = vshll.u32 %v4183_v63, 16  ;;  %5122 = vst [vmem:[#allocation7_spill] sm:$0xff] %v4208_v37 }
  0x55   : > { %v1579_v6 = vsel %vm4114_vm7, %v1577_v61, %v1578_v53  ;;  %v412_v62 = vrot.slane %v410_v16, 5  ;;  %v418_v36 = vrot.slane %v416_v20, 5  ;;  %v3043_v17 = vrot.slane %v4059_v43, 9  ;;  %v4227_v61 = vld [vmem:[%s3902_s6 + $0x48] sm:$0xf] }
  0x56   : > { %v405_v29 = vsel %vm3951_vm4, %v400_v0, %v404_v60  ;;  %v3050_v27 = vcombine.low %v1576_v54, %v1579_v6  ;;  %v422_v42 = vrot.slane %v420_v57, 4  ;;  %v1582_v2 = vrot.slane %v4067_v55, 5  ;;  %v4230_v0 = vld [vmem:[%s3902_s6 + $0x4c] sm:$0xf]  ;;  %v4242_v57 = vld [vmem:[%s3902_s6 + $0x54] sm:$0xf] }
  0x57   : > { %v2930_v15 = vcombine.low %v395_v21, %v405_v29  ;;  %v413_v47 = vor.u32 %v412_v62, %v409_v14  ;;  %v1585_v49 = vrot.slane %v4077_v5, 5  ;;  %v3044_v38 = vrot.slane %v4200_v39, 9  ;;  %v4233_v14 = vld [vmem:[%s3902_s6 + $0x50] sm:$0x1]  ;;  %5123 = vst [vmem:[#allocation8_spill] sm:$0xff] %v4242_v57 }
  0x58   : > { %3363 = vmatprep.mubr.msk.bf16.mxu0 %vm459_vm3, %v3050_v27  ;;  %v423_v51 = vor.u32 %v422_v42, %v418_v36  ;;  %v428_v52 = vrot.slane %v426_v28, 5  ;;  %v1589_v53 = vrot.slane %v4205_v30, 5  ;;  %v1592_v43 = vrot.slane %v4208_v37, 5  ;;  %v4245_v28 = vld [vmem:[%s3902_s6 + $0x58] sm:$0xf] }
  0x59   : > { %3281 = vmatprep.mubr.msk.bf16.mxu1 %vm459_vm3, %v2930_v15  ;;  %v414_v4 = vrot.slane %v413_v47, 4  ;;  %v1583_v58 = vsel %vm4114_vm7, %v3043_v17, %v1582_v2  ;;  %v1584_v60 = vrot.slane %v1582_v2, 4  ;;  %v2941_v21 = vcombine.low %v3908_v8, %v3911_v9  ;;  %5124 = vst [vmem:[#allocation9_spill] sm:$0xff] %v4245_v28  ;;  %v4248_v62 = vld [vmem:[%s3902_s6 + $0x5c] sm:$0x1] }
  0x5a   : > { %v424_v5 = vrot.slane %v423_v51, 4  ;;  %v1590_v1 = vsel %vm4114_vm7, %v3044_v38, %v1589_v53  ;;  %v1591_v18 = vrot.slane %v1589_v53, 4  ;;  %5125 = vst [vmem:[#allocation10_spill] sm:$0xff] %v4248_v62  ;;  %v1596_v15 = vrot.slane %v4230_v0, 5  ;;  %v4259_v2 = vld [vmem:[%s3902_s6 + $0x64] sm:$0xf] }
  0x5b   : > { %v419_v40 = vsel %vm3951_vm4, %v414_v4, %v418_v36  ;;  %v1586_v54 = vsel %vm4114_vm7, %v1584_v60, %v1585_v49  ;;  %v3045_v36 = vrot.slane %v4227_v61, 9  ;;  %v1599_v42 = vrot.slane %v4233_v14, 5  ;;  %5126 = vst [vmem:[#allocation11_spill] sm:$0xff] %v4259_v2  ;;  %v4269_v53 = vld [vmem:[%s3902_s6 + $0x68] sm:$0x1] }
  0x5c   : > { %v429_v16 = vsel %vm3951_vm4, %v424_v5, %v428_v52  ;;  %v3051_v20 = vcombine.low %v1583_v58, %v1586_v54  ;;  %v1593_v6 = vsel %vm4114_vm7, %v1591_v18, %v1592_v43  ;;  %v3046_v17 = vrot.slane %v4242_v57, 9  ;;  %v4266_v52 = vld [vmem:[%s3902_s6 + $0x60] sm:$0xf]  ;;  %5128 = vst [vmem:[#allocation13_spill] sm:$0xff] %v4269_v53  ;;  %v4514_v37 = vld [vmem:[%s3902_s6 + $0x6c] sm:$0xf] }
  0x5d   : > { %v2931_v29 = vcombine.low %v419_v40, %v429_v16  ;;  %v3052_v27 = vcombine.low %v1590_v1, %v1593_v6  ;;  %v1603_v47 = vrot.slane %v4245_v28, 5  ;;  %v1597_v49 = vsel %vm4114_vm7, %v3045_v36, %v1596_v15  ;;  %5127 = vst [vmem:[#allocation12_spill] sm:$0xff] %v4266_v52  ;;  %v3650_v58 = vld [vmem:[%s5089_s1 + $0xc] ss:$0 sps:$4 sm:$0xcc]  }
  0x5e   : > { %3364 = vmatmul.mubr.msk.bf16.gmra.mrb[4].mxu0 %vm459_vm3, %v3051_v20  ;;  %v1598_v38 = vrot.slane %v1596_v15, 4  ;;  %v1606_v51 = vrot.slane %v4248_v62, 5  ;;  %v2942_v60 = vcombine.low %v3944_v33, %v3947_v34  ;;  %v1610_v1 = vrot.slane %v4259_v2, 5  ;;  %v4293_v36 = vld [vmem:[%s5089_s1 + $0x4] ss:$0 sps:$4 sm:$0xcc]  }
  0x5f   : > { %3282 = vmatmul.mubr.msk.bf16.gmra.mrb[12].mxu1 %vm459_vm3, %v2931_v29  ;;  %3367 = vmatprep.mubr.msk.bf16.mxu0 %vm459_vm3, %v3052_v27  ;;  %v1604_v43 = vsel %vm4114_vm7, %v3046_v17, %v1603_v47  ;;  %v1605_v4 = vrot.slane %v1603_v47, 4  ;;  %v3047_v54 = vrot.slane %v4266_v52, 9  ;;  %v1613_v16 = vrot.slane %v4269_v53, 5  ;;  %v4304_v17 = vld [vmem:[%s3902_s6 + $0x18] sm:$0xf] }
  0x60   : > { %3287 = vmatprep.mubr.msk.bf16.mxu1 %vm459_vm3, %v2941_v21  ;;  %v1600_v5 = vsel %vm4114_vm7, %v1598_v38, %v1599_v42  ;;  %v2943_v20 = vcombine.low %v3995_v22, %v4000_v26  ;;  %v1612_v6 = vrot.slane %v1610_v1, 4  ;;  %v866_v29 = vsel %vm484_vm0, %v4023_v50, 0  ;;  %v4307_v47 = vld [vmem:[%s3902_s6 + $0x1c] sm:$0xf]  ;;  %v4473_v53 = vld [vmem:[%s3902_s6 + $0x64] sm:$0xf] }
  0x61   : > { %v3053_v18 = vcombine.low %v1597_v49, %v1600_v5  ;;  %v1607_v40 = vsel %vm4114_vm7, %v1605_v4, %v1606_v51  ;;  %v2213_v27 = vrot.slane %v3650_v58, 2  ;;  %v1611_v15 = vsel %vm4114_vm7, %v3047_v54, %v1610_v1  ;;  %v4317_v4 = vld [vmem:[%s3902_s6 + $0x24] sm:$0xf]  ;;  %v4320_v58 = vld [vmem:[%s3902_s6 + $0x28] sm:$0xf] }
  0x62   : > { %v3054_v21 = vcombine.low %v1604_v43, %v1607_v40  ;;  %v1614_v50 = vsel %vm4114_vm7, %v1612_v6, %v1613_v16  ;;  %v769_v42 = vrot.slane %v3947_v34, 5  ;;  %v772_v49 = vrot.slane %v3960_v45, 5  ;;  %5129 = vst [vmem:[#allocation14_spill] sm:$0xff] %v4317_v4  ;;  %v4343_v6 = vld [vmem:[%s3902_s6 + $0x30] sm:$0xf] }
  0x63   : > { %3567 = vmatprep.subr.msk.bf16.mxu0 %vm484_vm0, %v2213_v27  ;;  %v3055_v38 = vcombine.low %v1611_v15, %v1614_v50  ;;  %v5092_v51 = vrot.slane %v4293_v36, 2  ;;  %v2944_v43 = vcombine.low %v4038_v12, %v4048_v23  ;;  %v3091_v34 = vcombine.low %v4304_v17, %v4307_v47  ;;  %5130 = vst [vmem:[#allocation15_spill] sm:$0xff] %v4343_v6 }
  0x64   : > { %v765_v5 = vrot.slane %v3914_v10, 5  ;;  %v2945_v45 = vcombine.low %v4081_v19, %v4087_v25  ;;  %v1994_v1 = vshrl.u32 %v4304_v17, 16  ;;  %v1997_v40 = vshll.u32 %v4304_v17, 16  ;;  %v4470_v10 = vld [vmem:[%s3902_s6 + $0x60] sm:$0xf] }
  0x65   : > { %v2959_v15 = vrot.slane %v3995_v22, 9  ;;  %v786_v50 = vrot.slane %v4055_v41, 5  ;;  %v2961_v41 = vrot.slane %v4081_v19, 9  ;;  %v2948_v19 = vcombine.low %v4171_v46, %v4178_v48  ;;  %5135 = vst [vmem:[#allocation19_spill] sm:$0xff] %v4470_v10 }
  0x66   : > { %3368 = vmatmul.mubr.msk.bf16.gmra.mrb[8].mxu0 %vm459_vm3, %v3053_v18  ;;  %v771_v18 = vrot.slane %v769_v42, 4  ;;  %v797_v54 = vrot.slane %v4108_v11, 5  ;;  %v5139_v28 = vshrl.u32 %v4320_v58, 16 }
  0x67   : > { %3288 = vmatmul.mubr.msk.bf16.vlgmr.msra.gmra.mrb[0].mxu1 %vm459_vm3, %v2942_v60  ;;  %3371 = vmatprep.mubr.msk.bf16.mxu0 %vm459_vm3, %v3054_v21  ;;  %v2958_v60 = vrot.slane %v3944_v33, 9  ;;  %v2946_v33 = vcombine.low %v4104_v56, %v4108_v11  ;;  %v4378_v21 = vld [vmem:[%s3902_s6 + $0x3c] sm:$0xf] }
  0x68   : > { %3304 = vmatpush3.bf16.msra.mxu1 %v866_v29  ;;  %3291 = vmatprep.mubr.msk.bf16.mxu1 %vm459_vm3, %v2943_v20  ;;  %v3092_v20 = vcombine.low %v4317_v4, %v4320_v58  ;;  %v4347_v29 = vsel %vm4114_vm7, %v771_v18, %v772_v49  ;;  %v2239_v49 = vsel %vm484_vm0, %v2213_v27, 0  ;;  %5131 = vst [vmem:[#allocation16_spill] sm:$0xff] %v4378_v21  ;;  %v790_v27 = vrot.slane %v4087_v25, 5  ;;  %v4423_v25 = vld [vmem:[%s3902_s6 + $0x48] sm:$0xf] }
  0x69   : > { %3562 = vmatprep.subr.msk.bf16.mxu1 %vm484_vm0, %v5092_v51  ;;  %v4336_v16 = vsel %vm4114_vm7, %v2958_v60, %v769_v42  ;;  %v4354_v42 = vld [vmem:[%s3902_s6 + $0x34] sm:$0xf]  ;;  %v776_v60 = vrot.slane %v4000_v26, 5  ;;  %v779_v51 = vrot.slane %v4007_v31, 5  ;;  %v2960_v26 = vrot.slane %v4038_v12, 9 }
  0x6a   : > { %v783_v31 = vrot.slane %v4048_v23, 5  ;;  %v792_v22 = vrot.slane %v790_v27, 4  ;;  %v2033_v57 = vrot.slane %v5139_v28, 4  ;;  %v5140_v28 = vshrl.u32 %v4343_v6, 16 }
  0x6b   : > { %v4368_v18 = vsel %vm4114_vm7, %v2959_v15, %v776_v60 }
  0x6c   : > { %v4387_v12 = vsel %vm4114_vm7, %v2960_v26, %v783_v31  ;;  %v785_v23 = vrot.slane %v783_v31, 4  ;;  %v2003_v31 = vshll.u32 %v4307_v47, 16 }
  0x6e   : > { %3372 = vmatmul.mubr.msk.bf16.gmra.mrb[12].mxu0 %vm459_vm3, %v3055_v38  ;;  %v778_v38 = vrot.slane %v776_v60, 4  ;;  %v4390_v60 = vld [vmem:[%s3902_s6 + $0x40] sm:$0xf]  ;;  %v4400_v26 = vsel %vm4114_vm7, %v785_v23, %v786_v50  ;;  %v4415_v50 = vld [vmem:[%s5089_s1 + $0x10] sm:$0x3] }
  0x6f   : > { %3292 = vmatmul.mubr.msk.bf16.gmra.mrb[4].mxu1 %vm459_vm3, %v2944_v43  ;;  %3377 = vmatprep.mubr.msk.bf16.mxu0 %vm459_vm3, %v3091_v34  ;;  %v2947_v43 = vcombine.low %v4140_v59, %v4147_v24  ;;  %v762_v34 = vrot.slane %v3911_v9, 5  ;;  %v2957_v9 = vrot.slane %v3908_v8, 9  ;;  %5132 = vst [vmem:[#allocation17_spill] sm:$0xff] %v4390_v60  ;;  %v793_v8 = vrot.slane %v4096_v44, 5 }
  0x70   : > { %3295 = vmatprep.mubr.msk.bf16.mxu1 %vm459_vm3, %v2945_v45  ;;  %v3093_v45 = vcombine.low %v4343_v6, %v4354_v42  ;;  %v4383_v15 = vsel %vm4114_vm7, %v778_v38, %v779_v51  ;;  %v4410_v44 = vsel %vm4114_vm7, %v2961_v41, %v790_v27  ;;  %v1996_v41 = vrot.slane %v1994_v1, 4  ;;  %v4429_v51 = vld [vmem:[%s3902_s6 + $0x4c] sm:$0xf]  ;;  %v4467_v1 = vld [vmem:[%s3902_s6 + $0x58] sm:$0xf] }
  0x71   : > { %v764_v38 = vrot.slane %v762_v34, 4  ;;  %v763_v23 = vsel %vm4114_vm7, %v2957_v9, %v762_v34  ;;  %v2962_v27 = vrot.slane %v4104_v56, 9  ;;  %v800_v34 = vrot.slane %v4123_v32, 5 }
  0x72   : > { %v799_v9 = vrot.slane %v797_v54, 4 }
  0x73   : > { %v766_v56 = vsel %vm4114_vm7, %v764_v38, %v765_v5  ;;  %v4455_v5 = vld [vmem:[%s3902_s6 + $0x54] sm:$0xf]  ;;  %v3095_v38 = vcombine.low %v4423_v25, %v4429_v51 }
  0x74   : > { %5134 = vst [vmem:[#allocation18_spill] sm:$0xff] %v4455_v5  ;;  %v2965_v32 = vcombine.low %v763_v23, %v766_v56  ;;  %v2963_v23 = vrot.slane %v4140_v59, 9  ;;  %v3096_v59 = vcombine.low %v4455_v5, %v4467_v1 }
  0x76   : > { %3378 = vmatmul.mubr.msk.bf16.vlgmr.msra.gmra.mrb[0].mxu0 %vm459_vm3, %v3092_v20  ;;  %v3094_v20 = vcombine.low %v4378_v21, %v4390_v60 }
  0x77   : > { %3296 = vmatmul.mubr.msk.bf16.gmra.mrb[8].mxu1 %vm459_vm3, %v2946_v33  ;;  %3394 = vmatpush3.bf16.msra.mxu0 %v2239_v49  ;;  %v4433_v33 = vsel %vm4114_vm7, %v792_v22, %v793_v8  ;;  %v1999_v49 = vrot.slane %v1997_v40, 5  ;;  %v4446_v22 = vrot.slane %v2003_v31, 5  ;;  %v5133_v40 = vshrl.u32 %v4307_v47, 16 }
  0x78   : > { %3299 = vmatprep.mubr.msk.bf16.mxu1 %vm459_vm3, %v2947_v43  ;;  %3381 = vmatprep.mubr.msk.bf16.mxu0 %vm459_vm3, %v3093_v45  ;;  %v4444_v43 = vld [vmem:[%s3902_s6 + $0x20] sm:$0x1]  ;;  %v4459_v45 = vsel %vm4114_vm7, %v2962_v27, %v797_v54  ;;  %v4478_v8 = vsel %vm4114_vm7, %v799_v9, %v800_v34  ;;  %v5138_v34 = vshll.u32 %v4317_v4, 16  ;;  %v807_v31 = vrot.slane %v4157_v7, 5 }
  0x79   : > { %v2009_v11 = vrot.slane %v5133_v40, 4  ;;  %3568 = vmatprep.subr.msk.bf16.mxu0 %vm484_vm0, %v4415_v50  ;;  %v2000_v27 = vor.u32 %v1999_v49, %v1996_v41  ;;  %v2013_v54 = vshll.u32 %v4444_v43, 16  ;;  %v2027_v40 = vshll.u32 %v4320_v58, 16  ;;  %v4488_v41 = vld [vmem:[%s3902_s6 + $0x2c] sm:$0x1] }
  0x7a   : > { %5136 = vst [vmem:[#allocation20_spill] sm:$0xff] %v4488_v41  ;;  %v5137_v49 = vshrl.u32 %v4317_v4, 16  ;;  %v2023_v9 = vrot.slane %v5138_v34, 5  ;;  %v2037_v7 = vshll.u32 %v4488_v41, 16  ;;  %v814_v41 = vrot.slane %v4183_v63, 5 }
  0x7b   : > { %v2010_v62 = vor.u32 %v2009_v11, %v4446_v22  ;;  %v804_v11 = vrot.slane %v4147_v24, 5  ;;  %v2001_v34 = vrot.slane %v2000_v27, 4  ;;  %v2015_v24 = vrot.slane %v2013_v54, 5 }
  0x7c   : > { %v2020_v52 = vrot.slane %v5137_v49, 4  ;;  %v2051_v49 = vshll.u32 %v4354_v42, 16  ;;  %v4508_v2 = vrot.slane %v2027_v40, 5  ;;  %v2964_v27 = vrot.slane %v4171_v46, 9 }
  0x7d   : > { %v2011_v56 = vrot.slane %v2010_v62, 4  ;;  %v811_v54 = vrot.slane %v4178_v48, 5  ;;  %v4523_v62 = vld [vmem:[%s3902_s6 + $0x70] sm:$0xf]  ;;  %v5143_v40 = vrot.slane %v4293_v36, 2  ;;  %v2075_v36 = vshll.u32 %v4390_v60, 16 }
  0x7e   : > { %3382 = vmatmul.mubr.msk.bf16.gmra.mrb[4].mxu0 %vm459_vm3, %v3094_v20  ;;  %v3097_v20 = vcombine.low %v4470_v10, %v4473_v53  ;;  %v2024_v4 = vor.u32 %v2023_v9, %v2020_v52  ;;  %v4531_v9 = vrot.slane %v2051_v49, 5  ;;  %v2034_v49 = vor.u32 %v2033_v57, %v4508_v2 }
  0x7f   : > { %3300 = vmatmul.mubr.msk.bf16.gmra.mrb[12].mxu1 %vm459_vm3, %v2948_v19  ;;  %3385 = vmatprep.mubr.msk.bf16.mxu0 %vm459_vm3, %v3095_v38  ;;  %v4506_v19 = vsel %vm4114_vm7, %v2963_v23, %v804_v11  ;;  %v806_v38 = vrot.slane %v804_v11, 4  ;;  %v2044_v23 = vrot.slane %v5140_v28, 4  ;;  %v5141_v11 = vshll.u32 %v4343_v6, 16  ;;  %v4547_v6 = vld [vmem:[%s3902_s6 + $0x38] sm:$0x1] }
  0x80   : > { %3305 = vmatprep.mubr.msk.bf16.mxu1 %vm459_vm3, %v2965_v32  ;;  %v4537_v46 = vsel %vm4114_vm7, %v2964_v27, %v811_v54  ;;  %v813_v48 = vrot.slane %v811_v54, 4  ;;  %v1079_v55 = vsel %vm484_vm0, %v5143_v40, 0  ;;  %v2114_v28 = vshrl.u32 %v4455_v5, 16  ;;  %5144 = vst [vmem:[#allocation21_spill] sm:$0xff] %v4547_v6 }
  0x81   : > { %v4518_v32 = vsel %vm4114_vm7, %v806_v38, %v807_v31  ;;  %v2047_v52 = vrot.slane %v5141_v11, 5  ;;  %v5142_v31 = vshrl.u32 %v4354_v42, 16  ;;  %v2117_v11 = vshll.u32 %v4455_v5, 16  ;;  %v4598_v5 = vld [vmem:[%s3902_s6 + $0x50] sm:$0x1] }
  0x82   : > { %v2127_v27 = vshrl.u32 %v4467_v1, 16  ;;  %v3098_v54 = vcombine.low %v4514_v37, %v4523_v62  ;;  %v4555_v63 = vsel %vm4114_vm7, %v813_v48, %v814_v41  ;;  %v5145_v40 = vcombine.low %v4336_v16, %v4347_v29 }
  0x83   : > { %v2057_v38 = vrot.slane %v5142_v31, 4  ;;  %v2006_v57 = vsel %vm3951_vm4, %v2001_v34, %v4446_v22  ;;  %v2039_v31 = vrot.slane %v2037_v7, 5  ;;  %v5146_v16 = vcombine.low %v4368_v18, %v4383_v15  ;;  %v4586_v18 = vld [vmem:[%s3902_s6 + $0x44] sm:$0x1] }
  0x84   : > { %v2025_v29 = vrot.slane %v2024_v4, 4  ;;  %v2061_v22 = vshll.u32 %v4547_v6, 16  ;;  %v2035_v34 = vrot.slane %v2034_v49, 4  ;;  %v5148_v7 = vshll.u32 %v4378_v21, 16 }
  0x85   : > { %v2058_v48 = vor.u32 %v2057_v38, %v4531_v9  ;;  %v2099_v4 = vshll.u32 %v4429_v51, 16  ;;  %v4588_v15 = vrot.slane %v2075_v36, 5  ;;  %v5150_v38 = vshrl.u32 %v4423_v25, 16 }
  0x86   : > { %3386 = vmatmul.mubr.msk.bf16.gmra.mrb[8].mxu0 %vm459_vm3, %v3096_v59  ;;  %v2016_v59 = vsel %vm3951_vm4, %v2011_v56, %v2015_v24  ;;  %v5147_v56 = vshrl.u32 %v4378_v21, 16  ;;  %v5152_v21 = vshrl.u32 %v4429_v51, 16  ;;  %v2141_v6 = vshll.u32 %v4470_v10, 16 }
  0x87   : > { %3306 = vmatmul.mubr.msk.bf16.vlgmr.msra.gmra.mrb[0].mxu1 %vm459_vm3, %v5145_v40  ;;  %3389 = vmatprep.mubr.msk.bf16.mxu0 %vm459_vm3, %v3097_v20  ;;  %v2048_v20 = vor.u32 %v2047_v52, %v2044_v23  ;;  %v2071_v40 = vrot.slane %v5148_v7, 5  ;;  %v5149_v23 = vshrl.u32 %v4390_v60, 16  ;;  %v2092_v49 = vrot.slane %v5150_v38, 4 }
  0x88   : > { %3322 = vmatpush3.bf16.msra.mxu1 %v1079_v55  ;;  %3309 = vmatprep.mubr.msk.bf16.mxu1 %vm459_vm3, %v5146_v16  ;;  %v2068_v24 = vrot.slane %v5147_v56, 4  ;;  %v3670_v55 = vld [vmem:[%s5089_s1 + $0x8] sm:$0x3]  ;;  %v5151_v16 = vshll.u32 %v4423_v25, 16  ;;  %v2138_v7 = vshrl.u32 %v4470_v10, 16  ;;  %v3107_v41 = vcombine.low %v2006_v57, %v2016_v59 }
  0x89   : > { %3564 = vmatprep.subr.msk.bf16.mxu1 %vm484_vm0, %v3670_v55  ;;  %v2081_v52 = vrot.slane %v5149_v23, 4  ;;  %v4600_v55 = vrot.slane %v2099_v4, 5  ;;  %v2105_v36 = vrot.slane %v5152_v21, 4  ;;  %v2049_v60 = vrot.slane %v2048_v20, 4 }
  0x8a   : > { %v2095_v56 = vrot.slane %v5151_v16, 5  ;;  %v2059_v23 = vrot.slane %v2058_v48, 4  ;;  %v2063_v3 = vrot.slane %v2061_v22, 5  ;;  %v2030_v38 = vsel %vm3951_vm4, %v2025_v29, %v4508_v2 }
  0x8b   : > { %v2040_v16 = vsel %vm3951_vm4, %v2035_v34, %v2039_v31  ;;  %v2072_v57 = vor.u32 %v2071_v40, %v2068_v24  ;;  %v2085_v59 = vshll.u32 %v4586_v18, 16  ;;  %v2151_v4 = vshrl.u32 %v4473_v53, 16 }
  0x8c   : > { %v2082_v21 = vor.u32 %v2081_v52, %v4588_v15  ;;  %v2096_v10 = vor.u32 %v2095_v56, %v2092_v49  ;;  %v2109_v20 = vshll.u32 %v4598_v5, 16  ;;  %v5153_v48 = vcombine.low %v4387_v12, %v4400_v26 }
  0x8d   : > { %v2162_v2 = vshrl.u32 %v4514_v37, 16  ;;  %v2165_v31 = vshll.u32 %v4514_v37, 16  ;;  %v2106_v29 = vor.u32 %v2105_v36, %v4600_v55  ;;  %v5154_v22 = vcombine.low %v4410_v44, %v4433_v33 }
  0x8e   : > { %3390 = vmatmul.mubr.msk.bf16.gmra.mrb[12].mxu0 %vm459_vm3, %v3098_v54  ;;  %v2123_v54 = vshll.u32 %v4467_v1, 16  ;;  %v3108_v34 = vcombine.low %v2030_v38, %v2040_v16  ;;  %v2054_v12 = vsel %vm3951_vm4, %v2049_v60, %v4531_v9  ;;  %v2064_v26 = vsel %vm3951_vm4, %v2059_v23, %v2063_v3  ;;  %v4635_v38 = vld [vmem:[%s3902_s6 + $0x5c] sm:$0x1] }
  0x8f   : > { %3310 = vmatmul.mubr.msk.bf16.gmra.mrb[4].mxu1 %vm459_vm3, %v5153_v48  ;;  %3395 = vmatprep.mubr.msk.bf16.mxu0 %vm459_vm3, %v3107_v41  ;;  %v2147_v41 = vshll.u32 %v4473_v53, 16  ;;  %v2073_v24 = vrot.slane %v2072_v57, 4  ;;  %v2087_v40 = vrot.slane %v2085_v59, 5  ;;  %v2116_v52 = vrot.slane %v2114_v28, 4 }
  0x90   : > { %3313 = vmatprep.mubr.msk.bf16.mxu1 %vm459_vm3, %v5154_v22  ;;  %v2119_v49 = vrot.slane %v2117_v11, 5  ;;  %v2083_v56 = vrot.slane %v2082_v21, 4  ;;  %v2097_v36 = vrot.slane %v2096_v10, 4  ;;  %v2111_v44 = vrot.slane %v2109_v20, 5  ;;  %v4642_v22 = vld [vmem:[%s3902_s6 + $0x68] sm:$0x1] }
  0x91   : > { %v2129_v33 = vrot.slane %v2127_v27, 4  ;;  %v2107_v48 = vrot.slane %v2106_v29, 4  ;;  %v4637_v16 = vrot.slane %v2123_v54, 5  ;;  %v2140_v60 = vrot.slane %v2138_v7, 4 }
  0x92   : > { %v2143_v9 = vrot.slane %v2141_v6, 5  ;;  %v2468_v3 = vsel %vm484_vm0, %v4415_v50, 0  ;;  %v3109_v23 = vcombine.low %v2054_v12, %v2064_v26  ;;  %v4644_v57 = vrot.slane %v2147_v41, 5 }
  0x93   : > { %v2153_v28 = vrot.slane %v2151_v4, 4  ;;  %v2175_v10 = vshrl.u32 %v4523_v62, 16  ;;  %v2078_v11 = vsel %vm3951_vm4, %v2073_v24, %v4588_v15  ;;  %v2120_v27 = vor.u32 %v2119_v49, %v2116_v52  ;;  %v3671_v24 = vld [vmem:[%s3902_s6 + $0xc] sm:$0xf] }
  0x94   : > { %v2088_v6 = vsel %vm3951_vm4, %v2083_v56, %v2087_v40  ;;  %v2102_v50 = vsel %vm3951_vm4, %v2097_v36, %v4600_v55  ;;  %v2133_v7 = vshll.u32 %v4635_v38, 16  ;;  %v2171_v59 = vshll.u32 %v4523_v62, 16  ;;  %v3672_v40 = vld [vmem:[%s3902_s6 + $0x10] sm:$0xf] }
  0x95   : > { %v5155_v4 = vcombine.low %v4459_v45, %v4478_v8  ;;  %v2112_v15 = vsel %vm3951_vm4, %v2107_v48, %v2111_v44  ;;  %v2130_v21 = vor.u32 %v2129_v33, %v4637_v16  ;;  %v2144_v20 = vor.u32 %v2143_v9, %v2140_v60 }
  0x96   : > { %3396 = vmatmul.mubr.msk.bf16.vlgmr.msra.gmra.mrb[0].mxu0 %vm459_vm3, %v3108_v34  ;;  %v2157_v55 = vshll.u32 %v4642_v22, 16  ;;  %v5156_v29 = vcombine.low %v4506_v19, %v4518_v32  ;;  %v2154_v45 = vor.u32 %v2153_v28, %v4644_v57  ;;  %v2164_v8 = vrot.slane %v2162_v2, 4  ;;  %v4681_v2 = vld [vmem:[%s3902_s6 + $0x74] sm:$0x1] }
  0x97   : > { %3314 = vmatmul.mubr.msk.bf16.gmra.mrb[8].mxu1 %vm459_vm3, %v5155_v4  ;;  %3412 = vmatpush3.bf16.msra.mxu0 %v2468_v3  ;;  %v2167_v54 = vrot.slane %v2165_v31, 5  ;;  %v3012_v34 = vcombine.low %v4227_v61, %v4230_v0  ;;  %v1315_v12 = vshrl.u32 %v4227_v61, 16  ;;  %v1318_v26 = vshll.u32 %v4227_v61, 16 }
  0x98   : > { %3317 = vmatprep.mubr.msk.bf16.mxu1 %vm459_vm3, %v5156_v29  ;;  %3399 = vmatprep.mubr.msk.bf16.mxu0 %vm459_vm3, %v3109_v23  ;;  %v3110_v41 = vcombine.low %v2078_v11, %v2088_v6  ;;  %v3007_v19 = vcombine.low %v3671_v24, %v3672_v40  ;;  %v4678_v32 = vrot.slane %v2171_v59, 5  ;;  %v2177_v52 = vrot.slane %v2175_v10, 4 }
  0x99   : > { %v3111_v49 = vcombine.low %v2102_v50, %v2112_v15  ;;  %v2121_v56 = vrot.slane %v2120_v27, 4  ;;  %v2131_v36 = vrot.slane %v2130_v21, 4  ;;  %v2135_v44 = vrot.slane %v2133_v7, 5 }
  0x9a   : > { %v2145_v31 = vrot.slane %v2144_v20, 4  ;;  %v2155_v33 = vrot.slane %v2154_v45, 4  ;;  %v2159_v48 = vrot.slane %v2157_v55, 5  ;;  %v2168_v60 = vor.u32 %v2167_v54, %v2164_v8  ;;  %v3673_v45 = vld [vmem:[%s3902_s6 + $0x18] sm:$0xf] }
  0x9b   : > { %v1324_v9 = vshll.u32 %v4230_v0, 16  ;;  %v1328_v3 = vshrl.u32 %v4230_v0, 16  ;;  %v2364_v23 = vrot.slane %v4307_v47, 5  ;;  %v1317_v28 = vrot.slane %v1315_v12, 4  ;;  %v3674_v8 = vld [vmem:[%s3902_s6 + $0x1c] sm:$0xf] }
  0x9c   : > { %v2178_v10 = vor.u32 %v2177_v52, %v4678_v32  ;;  %v2181_v11 = vshll.u32 %v4681_v2, 16  ;;  %v1320_v27 = vrot.slane %v1318_v26, 5  ;;  %v1334_v6 = vshll.u32 %v4233_v14, 16  ;;  %v3675_v26 = vld [vmem:[%s3902_s6 + $0x24] sm:$0xf] }
  0x9d   : > { %v5157_v50 = vcombine.low %v4537_v46, %v4555_v63  ;;  %v2126_v47 = vsel %vm3951_vm4, %v2121_v56, %v4637_v16  ;;  %v2136_v7 = vsel %vm3951_vm4, %v2131_v36, %v2135_v44  ;;  %v2150_v14 = vsel %vm3951_vm4, %v2145_v31, %v4644_v57 }
  0x9e   : > { %3400 = vmatmul.mubr.msk.bf16.gmra.mrb[4].mxu0 %vm459_vm3, %v3110_v41  ;;  %v2160_v46 = vsel %vm3951_vm4, %v2155_v33, %v2159_v48  ;;  %v2169_v63 = vrot.slane %v2168_v60, 4  ;;  %v3124_v59 = vrot.slane %v4304_v17, 9  ;;  %v1326_v4 = vrot.slane %v1324_v9, 5  ;;  %v3676_v41 = vld [vmem:[%s3902_s6 + $0x28] sm:$0xf] }
  0x9f   : > { %3318 = vmatmul.mubr.msk.bf16.gmra.mrb[12].mxu1 %vm459_vm3, %v5157_v50  ;;  %3403 = vmatprep.mubr.msk.bf16.mxu0 %vm459_vm3, %v3111_v49  ;;  %v1330_v15 = vrot.slane %v1328_v3, 4  ;;  %v2366_v16 = vrot.slane %v2364_v23, 4  ;;  %v2367_v21 = vrot.slane %v4444_v43, 5  ;;  %v3112_v20 = vcombine.low %v2126_v47, %v2136_v7  ;;  %v5158_v60 = vld [vmem:[#allocation5_spill] sm:$0xff]  ;;  %v3677_v9 = vld [vmem:[%s3902_s6 + $0x30] sm:$0xf] }
  0xa0   : > { %3323 = vmatprep.mubr.msk.bf16.mxu1 %vm459_vm3, %v3007_v19  ;;  %v2179_v55 = vrot.slane %v2178_v10, 4  ;;  %v2183_v29 = vrot.slane %v2181_v11, 5  ;;  %v3008_v54 = vcombine.low %v3673_v45, %v3674_v8  ;;  %v3113_v57 = vcombine.low %v2150_v14, %v2160_v46  ;;  %v5161_v10 = vld [vmem:[#allocation20_spill] sm:$0xff]  ;;  %s2918_s6 = sshll.u32 %s3756_s15, 4 }
  0xa1   : > { %v1336_v12 = vrot.slane %v1334_v6, 5  ;;  %v3009_v24 = vcombine.low %v3675_v26, %v3676_v41  ;;  %v2174_v17 = vsel %vm3951_vm4, %v2169_v63, %v4678_v32  ;;  %v2365_v40 = vsel %vm4114_vm7, %v3124_v59, %v2364_v23  ;;  %v5160_v23 = vld [vmem:[#allocation14_spill] sm:$0xff]  ;;  %v5163_v59 = vld [vmem:[#allocation21_spill] sm:$0xff]  ;;  %v5165_v26 = vld [vmem:[#allocation7_spill] sm:$0xff]  ;;  %p198_p13 = scmp.lt.s32.totalorder %s2918_s6, 31 }
  0xa2   : > { %v2368_v43 = vsel %vm4114_vm7, %v2366_v16, %v2367_v21  ;;  %v2371_v19 = vrot.slane %v4320_v58, 5  ;;  %v1321_v52 = vor.u32 %v1320_v27, %v1317_v28  ;;  %v1331_v49 = vor.u32 %v1330_v15, %v1326_v4  ;;  %v5162_v27 = vld [vmem:[#allocation15_spill] sm:$0xff] }
  0xa3   : > { %v2184_v56 = vsel %vm3951_vm4, %v2179_v55, %v2183_v29  ;;  %v2378_v36 = vrot.slane %v4354_v42, 5  ;;  %v1291_v32 = vshrl.u32 %v4200_v39, 16  ;;  %v1294_v44 = vshll.u32 %v4200_v39, 16  ;;  %v5159_v42 = vld [vmem:[#allocation6_spill] sm:$0xff]  ;;  %s5189_s6 = smov (!%p198_p13, %s2918_s6), 31 }
  0xa4   : > { %v1300_v58 = vshll.u32 %v4205_v30, 16  ;;  %v1304_v31 = vshrl.u32 %v4205_v30, 16  ;;  %v1322_v33 = vrot.slane %v1321_v52, 4  ;;  %v1332_v48 = vrot.slane %v1331_v49, 4  ;;  %v5167_v49 = vld [vmem:[#allocation8_spill] sm:$0xff]  ;;  %s201_s11 = sadd.s32 %s2919_s10, %s5189_s6 }
  0xa5   : > { %v3010_v3 = vcombine.low %v3677_v9, %v5159_v42  ;;  %v3125_v28 = vrot.slane %v5160_v23, 9  ;;  %v2374_v11 = vrot.slane %v5161_v10, 5  ;;  %v3126_v6 = vrot.slane %v5162_v27, 9  ;;  %v5169_v23 = vld [vmem:[#allocation11_spill] sm:$0xff]  ;;  %s2920_s20 = sshll.u32 %s201_s11, 2 }
  0xa6   : > { %3404 = vmatmul.mubr.msk.bf16.gmra.mrb[8].mxu0 %vm459_vm3, %v3112_v20  ;;  %v3132_v50 = vcombine.low %v2365_v40, %v2368_v43  ;;  %v2373_v47 = vrot.slane %v2371_v19, 4  ;;  %v1327_v7 = vsel %vm3951_vm4, %v1322_v33, %v1326_v4  ;;  %v1337_v14 = vsel %vm3951_vm4, %v1332_v48, %v1336_v12  ;;  %v5166_v43 = vld [vmem:[#allocation16_spill] sm:$0xff]  ;;  %s4845_s27 = scalar_lea.vmem %s5090_s2, %s2920_s20 }
  0xa7   : > { %3324 = vmatmul.mubr.msk.bf16.vlgmr.msra.gmra.mrb[0].mxu1 %vm459_vm3, %v3008_v54  ;;  %3407 = vmatprep.mubr.msk.bf16.mxu0 %vm459_vm3, %v3113_v57  ;;  %v3114_v46 = vcombine.low %v2174_v17, %v2184_v56  ;;  %v2380_v63 = vrot.slane %v2378_v36, 4  ;;  %v2381_v15 = vrot.slane %v5163_v59, 5  ;;  %v4742_v16 = vcombine.low %v1327_v7, %v1337_v14  ;;  %v5164_v57 = vld [vmem:[#allocation17_spill] sm:$0xff] }
  0xa8   : > { %3430 = vmatpush3.bf16.msra.mxu1 %v5158_v60  ;;  %3327 = vmatprep.mubr.msk.bf16.mxu1 %vm459_vm3, %v3009_v24  ;;  %v1293_v21 = vrot.slane %v1291_v32, 4  ;;  %v1296_v20 = vrot.slane %v1294_v44, 5  ;;  %v1302_v55 = vrot.slane %v1300_v58, 5  ;;  %v1306_v29 = vrot.slane %v1304_v31, 4  ;;  %v5168_v32 = vld [vmem:[#allocation9_spill] sm:$0xff] }
  0xa9   : > { %v3011_v45 = vcombine.low %v4200_v39, %v4205_v30  ;;  %v2372_v8 = vsel %vm4114_vm7, %v3125_v28, %v2371_v19  ;;  %v2375_v4 = vsel %vm4114_vm7, %v2373_v47, %v2374_v11  ;;  %v2379_v54 = vsel %vm4114_vm7, %v3126_v6, %v2378_v36  ;;  %v5170_v28 = vld [vmem:[#allocation12_spill] sm:$0xff] }
  0xaa   : > { %v2385_v12 = vrot.slane %v5164_v57, 5  ;;  %v1310_v41 = vshll.u32 %v5165_v26, 16  ;;  %v2382_v39 = vsel %vm4114_vm7, %v2380_v63, %v2381_v15  ;;  %v1297_v30 = vor.u32 %v1296_v20, %v1293_v21 }
  0xab   : > { %v1307_v24 = vor.u32 %v1306_v29, %v1302_v55  ;;  %v2392_v17 = vrot.slane %v4429_v51, 5  ;;  %v3133_v40 = vcombine.low %v2372_v8, %v2375_v4  ;;  %v3127_v19 = vrot.slane %v5166_v43, 9  ;;  %v5172_v8 = vld [vmem:[#allocation18_spill] sm:$0xff] }
  0xac   : > { %v2388_v52 = vrot.slane %v4586_v18, 5  ;;  %v1339_v56 = vshrl.u32 %v5167_v49, 16  ;;  %v1342_v36 = vshll.u32 %v5167_v49, 16  ;;  %v1348_v44 = vshll.u32 %v5168_v32, 16 }
  0xad   : > { %v1352_v58 = vshrl.u32 %v5168_v32, 16  ;;  %v3134_v31 = vcombine.low %v2379_v54, %v2382_v39  ;;  %v2387_v33 = vrot.slane %v2385_v12, 4  ;;  %v1312_v48 = vrot.slane %v1310_v41, 5 }
  0xae   : > { %3408 = vmatmul.mubr.msk.bf16.gmra.mrb[12].mxu0 %vm459_vm3, %v3114_v46  ;;  %v3128_v51 = vrot.slane %v4423_v25, 9  ;;  %v1298_v60 = vrot.slane %v1297_v30, 4  ;;  %v1308_v9 = vrot.slane %v1307_v24, 4  ;;  %v2394_v42 = vrot.slane %v2392_v17, 4 }
  0xaf   : > { %3328 = vmatmul.mubr.msk.bf16.gmra.mrb[4].mxu1 %vm459_vm3, %v3010_v3  ;;  %3413 = vmatprep.mubr.msk.bf16.mxu0 %vm459_vm3, %v3132_v50  ;;  %v2395_v3 = vrot.slane %v4598_v5, 5  ;;  %v3013_v18 = vcombine.low %v5167_v49, %v5168_v32  ;;  %v3014_v10 = vcombine.low %v5170_v28, %v5169_v23  ;;  %v1341_v11 = vrot.slane %v1339_v56, 4 }
  0xb0   : > { %3331 = vmatprep.mubr.msk.bf16.mxu1 %vm459_vm3, %v3011_v45  ;;  %v1344_v27 = vrot.slane %v1342_v36, 5  ;;  %v1350_v6 = vrot.slane %v1348_v44, 5  ;;  %v1354_v50 = vrot.slane %v1352_v58, 4  ;;  %v2386_v25 = vsel %vm4114_vm7, %v3127_v19, %v2385_v12  ;;  %v5173_v12 = vld [vmem:[#allocation19_spill] sm:$0xff]  ;;  %v5174_v58 = vld [vmem:[#allocation13_spill] sm:$0xff] }
  0xb1   : > { %v2389_v47 = vsel %vm4114_vm7, %v2387_v33, %v2388_v52  ;;  %v2393_v5 = vsel %vm4114_vm7, %v3128_v51, %v2392_v17  ;;  %v2399_v7 = vrot.slane %v4467_v1, 5  ;;  %v1303_v14 = vsel %vm3951_vm4, %v1298_v60, %v1302_v55  ;;  %v5171_v55 = vld [vmem:[#allocation10_spill] sm:$0xff] }
  0xb2   : > { %v1313_v46 = vsel %vm3951_vm4, %v1308_v9, %v1312_v48  ;;  %v2396_v63 = vsel %vm4114_vm7, %v2394_v42, %v2395_v3  ;;  %v2406_v59 = vrot.slane %v4473_v53, 5  ;;  %v1363_v1 = vshrl.u32 %v5170_v28, 16 }
  0xb3   : > { %v1366_v61 = vshll.u32 %v5170_v28, 16  ;;  %v1372_v0 = vshll.u32 %v5169_v23, 16  ;;  %v3135_v15 = vcombine.low %v2386_v25, %v2389_v47  ;;  %v1345_v21 = vor.u32 %v1344_v27, %v1341_v11 }
  0xb4   : > { %v1355_v20 = vor.u32 %v1354_v50, %v1350_v6  ;;  %v1358_v29 = vshll.u32 %v5171_v55, 16  ;;  %v3136_v45 = vcombine.low %v2393_v5, %v2396_v63  ;;  %v3129_v4 = vrot.slane %v5172_v8, 9 }
  0xb5   : > { %v2401_v54 = vrot.slane %v2399_v7, 4  ;;  %v2402_v53 = vrot.slane %v4635_v38, 5  ;;  %v3028_v57 = vcombine.low %v1303_v14, %v1313_v46  ;;  %v3130_v26 = vrot.slane %v5173_v12, 9 }
  0xb6   : > { %3414 = vmatmul.mubr.msk.bf16.vlgmr.msra.gmra.mrb[0].mxu0 %vm459_vm3, %v3133_v40  ;;  %v2408_v41 = vrot.slane %v2406_v59, 4  ;;  %v2409_v39 = vrot.slane %v4642_v22, 5  ;;  %v1365_v30 = vrot.slane %v1363_v1, 4  ;;  %v1368_v24 = vrot.slane %v1366_v61, 5 }
  0xb7   : > { %3332 = vmatmul.mubr.msk.bf16.gmra.mrb[8].mxu1 %vm459_vm3, %v3012_v34  ;;  %3417 = vmatprep.mubr.msk.bf16.mxu0 %vm459_vm3, %v3134_v31  ;;  %v1376_v34 = vshrl.u32 %v5169_v23, 16  ;;  %v1374_v17 = vrot.slane %v1372_v0, 5  ;;  %v1346_v43 = vrot.slane %v1345_v21, 4  ;;  %v1356_v19 = vrot.slane %v1355_v20, 4 }
  0xb8   : > { %3335 = vmatprep.mubr.msk.bf16.mxu1 %vm459_vm3, %v3013_v18  ;;  %v1360_v52 = vrot.slane %v1358_v29, 5  ;;  %v2400_v38 = vsel %vm4114_vm7, %v3129_v4, %v2399_v7  ;;  %v2403_v49 = vsel %vm4114_vm7, %v2401_v54, %v2402_v53  ;;  %v2407_v22 = vsel %vm4114_vm7, %v3130_v26, %v2406_v59 }
  0xb9   : > { %v1378_v40 = vrot.slane %v1376_v34, 4  ;;  %v2413_v56 = vrot.slane %v4523_v62, 5  ;;  %v2410_v36 = vsel %vm4114_vm7, %v2408_v41, %v2409_v39  ;;  %v1369_v32 = vor.u32 %v1368_v24, %v1365_v30 }
  0xba   : > { %v1382_v31 = vshll.u32 %v5174_v58, 16  ;;  %v1351_v33 = vsel %vm3951_vm4, %v1346_v43, %v1350_v6  ;;  %v1361_v48 = vsel %vm3951_vm4, %v1356_v19, %v1360_v52  ;;  %v3137_v51 = vcombine.low %v2400_v38, %v2403_v49 }
  0xbb   : > { %v1379_v44 = vor.u32 %v1378_v40, %v1374_v17  ;;  %v3138_v60 = vcombine.low %v2407_v22, %v2410_v36  ;;  %v3131_v9 = vrot.slane %v4514_v37, 9  ;;  %v2415_v62 = vrot.slane %v2413_v56, 4 }
  0xbc   : > { %v2416_v42 = vrot.slane %v4681_v2, 5  ;;  %v3030_v3 = vcombine.low %v1351_v33, %v1361_v48  ;;  %v1370_v18 = vrot.slane %v1369_v32, 4  ;;  %v1384_v28 = vrot.slane %v1382_v31, 5 }
  0xbd   : > { %v1380_v23 = vrot.slane %v1379_v44, 4 }
  0xbe   : > { %3418 = vmatmul.mubr.msk.bf16.gmra.mrb[4].mxu0 %vm459_vm3, %v3135_v15  ;;  %v2417_v37 = vsel %vm4114_vm7, %v2415_v62, %v2416_v42  ;;  %v1375_v2 = vsel %vm3951_vm4, %v1370_v18, %v1374_v17 }
  0xbf   : > { %3336 = vmatmul.mubr.msk.bf16.gmra.mrb[12].mxu1 %vm459_vm3, %v3014_v10  ;;  %3421 = vmatprep.mubr.msk.bf16.mxu0 %vm459_vm3, %v3136_v45  ;;  %v2414_v10 = vsel %vm4114_vm7, %v3131_v9, %v2413_v56  ;;  %v1385_v11 = vsel %vm3951_vm4, %v1380_v23, %v1384_v28 }
  0xc0   : > { %3349 = vmatprep.mubr.msk.bf16.mxu1 %vm459_vm3, %v3028_v57  ;;  %v3139_v27 = vcombine.low %v2414_v10, %v2417_v37  ;;  %v3031_v6 = vcombine.low %v1375_v2, %v1385_v11 }
  0xc6   : > { %3422 = vmatmul.mubr.msk.bf16.gmra.mrb[8].mxu0 %vm459_vm3, %v3137_v51 }
  0xc7   : > { %3350 = vmatmul.mubr.msk.bf16.vlgmr.msra.gmra.mrb[8].mxu1 %vm459_vm3, %v4742_v16  ;;  %3425 = vmatprep.mubr.msk.bf16.mxu0 %vm459_vm3, %v3138_v60 }
  0xc8   : > { %3353 = vmatprep.mubr.msk.bf16.mxu1 %vm459_vm3, %v3030_v3 }
  0xce   : > { %3426 = vmatmul.mubr.msk.bf16.gmra.mrb[12].mxu0 %vm459_vm3, %v3139_v27 }
  0xcf   : > { %3354 = vmatmul.mubr.msk.bf16.gmra.mrb[12].mxu1 %vm459_vm3, %v3031_v6 }
 0x17a   : > { %v3325_v16 = vpop.f32.mrb[0].mxu1 }
 0x17b   : > { %v1115_v50 = vpop.f32.mrb[1].mxu1 }
 0x17c   : > { %v3326_v13 = vpop.f32.mrb[2].mxu1 }
 0x17d   : > { %v1118_v25 = vpop.f32.mrb[3].mxu1 }
 0x182   : > { %v3329_v47 = vpop.f32.mrb[4].mxu1 }
 0x183   : > { %v1131_v5 = vpop.f32.mrb[5].mxu1 }
 0x184   : > { %v3330_v7 = vpop.f32.mrb[6].mxu1 }
 0x185   : > { %v1134_v14 = vpop.f32.mrb[7].mxu1 }
 0x189   : > { %v3415_v35 = vpop.f32.mrb[0].mxu0 }
 0x18a   : > { %v4840_v46 = vadd.f32 %v3415_v35, %v3325_v16  ;;  %v2504_v63 = vpop.f32.mrb[1].mxu0  ;;  %v3774_v16 = vmov (!%p3164_p0), 0.0  }
 0x18b   : > { %v4847_v59 = vadd.f32 %v2504_v63, %v1115_v50  ;;  %v3416_v1 = vpop.f32.mrb[2].mxu0  ;;  %2669 = vst.msk [vmem:[%s4942_s9] sm:$0x3] (!%p3164_p0), %vm2668_vm9, %v3774_v16 }
 0x18c   : > { %v3172_v61 = vpack.c.bf16 %v4840_v46, %v4840_v46  ;;  %v4851_v0 = vadd.f32 %v3416_v1, %v3326_v13  ;;  %v2507_v34 = vpop.f32.mrb[3].mxu0 }
 0x18d   : > { %v3170_v15 = vpack.c.bf16 %v4847_v59, %v4847_v59  ;;  %v4855_v21 = vadd.f32 %v2507_v34, %v1118_v25 }
 0x18e   : > { %2650 = vst.msk [vmem:[%s4845_s27 + $0x8] sm:$0xf] %vm2647_vm8, %v3172_v61  ;;  %v3173_v20 = vpack.c.bf16 %v4851_v0, %v4851_v0 }
 0x18f   : > { %2648 = vst.msk [vmem:[%s4845_s27] sm:$0xf] %vm2647_vm8, %v3170_v15  ;;  %v3171_v55 = vpack.c.bf16 %v4855_v21, %v4855_v21 }
 0x190   : > { %2651 = vst.msk [vmem:[%s4845_s27 + $0xc] sm:$0xf] %vm2647_vm8, %v3173_v20 }
 0x191   : > { %2649 = vst.msk [vmem:[%s4845_s27 + $0x4] sm:$0xf] %vm2647_vm8, %v3171_v55  ;;  %v3419_v29 = vpop.f32.mrb[4].mxu0 }
 0x192   : > { %v4869_v45 = vadd.f32 %v3419_v29, %v3329_v47  ;;  %v2520_v8 = vpop.f32.mrb[5].mxu0 }
 0x193   : > { %v4871_v4 = vadd.f32 %v2520_v8, %v1131_v5  ;;  %v3420_v54 = vpop.f32.mrb[6].mxu0 }
 0x194   : > { %v3176_v53 = vpack.c.bf16 %v4869_v45, %v4869_v45  ;;  %v4875_v57 = vadd.f32 %v3420_v54, %v3330_v7  ;;  %v2523_v12 = vpop.f32.mrb[7].mxu0 }
 0x195   : > { %v3174_v26 = vpack.c.bf16 %v4871_v4, %v4871_v4  ;;  %v4879_v41 = vadd.f32 %v2523_v12, %v1134_v14 }
 0x196   : > { %2654 = vst.msk [vmem:[%s4845_s27 + $0x18] sm:$0xf] %vm2647_vm8, %v3176_v53  ;;  %v3177_v39 = vpack.c.bf16 %v4875_v57, %v4875_v57 }
 0x197   : > { %2652 = vst.msk [vmem:[%s4845_s27 + $0x10] sm:$0xf] %vm2647_vm8, %v3174_v26  ;;  %v3175_v30 = vpack.c.bf16 %v4879_v41, %v4879_v41 }
 0x198   : > { %2655 = vst.msk [vmem:[%s4845_s27 + $0x1c] sm:$0xf] %vm2647_vm8, %v3177_v39 }
 0x199   : > { %2653 = vst.msk [vmem:[%s4845_s27 + $0x14] sm:$0xf] %vm2647_vm8, %v3175_v30  ;;  %v3423_v24 = vpop.f32.mrb[8].mxu0 }
 0x19a   : > { %v3351_v17 = vpop.f32.mrb[8].mxu1  ;;  %v2536_v40 = vpop.f32.mrb[9].mxu0 }
 0x19b   : > { %v4893_v43 = vadd.f32 %v3423_v24, %v3351_v17  ;;  %v1504_v19 = vpop.f32.mrb[9].mxu1  ;;  %v3424_v52 = vpop.f32.mrb[10].mxu0 }
 0x19c   : > { %v4895_v38 = vadd.f32 %v2536_v40, %v1504_v19  ;;  %v3352_v49 = vpop.f32.mrb[10].mxu1  ;;  %v2539_v22 = vpop.f32.mrb[11].mxu0 }
 0x19d   : > { %v3180_v56 = vpack.c.bf16 %v4893_v43, %v4893_v43  ;;  %v4899_v36 = vadd.f32 %v3424_v52, %v3352_v49  ;;  %v1507_v32 = vpop.f32.mrb[11].mxu1 }
 0x19e   : > { %v3178_v44 = vpack.c.bf16 %v4895_v38, %v4895_v38  ;;  %v4903_v58 = vadd.f32 %v2539_v22, %v1507_v32 }
 0x19f   : > { %2658 = vst.msk [vmem:[%s4845_s27 + $0x28] sm:$0xf] %vm2647_vm8, %v3180_v56  ;;  %v3181_v31 = vpack.c.bf16 %v4899_v36, %v4899_v36 }
 0x1a0   : > { %2656 = vst.msk [vmem:[%s4845_s27 + $0x20] sm:$0xf] %vm2647_vm8, %v3178_v44  ;;  %v3179_v33 = vpack.c.bf16 %v4903_v58, %v4903_v58 }
 0x1a1   : > { %2659 = vst.msk [vmem:[%s4845_s27 + $0x2c] sm:$0xf] %vm2647_vm8, %v3181_v31  ;;  %v3427_v48 = vpop.f32.mrb[12].mxu0 }
 0x1a2   : > { %2657 = vst.msk [vmem:[%s4845_s27 + $0x24] sm:$0xf] %vm2647_vm8, %v3179_v33  ;;  %v3355_v51 = vpop.f32.mrb[12].mxu1  ;;  %v2552_v60 = vpop.f32.mrb[13].mxu0 }
 0x1a3   : > { %v4917_v9 = vadd.f32 %v3427_v48, %v3355_v51  ;;  %v1520_v62 = vpop.f32.mrb[13].mxu1  ;;  %v3428_v42 = vpop.f32.mrb[14].mxu0 }
 0x1a4   : > { %v4919_v3 = vadd.f32 %v2552_v60, %v1520_v62  ;;  %v3356_v18 = vpop.f32.mrb[14].mxu1  ;;  %v2555_v23 = vpop.f32.mrb[15].mxu0  ;;  %2667 = sbr.rel (%p3164_p0) target bundleno = 427 (0x1ab), region = 32 }
 0x1a5   : > { %v3184_v28 = vpack.c.bf16 %v4917_v9, %v4917_v9  ;;  %v4923_v10 = vadd.f32 %v3428_v42, %v3356_v18  ;;  %v1523_v37 = vpop.f32.mrb[15].mxu1 }
 0x1a6   : > { %v3182_v2 = vpack.c.bf16 %v4919_v3, %v4919_v3  ;;  %v4927_v11 = vadd.f32 %v2555_v23, %v1523_v37 }
 0x1a7   : > { %2662 = vst.msk [vmem:[%s4845_s27 + $0x38] sm:$0xf] %vm2647_vm8, %v3184_v28  ;;  %v3185_v27 = vpack.c.bf16 %v4923_v10, %v4923_v10 }
 0x1a8   : > { %2660 = vst.msk [vmem:[%s4845_s27 + $0x30] sm:$0xf] %vm2647_vm8, %v3182_v2  ;;  %v3183_v6 = vpack.c.bf16 %v4927_v11, %v4927_v11 }
 0x1a9   : > { %2663 = vst.msk [vmem:[%s4845_s27 + $0x3c] sm:$0xf] %vm2647_vm8, %v3185_v27 }
 0x1aa   : > { %2661 = vst.msk [vmem:[%s4845_s27 + $0x34] sm:$0xf] %vm2647_vm8, %v3183_v6 }
 0x1ab PF: > { %vm2671_vm10 = vcmask 64512   ;;  %v2709_v35 = vmul.f32 %v4847_v59, %v4847_v59  ;;  %v2710_v63 = vmul.f32 %v4855_v21, %v4855_v21  ;;  %v2711_v1 = vmul.f32 %v4840_v46, %v4840_v46  ;;  %s3166_s15 = sshll.u32 %s3760_s16, 5  ;;  %s2794_s5 = sshll.u32 %s4942_s9, 4  ;;  %s5034_s5 = int_to_ptr.vmem [resolvable:$true] %s2794_s5 }
 0x1ac   : > { %v2672_v50 = vsel %vm2671_vm10, %v4847_v59, 0.0  ;;  %v2673_v13 = vsel %vm2671_vm10, %v4855_v21, 0.0  ;;  %v2675_v25 = vsel %vm2671_vm10, %v4840_v46, 0.0  ;;  %v2677_v5 = vsel %vm2671_vm10, %v4851_v0, 0.0  ;;  %s5032_s7 = scalar_lea.hbm %s5091_s3, %s3166_s15  ;;  %s2777_s8 = scalar_lea.sflag [#allocation3], %s187_s29 }
 0x1ad   : > { %v2674_v47 = vadd.f32 %v2673_v13, %v2672_v50  ;;  %v2679_v14 = vsel %vm2671_vm10, %v4871_v4, 0.0  ;;  %v2681_v34 = vsel %vm2671_vm10, %v4879_v41, 0.0  ;;  %v2712_v15 = vmul.f32 %v4851_v0, %v4851_v0  ;;  %s3678_s6 = scalar_lea.vmem %s5034_s5, 32  ;;  %s3775_s16 = smov [#allocation2]  }
 0x1ae   : > { %v2683_v55 = vsel %vm2671_vm10, %v4869_v45, 0.0  ;;  %v2713_v59 = vmul.f32 %v4871_v4, %v4871_v4  ;;  %v2725_v29 = vsel %vm2671_vm10, %v2709_v35, 0.0  ;;  %v2726_v21 = vsel %vm2671_vm10, %v2710_v63, 0.0  ;;  %p3679_p1 = scmp.ne.s32.totalorder %s5034_s5, %s3678_s6  ;;  %s3682_s10 = sshll.u32 %s3775_s16, 4  ;;  %s3683_s10 = int_to_ptr.vmem [resolvable:$false] %s3682_s10 }
 0x1af   : > { %v2676_v7 = vadd.f32 %v2675_v25, %v2674_v47  ;;  %v2728_v46 = vsel %vm2671_vm10, %v2711_v1, 0.0  ;;  %v2727_v54 = vadd.f32 %v2726_v21, %v2725_v29  ;;  %v2685_v53 = vsel %vm2671_vm10, %v4875_v57, 0.0  ;;  %s3684_s11 = scalar_lea.vmem %s3683_s10, 64  ;;  %p3685_p5 = scmp.lt.s32.totalorder %s5034_s5, %s3683_s10 }
 0x1b0   : > { %v2714_v0 = vmul.f32 %v4879_v41, %v4879_v41  ;;  %v2730_v12 = vsel %vm2671_vm10, %v2712_v15, 0.0  ;;  %v2687_v4 = vsel %vm2671_vm10, %v4895_v38, 0.0  ;;  %v2715_v30 = vmul.f32 %v4869_v45, %v4869_v45  ;;  %p3680_p2 = pnand %p3679_p1, %p3845_p3  ;;  %p3686_p6 = scmp.lt.s32.totalorder %s3684_s11, %s3678_s6 }
 0x1b1   : > { %v2678_v61 = vadd.f32 %v2677_v5, %v2676_v7  ;;  %v2729_v39 = vadd.f32 %v2728_v46, %v2727_v54  ;;  %v2732_v24 = vsel %vm2671_vm10, %v2713_v59, 0.0  ;;  %v2689_v19 = vsel %vm2671_vm10, %v4903_v58, 0.0 }
 0x1b2   : > { %v2716_v41 = vmul.f32 %v4875_v57, %v4875_v57  ;;  %v2734_v52 = vsel %vm2671_vm10, %v2714_v0, 0.0  ;;  %v2691_v56 = vsel %vm2671_vm10, %v4893_v43, 0.0  ;;  %v2717_v45 = vmul.f32 %v4895_v38, %v4895_v38  ;;  %p3681_p4 = pneg %p3680_p2  ;;  %p3687_p7 = por %p3686_p6, %p3685_p5 }
 0x1b3   : > { %v2680_v20 = vadd.f32 %v2679_v14, %v2678_v61  ;;  %v2731_v40 = vadd.f32 %v2730_v12, %v2729_v39  ;;  %v2736_v32 = vsel %vm2671_vm10, %v2715_v30, 0.0  ;;  %v2693_v33 = vsel %vm2671_vm10, %v4899_v36, 0.0  ;;  %v2670_v39 = vld [vmem:[%s4942_s9] sm:$0x3] }
 0x1b4   : > { %v2718_v57 = vmul.f32 %v4903_v58, %v4903_v58  ;;  %v2738_v48 = vsel %vm2671_vm10, %v2716_v41, 0.0  ;;  %v2695_v62 = vsel %vm2671_vm10, %v4919_v3, 0.0  ;;  %v2719_v38 = vmul.f32 %v4893_v43, %v4893_v43  ;;  %p3688_p8 = pnand %p3687_p7, %p3681_p4 }
 0x1b5   : > { %v2682_v8 = vadd.f32 %v2681_v34, %v2680_v20  ;;  %v2733_v22 = vadd.f32 %v2732_v24, %v2731_v40  ;;  %v2740_v42 = vsel %vm2671_vm10, %v2717_v45, 0.0  ;;  %v2697_v28 = vsel %vm2671_vm10, %v4927_v11, 0.0 }
 0x1b6   : > { %v2720_v58 = vmul.f32 %v4899_v36, %v4899_v36  ;;  %v2742_v37 = vsel %vm2671_vm10, %v2718_v57, 0.0  ;;  %v2699_v6 = vsel %vm2671_vm10, %v4917_v9, 0.0  ;;  %v2721_v43 = vmul.f32 %v4919_v3, %v4919_v3 }
 0x1b7   : > { %v2684_v26 = vadd.f32 %v2683_v55, %v2682_v8  ;;  %v2735_v31 = vadd.f32 %v2734_v52, %v2733_v22  ;;  %v2744_v16 = vsel %vm2671_vm10, %v2719_v38, 0.0  ;;  %v2701_v25 = vsel %vm2671_vm10, %v4923_v10, 0.0 }
 0x1b8   : > { %v2722_v36 = vmul.f32 %v4927_v11, %v4927_v11  ;;  %v2746_v47 = vsel %vm2671_vm10, %v2720_v58, 0.0  ;;  %v2723_v14 = vmul.f32 %v4917_v9, %v4917_v9  ;;  %v2748_v35 = vsel %vm2671_vm10, %v2721_v43, 0.0 }
 0x1b9   : > { %v2686_v17 = vadd.f32 %v2685_v53, %v2684_v26  ;;  %v2737_v60 = vadd.f32 %v2736_v32, %v2735_v31  ;;  %v2724_v1 = vmul.f32 %v4923_v10, %v4923_v10  ;;  %vm2762_vm11 = vcmask 1040384  }
 0x1ba   : > { %v2750_v61 = vsel %vm2671_vm10, %v2722_v36, 0.0  ;;  %v2752_v11 = vsel %vm2671_vm10, %v2723_v14, 0.0  ;;  %vm2765_vm12 = vcmask 58368  }
 0x1bb   : > { %v2688_v49 = vadd.f32 %v2687_v4, %v2686_v17  ;;  %v2739_v23 = vadd.f32 %v2738_v48, %v2737_v60  ;;  %v2754_v59 = vsel %vm2671_vm10, %v2724_v1, 0.0 }
 0x1bd   : > { %v2690_v44 = vadd.f32 %v2689_v19, %v2688_v49  ;;  %v2741_v27 = vadd.f32 %v2740_v42, %v2739_v23 }
 0x1bf   : > { %v2692_v51 = vadd.f32 %v2691_v56, %v2690_v44  ;;  %v2743_v13 = vadd.f32 %v2742_v37, %v2741_v27 }
 0x1c1   : > { %v2694_v18 = vadd.f32 %v2693_v33, %v2692_v51  ;;  %v2745_v7 = vadd.f32 %v2744_v16, %v2743_v13 }
 0x1c3   : > { %v2696_v2 = vadd.f32 %v2695_v62, %v2694_v18  ;;  %v2747_v63 = vadd.f32 %v2746_v47, %v2745_v7 }
 0x1c5   : > { %v2698_v50 = vadd.f32 %v2697_v28, %v2696_v2  ;;  %v2749_v15 = vadd.f32 %v2748_v35, %v2747_v63 }
 0x1c7   : > { %v2700_v5 = vadd.f32 %v2699_v6, %v2698_v50  ;;  %v2751_v55 = vadd.f32 %v2750_v61, %v2749_v15 }
 0x1c9   : > { %v2702_v3 = vadd.f32 %v2701_v25, %v2700_v5  ;;  %v2753_v29 = vadd.f32 %v2752_v11, %v2751_v55 }
 0x1cb   : > { %v2703_v34 = vrot.slane %v2702_v3, 4  ;;  %v2755_v21 = vadd.f32 %v2754_v59, %v2753_v29 }
 0x1cd   : > { %v2704_v20 = vadd.f32 %v2703_v34, %v2702_v3  ;;  %v2756_v8 = vrot.slane %v2755_v21, 4 }
 0x1cf   : > { %v2705_v9 = vrot.slane %v2704_v20, 2  ;;  %v2757_v54 = vadd.f32 %v2756_v8, %v2755_v21 }
 0x1d1   : > { %v2706_v46 = vadd.f32 %v2705_v9, %v2704_v20  ;;  %v2758_v53 = vrot.slane %v2757_v54, 2 }
 0x1d3   : > { %v2707_v10 = vrot.slane %v2706_v46, 1  ;;  %v2759_v0 = vadd.f32 %v2758_v53, %v2757_v54 }
 0x1d5   : > { %v2708_v12 = vadd.f32 %v2707_v10, %v2706_v46  ;;  %v2760_v26 = vrot.slane %v2759_v0, 1 }
 0x1d7   : > { %v2761_v4 = vadd.f32 %v2760_v26, %v2759_v0 }
 0x1d9   : > { %v2763_v30 = vsel %vm2762_vm11, %v2708_v12, %v2761_v4 }
 0x1da   : > { %v2764_v24 = vadd.f32 %v2763_v30, %v2670_v39 }
 0x1dc   : > { %2766 = vst.msk [vmem:[%s4942_s9] sm:$0x3] %vm2765_vm12, %v2764_v24 }
 0x1dd   : > { %3691 = shalt.err (!%p3688_p8)
}
 0x1de   : > { %s3692_s29 = scalar_lea.hbm %s5032_s7, 32  ;;  %s3696_s26 = scalar_lea.hbm %s5091_s3, 64 }
 0x1df   : > { %p3693_p10 = scmp.ne.s32.totalorder %s5032_s7, %s3692_s29  ;;  %p3697_p13 = scmp.lt.u32.totalorder %s5032_s7, %s5091_s3 }
 0x1e0   : > { %p3698_p0 = scmp.lt.u32.totalorder %s3696_s26, %s3692_s29  ;;  %p3700_p2 = scmp.lt.u32.totalorder %s3692_s29, %s5032_s7 }
 0x1e1   : > { %p3694_p11 = pnand %p3693_p10, %p3845_p3 }
 0x1e2   : > { %p3699_p1 = por %p3698_p0, %p3697_p13 }
 0x1e3   : > { %p3695_p12 = pneg %p3694_p11 }
 0x1e4   : > { %p3701_p4 = por %p3700_p2, %p3699_p1 }
 0x1e6   : > { %p3702_p5 = pnand %p3701_p4, %p3695_p12 }
 0x1e8   : > { %3705 = shalt.err (!%p3702_p5)
}
 0x1e9   : > { %3570 = dma.vmem_to_hbm [thread:$0]  (%p3845_p3), %s5034_s5, 32, %s5032_s7, %s2777_s8  }
 0x1ea PF: > { %p3576_p6 = scmp.ge.s32.totalorder %s3772_s19, 2  ;;  %s2818_s15 = sand.u32 1, %s3744_s12  }
 0x1eb   : > { %s2819_s30 = scalar_lea.sflag [#allocation3], %s2818_s15 }
 0x1ec   : > { %p3573_p7 = pnand %p3576_p6, %p3855_p9 }
 0x1ee   : > { %3739 = dma.done.wait (!%p3573_p7), %s2819_s30, 32  }
 0x1ef   : > { %3741 = vsyncadd (!%p3573_p7), %s2819_s30, 4294967264  ;;  %s17_s19 = sadd.s32 1, %s3772_s19   ;;  %s5175_s12 = smov %s3748_s13 }
 0x1f0   : > { %p14_p8 = scmp.ge.s32.totalorder %s17_s19, 6   ;;  %s5176_s13 = smov %s3752_s14 }
 0x1f1   : > { %s5177_s14 = smov %s3863_s28  ;;  %s5178_s15 = smov %s3764_s17 }
 0x1f2   : > { %s5179_s16 = smov %s3768_s18  ;;  %s5180_s17 = smov %s5183_s22 }
 0x1f3   : > { %s5181_s18 = smov %s5187_s23  ;;  %16 = sbr.rel (!%p14_p8) target bundleno = 5 (0x5), region = 82 }
 0x1fa   :  { %2824 = vsyncpa [#allocation3], 1 }
 0x1fb   :  { %2826 = vsyncpa [#allocation3 + $0x1], 1 }

// kernel: tpu_custom_call.1
= control target key start
LH: loop header
LB: loop body
LE: loop exit
PB: predicated region body
PF: predicated region fallthrough
CT: control target
= control target key end

     0   :  { %9 = vsyncpa [#allocation3], 0  ;;  %s5088_s0 = inlined_call_operand.vmem [shape: bf16[2,18,18,4], index: 0, kind: input, shape index: {}]   ;;  %s5089_s1 = inlined_call_operand.vmem [shape: bf16[36,8], index: 1, kind: input, shape index: {}]   ;;  %s5090_s2 = inlined_call_operand.vmem [shape: bf16[2,256,8], index: 2, kind: output, shape index: {0}]   ;;  %s5091_s3 = inlined_call_operand.hbm [shape: f32[2,2,8], index: 3, kind: output, shape index: {1}]  }
   0x1   :  { %11 = vsyncpa [#allocation3 + $0x1], 0  ;;  %s3796_s12 = smov 0   ;;  %s3798_s13 = smov 0  }
   0x2   :  { %s3800_s14 = smov 0   ;;  %s3802_s15 = smov 0  }
   0x3   :  { %s3804_s16 = smov 0   ;;  %s3806_s17 = smov 0  }
   0x4   :  { %s3808_s18 = smov 0   ;;  %s3810_s19 = smov 0  }
   0x5 LB: > { %s2911_s20 = sadd.s32 4294967295, %s3772_s19   ;;  %s2912_s21 = sadd.s32 4294967294, %s3772_s19   ;;  %s3772_s19 = sphi %s3810_s19, %s17_s19   ;;  %s3768_s18 = sphi %s3808_s18, %s5181_s18   ;;  %s3764_s17 = sphi %s3806_s17, %s5180_s17   ;;  %s3760_s16 = sphi %s3804_s16, %s5179_s16   ;;  %s3756_s15 = sphi %s3802_s15, %s5178_s15   ;;  %s3752_s14 = sphi %s3800_s14, %s5177_s14   ;;  %s3748_s13 = sphi %s3798_s13, %s5176_s13   ;;  %s3744_s12 = sphi %s3796_s12, %s5175_s12  }
   0x6   : > { %s26_s22 = sadd.s32 1, %s3764_s17  ;;  %s29_s23 = sadd.s32 1, %s3768_s18 }
   0x7   : > { %p27_p0 = scmp.ge.s32.totalorder %s26_s22, 2  ;;  %p121_p1 = scmp.ne.s32.totalorder %s3752_s14, %s3748_s13 }
   0x8   : > { %p122_p2 = scmp.eq.s32.totalorder %s2911_s20, 3  ;;  %p127_p4 = scmp.ne.s32.totalorder %s3748_s13, %s3744_s12 }
   0x9   : > { %s5183_s22 = smov (%p27_p0, %s26_s22), 0  ;;  %s5185_s23 = smov (!%p27_p0, %s29_s23), %s3768_s18 }
   0xa   : > { %p3845_p3 = por %p122_p2, %p121_p1  ;;  %p31_p5 = scmp.ge.s32.totalorder %s5185_s23, 2 }
   0xb   : > { %p128_p6 = scmp.eq.s32.totalorder %s2912_s21, 3  ;;  %p2915_p7 = scmp.ge.s32.totalorder %s3772_s19, 1 }
   0xc   : > { %p157_p8 = scmp.lt.s32.totalorder %s3772_s19, 5  ;;  %s5187_s23 = smov (%p31_p5, %s5185_s23), 0 }
   0xd   : > { %p3855_p9 = por %p128_p6, %p127_p4  ;;  %s108_s26 = ssub.s32 %s3768_s18, %s5187_s23 }
   0xe   : > { %p158_p10 = pnand %p2915_p7, %p157_p8  ;;  %s111_s27 = sadd.s32 1, %s3752_s14 }
   0xf   : > { %p109_p11 = scmp.eq.s32.totalorder %s108_s26, 0 }
  0x10   : > { %161 = sbr.rel (%p158_p10) target bundleno = 490 (0x1ea), region = 28 }
  0x11   : > { %s3863_s28 = scalar_select %p109_p11, %s3752_s14, %s111_s27  }
  0x17   : > { %s187_s29 = sand.u32 1, %s3748_s13   ;;  %v3642_v0 = vld [vmem:[%s5089_s1] ss:$0 sps:$4 sm:$0xcc]   ;;  %vm484_vm0 = vcmask 1041408   ;;  %p190_p12 = scmp.lt.s32.totalorder %s3760_s16, 1 }
  0x18   : > { %s3871_s5 = sshll.u32 %s187_s29, 1  ;;  %v1386_v1 = vld [vmem:[%s5089_s1 + $0x8] sm:$0x3]  ;;  %v458_v2 = vrot.slane %v3642_v0, 2  ;;  %s3169_s8 = smul.u32 96, %s3756_s15  ;;  %vm459_vm3 = vcmask 31744  }
  0x19   : > { %3563 = vmatprep.subr.msk.bf16.mxu0 %vm484_vm0, %v1386_v1  ;;  %v3879_v3 = vsel %vm484_vm0, %v1386_v1, 0  ;;  %s3884_s9 = scalar_select %p190_p12, %s3760_s16, 1  ;;  %v234_v4 = vld [vmem:[%s5089_s1] sm:$0x3]  ;;  %vm235_vm1 = vsmask.f32 3328 }
  0x1a   : > { %5116 = vst [vmem:[#allocation5_spill] sm:$0xff] %v3879_v3  ;;  %3340 = vmatpush3.bf16.msra.mxu0 %v3879_v3  ;;  %3559 = vmatprep.subr.msk.bf16.mxu1 %vm484_vm0, %v458_v2  ;;  %v486_v5 = vsel %vm484_vm0, %v458_v2, 0  ;;  %v3894_v6 = vld [vmem:[%s5089_s1 + $0x8] ss:$0 sps:$4 sm:$0xcc]   ;;  %v3931_v19 = vsel %vm484_vm0, %v234_v4, 0 }
  0x1b   : > { %3268 = vmatpush3.bf16.msra.mxu1 %v486_v5  ;;  %s3569_s26 = smul.u32 216, %s3884_s9  ;;  %v1643_v7 = vrot.slane %v3894_v6, 2  ;;  %vm236_vm2 = vsmask.f32 7440  ;;  %v3936_v24 = vld [vmem:[%s5089_s1 + $0xc] sm:$0x3] }
  0x1c   : > { %3560 = vmatprep.subr.msk.bf16.mxu1 %vm484_vm0, %v234_v4  ;;  %vm3951_vm4 = vmor %vm235_vm1, %vm236_vm2  ;;  %v3957_v39 = vsel %vm484_vm0, %v3936_v24, 0  ;;  %vm757_vm5 = vcmask 1042432   ;;  %vm758_vm6 = vcmask 1046532   ;;  %s2919_s10 = sshll.u32 %s3884_s9, 5  ;;  %vm2647_vm8 = vcmask 60416   ;;  %s4942_s9 = scalar_lea.vmem [#allocation2], %s3871_s5 }
  0x1d   : > { %s194_s4 = scalar_lea.vmem %s5088_s0, %s3569_s26  ;;  %3565 = vmatprep.subr.msk.bf16.mxu0 %vm484_vm0, %v1643_v7  ;;  %v3987_v4 = vsel %vm484_vm0, %v1643_v7, 0  ;;  %vm4114_vm7 = vmor %vm757_vm5, %vm758_vm6  ;;  %p3164_p0 = scmp.ne.s32.totalorder %s3756_s15, 0 }
  0x1e   : > { %s3902_s6 = scalar_lea.vmem %s194_s4, %s3169_s8  ;;  %vm2668_vm9 = vcmask (!%p3164_p0), 58368  }
  0x1f   : > { %v3908_v8 = vld [vmem:[%s3902_s6] sm:$0xf]  ;;  %v3911_v9 = vld [vmem:[%s3902_s6 + $0x4] sm:$0xf]  ;;  %v3914_v10 = vld [vmem:[%s3902_s6 + $0x8] sm:$0x1] }
  0x20   : > { %v239_v11 = vshrl.u32 %v3908_v8, 16  ;;  %v242_v12 = vshll.u32 %v3908_v8, 16  ;;  %v248_v13 = vshll.u32 %v3911_v9, 16  ;;  %v252_v14 = vshrl.u32 %v3911_v9, 16  ;;  %v3921_v15 = vld [vmem:[%s3902_s6 + $0xc] sm:$0xf] }
  0x21   : > { %v258_v16 = vshll.u32 %v3914_v10, 16  ;;  %v3925_v17 = vld [vmem:[%s3902_s6 + $0x10] sm:$0xf]  ;;  %v3928_v18 = vld [vmem:[%s3902_s6 + $0x14] sm:$0x1]  ;;  %v1195_v26 = vshrl.u32 %v3921_v15, 16 }
  0x22   : > { %v241_v20 = vrot.slane %v239_v11, 4  ;;  %v244_v21 = vrot.slane %v242_v12, 5  ;;  %v250_v22 = vrot.slane %v248_v13, 5  ;;  %v254_v23 = vrot.slane %v252_v14, 4  ;;  %v3944_v33 = vld [vmem:[%s3902_s6 + $0xc] sm:$0xf] }
  0x23   : > { %v260_v25 = vrot.slane %v258_v16, 5  ;;  %v1198_v27 = vshll.u32 %v3921_v15, 16  ;;  %v1204_v28 = vshll.u32 %v3925_v17, 16  ;;  %v1208_v31 = vshrl.u32 %v3925_v17, 16  ;;  %v3947_v34 = vld [vmem:[%s3902_s6 + $0x10] sm:$0xf] }
  0x24   : > { %v245_v29 = vor.u32 %v244_v21, %v241_v20  ;;  %v255_v30 = vor.u32 %v254_v23, %v250_v22  ;;  %v1214_v32 = vshll.u32 %v3928_v18, 16  ;;  %v1197_v36 = vrot.slane %v1195_v26, 4  ;;  %v3960_v45 = vld [vmem:[%s3902_s6 + $0x14] sm:$0x1]  ;;  %v3971_v57 = vld [vmem:[%s3902_s6 + $0x18] sm:$0xf] }
  0x25   : > { %v1200_v37 = vrot.slane %v1198_v27, 5  ;;  %v1206_v38 = vrot.slane %v1204_v28, 5  ;;  %v1210_v42 = vrot.slane %v1208_v31, 4  ;;  %v263_v46 = vshrl.u32 %v3944_v33, 16  ;;  %v3975_v62 = vld [vmem:[%s3902_s6 + $0x1c] sm:$0xf] }
  0x26   : > { %v246_v40 = vrot.slane %v245_v29, 4  ;;  %v256_v41 = vrot.slane %v255_v30, 4  ;;  %v1216_v43 = vrot.slane %v1214_v32, 5  ;;  %v266_v47 = vshll.u32 %v3944_v33, 16  ;;  %v3982_v2 = vld [vmem:[%s3902_s6 + $0x20] sm:$0x1] }
  0x27   : > { %v1201_v44 = vor.u32 %v1200_v37, %v1197_v36  ;;  %v272_v48 = vshll.u32 %v3947_v34, 16  ;;  %v1211_v51 = vor.u32 %v1210_v42, %v1206_v38  ;;  %v276_v52 = vshrl.u32 %v3947_v34, 16  ;;  %v4000_v26 = vld [vmem:[%s3902_s6 + $0x1c] sm:$0xf]  ;;  %v4007_v31 = vld [vmem:[%s3902_s6 + $0x20] sm:$0x1] }
  0x28   : > { %v251_v49 = vsel %vm3951_vm4, %v246_v40, %v250_v22  ;;  %v261_v50 = vsel %vm3951_vm4, %v256_v41, %v260_v25  ;;  %v265_v55 = vrot.slane %v263_v46, 4  ;;  %v268_v56 = vrot.slane %v266_v47, 5  ;;  %v3995_v22 = vld [vmem:[%s3902_s6 + $0x18] sm:$0xf]  ;;  %v4013_v40 = vld [vmem:[%s3902_s6 + $0x24] sm:$0xf] }
  0x29   : > { %v2924_v53 = vcombine.low %v251_v49, %v261_v50  ;;  %v1202_v54 = vrot.slane %v1201_v44, 4  ;;  %v1212_v58 = vrot.slane %v1211_v51, 4  ;;  %v274_v59 = vrot.slane %v272_v48, 5  ;;  %v4023_v50 = vld [vmem:[%s5089_s1 + $0x4] sm:$0x3] }
  0x2a   : > { %v278_v60 = vrot.slane %v276_v52, 4  ;;  %v282_v61 = vshll.u32 %v3960_v45, 16  ;;  %v1564_v0 = vrot.slane %v3928_v18, 5  ;;  %v269_v1 = vor.u32 %v268_v56, %v265_v55 }
  0x2b   : > { %3269 = vmatprep.mubr.msk.bf16.mxu1 %vm459_vm3, %v2924_v53  ;;  %v1207_v63 = vsel %vm3951_vm4, %v1202_v54, %v1206_v38  ;;  %v1217_v5 = vsel %vm3951_vm4, %v1212_v58, %v1216_v43  ;;  %v1219_v13 = vshrl.u32 %v3971_v57, 16  ;;  %v1222_v20 = vshll.u32 %v3971_v57, 16  ;;  %v4027_v54 = vld [vmem:[%s3902_s6 + $0x28] sm:$0xf] }
  0x2c   : > { %v279_v11 = vor.u32 %v278_v60, %v274_v59  ;;  %v284_v12 = vrot.slane %v282_v61, 5  ;;  %v3024_v14 = vcombine.low %v1207_v63, %v1217_v5  ;;  %v270_v16 = vrot.slane %v269_v1, 4  ;;  %v4032_v61 = vld [vmem:[%s3902_s6 + $0x2c] sm:$0x1] }
  0x2d   : > { %v1228_v21 = vshll.u32 %v3975_v62, 16  ;;  %v1221_v7 = vrot.slane %v1219_v13, 4  ;;  %v1232_v23 = vshrl.u32 %v3975_v62, 16  ;;  %v1238_v25 = vshll.u32 %v3982_v2, 16 }
  0x2e   : > { %v280_v6 = vrot.slane %v279_v11, 4  ;;  %3341 = vmatprep.mubr.msk.bf16.mxu0 %vm459_vm3, %v3024_v14  ;;  %v275_v27 = vsel %vm3951_vm4, %v270_v16, %v274_v59  ;;  %v1224_v28 = vrot.slane %v1222_v20, 5  ;;  %v1568_v30 = vrot.slane %v3975_v62, 5 }
  0x2f   : > { %v1230_v29 = vrot.slane %v1228_v21, 5  ;;  %v1234_v36 = vrot.slane %v1232_v23, 4  ;;  %v1240_v37 = vrot.slane %v1238_v25, 5  ;;  %v1571_v38 = vrot.slane %v3982_v2, 5  ;;  %v4048_v23 = vld [vmem:[%s3902_s6 + $0x28] sm:$0xf] }
  0x30   : > { %v285_v32 = vsel %vm3951_vm4, %v280_v6, %v284_v12  ;;  %v1225_v42 = vor.u32 %v1224_v28, %v1221_v7  ;;  %v287_v43 = vshrl.u32 %v3995_v22, 16  ;;  %v290_v44 = vshll.u32 %v3995_v22, 16  ;;  %v4038_v12 = vld [vmem:[%s3902_s6 + $0x24] sm:$0xf] }
  0x31   : > { %v2925_v41 = vcombine.low %v275_v27, %v285_v32  ;;  %v1235_v46 = vor.u32 %v1234_v36, %v1230_v29  ;;  %v296_v47 = vshll.u32 %v4000_v26, 16  ;;  %v300_v48 = vshrl.u32 %v4000_v26, 16 }
  0x32   : > { %v306_v49 = vshll.u32 %v4007_v31, 16  ;;  %v1226_v51 = vrot.slane %v1225_v42, 4  ;;  %v289_v52 = vrot.slane %v287_v43, 4  ;;  %v292_v53 = vrot.slane %v290_v44, 5  ;;  %v4059_v43 = vld [vmem:[%s3902_s6 + $0x30] sm:$0xf] }
  0x33   : > { %3270 = vmatmul.mubr.msk.bf16.vlgmr.msra.gmra.mrb[0].mxu1 %vm459_vm3, %v2925_v41  ;;  %v1243_v55 = vshrl.u32 %v4013_v40, 16  ;;  %v1236_v56 = vrot.slane %v1235_v46, 4  ;;  %v298_v58 = vrot.slane %v296_v47, 5  ;;  %v302_v59 = vrot.slane %v300_v48, 4  ;;  %v4055_v41 = vld [vmem:[%s3902_s6 + $0x2c] sm:$0x1] }
  0x34   : > { %3286 = vmatpush3.bf16.msra.mxu1 %v3931_v19  ;;  %v308_v60 = vrot.slane %v306_v49, 5  ;;  %v1231_v63 = vsel %vm3951_vm4, %v1226_v51, %v1230_v29  ;;  %v293_v1 = vor.u32 %v292_v53, %v289_v52  ;;  %v1246_v11 = vshll.u32 %v4013_v40, 16 }
  0x35   : > { %v1245_v5 = vrot.slane %v1243_v55, 4  ;;  %3561 = vmatprep.subr.msk.bf16.mxu1 %vm484_vm0, %v4023_v50  ;;  %v1241_v19 = vsel %vm3951_vm4, %v1236_v56, %v1240_v37  ;;  %v303_v13 = vor.u32 %v302_v59, %v298_v58  ;;  %v1252_v14 = vshll.u32 %v4027_v54, 16  ;;  %v4067_v55 = vld [vmem:[%s3902_s6 + $0x34] sm:$0xf] }
  0x36   : > { %v1256_v16 = vshrl.u32 %v4027_v54, 16  ;;  %v3025_v20 = vcombine.low %v1231_v63, %v1241_v19  ;;  %v294_v21 = vrot.slane %v293_v1, 4  ;;  %v1248_v6 = vrot.slane %v1246_v11, 5  ;;  %5119 = vst [vmem:[#allocation6_spill] sm:$0xff] %v4067_v55  ;;  %v4081_v19 = vld [vmem:[%s3902_s6 + $0x30] sm:$0xf] }
  0x37   : > { %v1262_v7 = vshll.u32 %v4032_v61, 16  ;;  %v304_v25 = vrot.slane %v303_v13, 4  ;;  %v1254_v27 = vrot.slane %v1252_v14, 5  ;;  %v311_v29 = vshrl.u32 %v4038_v12, 16 }
  0x38   : > { %v1258_v28 = vrot.slane %v1256_v16, 4  ;;  %3342 = vmatmul.mubr.msk.bf16.vlgmr.msra.gmra.mrb[0].mxu0 %vm459_vm3, %v3025_v20  ;;  %v299_v32 = vsel %vm3951_vm4, %v294_v21, %v298_v58  ;;  %v1249_v36 = vor.u32 %v1248_v6, %v1245_v5  ;;  %v314_v42 = vshll.u32 %v4038_v12, 16  ;;  %v4077_v5 = vld [vmem:[%s3902_s6 + $0x38] sm:$0x1] }
  0x39   : > { %v1264_v37 = vrot.slane %v1262_v7, 5  ;;  %3358 = vmatpush3.bf16.msra.mxu0 %v3987_v4  ;;  %v309_v44 = vsel %vm3951_vm4, %v304_v25, %v308_v60  ;;  %v313_v47 = vrot.slane %v311_v29, 4  ;;  %v320_v48 = vshll.u32 %v4048_v23, 16  ;;  %v4087_v25 = vld [vmem:[%s3902_s6 + $0x34] sm:$0xf] }
  0x3a   : > { %v1259_v46 = vor.u32 %v1258_v28, %v1254_v27  ;;  %v2926_v49 = vcombine.low %v299_v32, %v309_v44  ;;  %v1250_v51 = vrot.slane %v1249_v36, 4  ;;  %v316_v52 = vrot.slane %v314_v42, 5  ;;  %3566 = vmatprep.subr.msk.bf16.mxu0 %vm484_vm0, %v3936_v24  ;;  %v4096_v44 = vld [vmem:[%s3902_s6 + $0x38] sm:$0x1] }
  0x3b   : > { %v324_v53 = vshrl.u32 %v4048_v23, 16  ;;  %v322_v56 = vrot.slane %v320_v48, 5  ;;  %v330_v58 = vshll.u32 %v4055_v41, 16  ;;  %v1267_v59 = vshrl.u32 %v4059_v43, 16 }
  0x3c   : > { %v1260_v4 = vrot.slane %v1259_v46, 4  ;;  %3273 = vmatprep.mubr.msk.bf16.mxu1 %vm459_vm3, %v2926_v49  ;;  %v1255_v60 = vsel %vm3951_vm4, %v1250_v51, %v1254_v27  ;;  %v317_v63 = vor.u32 %v316_v52, %v313_v47  ;;  %v1270_v11 = vshll.u32 %v4059_v43, 16 }
  0x3d   : > { %v326_v1 = vrot.slane %v324_v53, 4  ;;  %v332_v13 = vrot.slane %v330_v58, 5  ;;  %v1269_v14 = vrot.slane %v1267_v59, 4  ;;  %v1276_v16 = vshll.u32 %v4067_v55, 16 }
  0x3e   : > { %v1265_v24 = vsel %vm3951_vm4, %v1260_v4, %v1264_v37  ;;  %v318_v21 = vrot.slane %v317_v63, 4  ;;  %v1272_v7 = vrot.slane %v1270_v11, 5  ;;  %v1280_v28 = vshrl.u32 %v4067_v55, 16  ;;  %v4108_v11 = vld [vmem:[%s3902_s6 + $0x40] sm:$0xf] }
  0x3f   : > { %v3026_v20 = vcombine.low %v1255_v60, %v1265_v24  ;;  %v327_v6 = vor.u32 %v326_v1, %v322_v56  ;;  %v1278_v27 = vrot.slane %v1276_v16, 5  ;;  %v1286_v29 = vshll.u32 %v4077_v5, 16 }
  0x40   : > { %v335_v32 = vshrl.u32 %v4081_v19, 16  ;;  %v323_v36 = vsel %vm3951_vm4, %v318_v21, %v322_v56  ;;  %v1273_v42 = vor.u32 %v1272_v7, %v1269_v14  ;;  %v338_v46 = vshll.u32 %v4081_v19, 16  ;;  %v4104_v56 = vld [vmem:[%s3902_s6 + $0x3c] sm:$0xf] }
  0x41   : > { %3345 = vmatprep.mubr.msk.bf16.mxu0 %vm459_vm3, %v3026_v20  ;;  %v328_v37 = vrot.slane %v327_v6, 4  ;;  %v1282_v47 = vrot.slane %v1280_v28, 4  ;;  %v1288_v48 = vrot.slane %v1286_v29, 5  ;;  %v344_v51 = vshll.u32 %v4087_v25, 16 }
  0x42   : > { %v337_v49 = vrot.slane %v335_v32, 4  ;;  %v1274_v53 = vrot.slane %v1273_v42, 4  ;;  %v340_v4 = vrot.slane %v338_v46, 5  ;;  %v348_v58 = vshrl.u32 %v4087_v25, 16  ;;  %v4123_v32 = vld [vmem:[%s3902_s6 + $0x44] sm:$0x1] }
  0x43   : > { %v333_v52 = vsel %vm3951_vm4, %v328_v37, %v332_v13  ;;  %v1283_v60 = vor.u32 %v1282_v47, %v1278_v27  ;;  %v346_v63 = vrot.slane %v344_v51, 5  ;;  %v354_v1 = vshll.u32 %v4096_v44, 16 }
  0x44   : > { %v2927_v59 = vcombine.low %v323_v36, %v333_v52  ;;  %v1279_v24 = vsel %vm3951_vm4, %v1274_v53, %v1278_v27  ;;  %v341_v14 = vor.u32 %v340_v4, %v337_v49  ;;  %v350_v16 = vrot.slane %v348_v58, 4 }
  0x45   : > { %v3040_v20 = vrot.slane %v3921_v15, 9  ;;  %v1284_v21 = vrot.slane %v1283_v60, 4  ;;  %v356_v6 = vrot.slane %v354_v1, 5  ;;  %v1561_v7 = vrot.slane %v3925_v17, 5 }
  0x46   : > { %3274 = vmatmul.mubr.msk.bf16.gmra.mrb[4].mxu1 %vm459_vm3, %v2927_v59  ;;  %v359_v28 = vshrl.u32 %v4104_v56, 16  ;;  %v342_v29 = vrot.slane %v341_v14, 4  ;;  %v351_v27 = vor.u32 %v350_v16, %v346_v63  ;;  %v362_v36 = vshll.u32 %v4104_v56, 16  ;;  %v4140_v59 = vld [vmem:[%s3902_s6 + $0x48] sm:$0xf] }
  0x47   : > { %v368_v37 = vshll.u32 %v4108_v11, 16  ;;  %v1289_v15 = vsel %vm3951_vm4, %v1284_v21, %v1288_v48  ;;  %v1562_v42 = vsel %vm4114_vm7, %v3040_v20, %v1561_v7  ;;  %v1563_v46 = vrot.slane %v1561_v7, 4  ;;  %v4157_v7 = vld [vmem:[%s3902_s6 + $0x50] sm:$0x1] }
  0x48   : > { %v361_v17 = vrot.slane %v359_v28, 4  ;;  %v3027_v47 = vcombine.low %v1279_v24, %v1289_v15  ;;  %v347_v49 = vsel %vm3951_vm4, %v342_v29, %v346_v63  ;;  %v352_v51 = vrot.slane %v351_v27, 4  ;;  %v4147_v24 = vld [vmem:[%s3902_s6 + $0x4c] sm:$0xf] }
  0x49   : > { %v364_v52 = vrot.slane %v362_v36, 5  ;;  %v1565_v53 = vsel %vm4114_vm7, %v1563_v46, %v1564_v0  ;;  %v370_v4 = vrot.slane %v368_v37, 5  ;;  %v372_v48 = vshrl.u32 %v4108_v11, 16  ;;  %v4171_v46 = vld [vmem:[%s3902_s6 + $0x54] sm:$0xf] }
  0x4a   : > { %v378_v58 = vshll.u32 %v4123_v32, 16  ;;  %3346 = vmatmul.mubr.msk.bf16.gmra.mrb[4].mxu0 %vm459_vm3, %v3027_v47  ;;  %v357_v60 = vsel %vm3951_vm4, %v352_v51, %v356_v6  ;;  %v3048_v63 = vcombine.low %v1562_v42, %v1565_v53  ;;  %v3041_v18 = vrot.slane %v3971_v57, 9 }
  0x4b   : > { %v365_v1 = vor.u32 %v364_v52, %v361_v17  ;;  %v2928_v0 = vcombine.low %v347_v49, %v357_v60  ;;  %v374_v14 = vrot.slane %v372_v48, 4  ;;  %v1570_v20 = vrot.slane %v1568_v30, 4  ;;  %v4178_v48 = vld [vmem:[%s3902_s6 + $0x58] sm:$0xf] }
  0x4c   : > { %v380_v16 = vrot.slane %v378_v58, 5  ;;  %3359 = vmatprep.mubr.msk.bf16.mxu0 %vm459_vm3, %v3048_v63  ;;  %v1569_v6 = vsel %vm4114_vm7, %v3041_v18, %v1568_v30  ;;  %v383_v57 = vshrl.u32 %v4140_v59, 16  ;;  %v386_v28 = vshll.u32 %v4140_v59, 16  ;;  %v4183_v63 = vld [vmem:[%s3902_s6 + $0x5c] sm:$0x1] }
  0x4d   : > { %v366_v21 = vrot.slane %v365_v1, 4  ;;  %3277 = vmatprep.mubr.msk.bf16.mxu1 %vm459_vm3, %v2928_v0  ;;  %v375_v29 = vor.u32 %v374_v14, %v370_v4  ;;  %v1572_v27 = vsel %vm4114_vm7, %v1570_v20, %v1571_v38  ;;  %v392_v62 = vshll.u32 %v4147_v24, 16 }
  0x4e   : > { %v396_v36 = vshrl.u32 %v4147_v24, 16  ;;  %v3049_v37 = vcombine.low %v1569_v6, %v1572_v27  ;;  %v385_v15 = vrot.slane %v383_v57, 4  ;;  %v388_v42 = vrot.slane %v386_v28, 5 }
  0x4f   : > { %v371_v30 = vsel %vm3951_vm4, %v366_v21, %v370_v4  ;;  %v376_v17 = vrot.slane %v375_v29, 4  ;;  %v394_v47 = vrot.slane %v392_v62, 5  ;;  %v402_v49 = vshll.u32 %v4157_v7, 16 }
  0x50   : > { %v398_v2 = vrot.slane %v396_v36, 4  ;;  %v389_v38 = vor.u32 %v388_v42, %v385_v15  ;;  %v3042_v51 = vrot.slane %v4013_v40, 9  ;;  %v1575_v52 = vrot.slane %v4027_v54, 5 }
  0x51   : > { %v1578_v53 = vrot.slane %v4032_v61, 5  ;;  %v381_v4 = vsel %vm3951_vm4, %v376_v17, %v380_v16  ;;  %v404_v60 = vrot.slane %v402_v49, 5  ;;  %v407_v1 = vshrl.u32 %v4171_v46, 16 }
  0x52   : > { %v399_v58 = vor.u32 %v398_v2, %v394_v47  ;;  %v2929_v18 = vcombine.low %v371_v30, %v381_v4  ;;  %3360 = vmatmul.mubr.msk.bf16.vlgmr.msra.gmra.mrb[0].mxu0 %vm459_vm3, %v3049_v37  ;;  %v390_v40 = vrot.slane %v389_v38, 4  ;;  %v1576_v54 = vsel %vm4114_vm7, %v3042_v51, %v1575_v52  ;;  %v4205_v30 = vld [vmem:[%s3902_s6 + $0x40] sm:$0xf]  ;;  %v4208_v37 = vld [vmem:[%s3902_s6 + $0x44] sm:$0x1] }
  0x53   : > { %v1577_v61 = vrot.slane %v1575_v52, 4  ;;  %3376 = vmatpush3.bf16.msra.mxu0 %v3957_v39  ;;  %v409_v14 = vrot.slane %v407_v1, 4  ;;  %v410_v16 = vshll.u32 %v4171_v46, 16  ;;  %v416_v20 = vshll.u32 %v4178_v48, 16  ;;  %v4200_v39 = vld [vmem:[%s3902_s6 + $0x3c] sm:$0xf] }
  0x54   : > { %v400_v0 = vrot.slane %v399_v58, 4  ;;  %3278 = vmatmul.mubr.msk.bf16.gmra.mrb[8].mxu1 %vm459_vm3, %v2929_v18  ;;  %v395_v21 = vsel %vm3951_vm4, %v390_v40, %v394_v47  ;;  %v420_v57 = vshrl.u32 %v4178_v48, 16  ;;  %v426_v28 = vshll.u32 %v4183_v63, 16  ;;  %5122 = vst [vmem:[#allocation7_spill] sm:$0xff] %v4208_v37 }
  0x55   : > { %v1579_v6 = vsel %vm4114_vm7, %v1577_v61, %v1578_v53  ;;  %v412_v62 = vrot.slane %v410_v16, 5  ;;  %v418_v36 = vrot.slane %v416_v20, 5  ;;  %v3043_v17 = vrot.slane %v4059_v43, 9  ;;  %v4227_v61 = vld [vmem:[%s3902_s6 + $0x48] sm:$0xf] }
  0x56   : > { %v405_v29 = vsel %vm3951_vm4, %v400_v0, %v404_v60  ;;  %v3050_v27 = vcombine.low %v1576_v54, %v1579_v6  ;;  %v422_v42 = vrot.slane %v420_v57, 4  ;;  %v1582_v2 = vrot.slane %v4067_v55, 5  ;;  %v4230_v0 = vld [vmem:[%s3902_s6 + $0x4c] sm:$0xf]  ;;  %v4242_v57 = vld [vmem:[%s3902_s6 + $0x54] sm:$0xf] }
  0x57   : > { %v2930_v15 = vcombine.low %v395_v21, %v405_v29  ;;  %v413_v47 = vor.u32 %v412_v62, %v409_v14  ;;  %v1585_v49 = vrot.slane %v4077_v5, 5  ;;  %v3044_v38 = vrot.slane %v4200_v39, 9  ;;  %v4233_v14 = vld [vmem:[%s3902_s6 + $0x50] sm:$0x1]  ;;  %5123 = vst [vmem:[#allocation8_spill] sm:$0xff] %v4242_v57 }
  0x58   : > { %3363 = vmatprep.mubr.msk.bf16.mxu0 %vm459_vm3, %v3050_v27  ;;  %v423_v51 = vor.u32 %v422_v42, %v418_v36  ;;  %v428_v52 = vrot.slane %v426_v28, 5  ;;  %v1589_v53 = vrot.slane %v4205_v30, 5  ;;  %v1592_v43 = vrot.slane %v4208_v37, 5  ;;  %v4245_v28 = vld [vmem:[%s3902_s6 + $0x58] sm:$0xf] }
  0x59   : > { %3281 = vmatprep.mubr.msk.bf16.mxu1 %vm459_vm3, %v2930_v15  ;;  %v414_v4 = vrot.slane %v413_v47, 4  ;;  %v1583_v58 = vsel %vm4114_vm7, %v3043_v17, %v1582_v2  ;;  %v1584_v60 = vrot.slane %v1582_v2, 4  ;;  %v2941_v21 = vcombine.low %v3908_v8, %v3911_v9  ;;  %5124 = vst [vmem:[#allocation9_spill] sm:$0xff] %v4245_v28  ;;  %v4248_v62 = vld [vmem:[%s3902_s6 + $0x5c] sm:$0x1] }
  0x5a   : > { %v424_v5 = vrot.slane %v423_v51, 4  ;;  %v1590_v1 = vsel %vm4114_vm7, %v3044_v38, %v1589_v53  ;;  %v1591_v18 = vrot.slane %v1589_v53, 4  ;;  %5125 = vst [vmem:[#allocation10_spill] sm:$0xff] %v4248_v62  ;;  %v1596_v15 = vrot.slane %v4230_v0, 5  ;;  %v4259_v2 = vld [vmem:[%s3902_s6 + $0x64] sm:$0xf] }
  0x5b   : > { %v419_v40 = vsel %vm3951_vm4, %v414_v4, %v418_v36  ;;  %v1586_v54 = vsel %vm4114_vm7, %v1584_v60, %v1585_v49  ;;  %v3045_v36 = vrot.slane %v4227_v61, 9  ;;  %v1599_v42 = vrot.slane %v4233_v14, 5  ;;  %5126 = vst [vmem:[#allocation11_spill] sm:$0xff] %v4259_v2  ;;  %v4269_v53 = vld [vmem:[%s3902_s6 + $0x68] sm:$0x1] }
  0x5c   : > { %v429_v16 = vsel %vm3951_vm4, %v424_v5, %v428_v52  ;;  %v3051_v20 = vcombine.low %v1583_v58, %v1586_v54  ;;  %v1593_v6 = vsel %vm4114_vm7, %v1591_v18, %v1592_v43  ;;  %v3046_v17 = vrot.slane %v4242_v57, 9  ;;  %v4266_v52 = vld [vmem:[%s3902_s6 + $0x60] sm:$0xf]  ;;  %5128 = vst [vmem:[#allocation13_spill] sm:$0xff] %v4269_v53  ;;  %v4514_v37 = vld [vmem:[%s3902_s6 + $0x6c] sm:$0xf] }
  0x5d   : > { %v2931_v29 = vcombine.low %v419_v40, %v429_v16  ;;  %v3052_v27 = vcombine.low %v1590_v1, %v1593_v6  ;;  %v1603_v47 = vrot.slane %v4245_v28, 5  ;;  %v1597_v49 = vsel %vm4114_vm7, %v3045_v36, %v1596_v15  ;;  %5127 = vst [vmem:[#allocation12_spill] sm:$0xff] %v4266_v52  ;;  %v3650_v58 = vld [vmem:[%s5089_s1 + $0xc] ss:$0 sps:$4 sm:$0xcc]  }
  0x5e   : > { %3364 = vmatmul.mubr.msk.bf16.gmra.mrb[4].mxu0 %vm459_vm3, %v3051_v20  ;;  %v1598_v38 = vrot.slane %v1596_v15, 4  ;;  %v1606_v51 = vrot.slane %v4248_v62, 5  ;;  %v2942_v60 = vcombine.low %v3944_v33, %v3947_v34  ;;  %v1610_v1 = vrot.slane %v4259_v2, 5  ;;  %v4293_v36 = vld [vmem:[%s5089_s1 + $0x4] ss:$0 sps:$4 sm:$0xcc]  }
  0x5f   : > { %3282 = vmatmul.mubr.msk.bf16.gmra.mrb[12].mxu1 %vm459_vm3, %v2931_v29  ;;  %3367 = vmatprep.mubr.msk.bf16.mxu0 %vm459_vm3, %v3052_v27  ;;  %v1604_v43 = vsel %vm4114_vm7, %v3046_v17, %v1603_v47  ;;  %v1605_v4 = vrot.slane %v1603_v47, 4  ;;  %v3047_v54 = vrot.slane %v4266_v52, 9  ;;  %v1613_v16 = vrot.slane %v4269_v53, 5  ;;  %v4304_v17 = vld [vmem:[%s3902_s6 + $0x18] sm:$0xf] }
  0x60   : > { %3287 = vmatprep.mubr.msk.bf16.mxu1 %vm459_vm3, %v2941_v21  ;;  %v1600_v5 = vsel %vm4114_vm7, %v1598_v38, %v1599_v42  ;;  %v2943_v20 = vcombine.low %v3995_v22, %v4000_v26  ;;  %v1612_v6 = vrot.slane %v1610_v1, 4  ;;  %v866_v29 = vsel %vm484_vm0, %v4023_v50, 0  ;;  %v4307_v47 = vld [vmem:[%s3902_s6 + $0x1c] sm:$0xf]  ;;  %v4473_v53 = vld [vmem:[%s3902_s6 + $0x64] sm:$0xf] }
  0x61   : > { %v3053_v18 = vcombine.low %v1597_v49, %v1600_v5  ;;  %v1607_v40 = vsel %vm4114_vm7, %v1605_v4, %v1606_v51  ;;  %v2213_v27 = vrot.slane %v3650_v58, 2  ;;  %v1611_v15 = vsel %vm4114_vm7, %v3047_v54, %v1610_v1  ;;  %v4317_v4 = vld [vmem:[%s3902_s6 + $0x24] sm:$0xf]  ;;  %v4320_v58 = vld [vmem:[%s3902_s6 + $0x28] sm:$0xf] }
  0x62   : > { %v3054_v21 = vcombine.low %v1604_v43, %v1607_v40  ;;  %v1614_v50 = vsel %vm4114_vm7, %v1612_v6, %v1613_v16  ;;  %v769_v42 = vrot.slane %v3947_v34, 5  ;;  %v772_v49 = vrot.slane %v3960_v45, 5  ;;  %5129 = vst [vmem:[#allocation14_spill] sm:$0xff] %v4317_v4  ;;  %v4343_v6 = vld [vmem:[%s3902_s6 + $0x30] sm:$0xf] }
  0x63   : > { %3567 = vmatprep.subr.msk.bf16.mxu0 %vm484_vm0, %v2213_v27  ;;  %v3055_v38 = vcombine.low %v1611_v15, %v1614_v50  ;;  %v5092_v51 = vrot.slane %v4293_v36, 2  ;;  %v2944_v43 = vcombine.low %v4038_v12, %v4048_v23  ;;  %v3091_v34 = vcombine.low %v4304_v17, %v4307_v47  ;;  %5130 = vst [vmem:[#allocation15_spill] sm:$0xff] %v4343_v6 }
  0x64   : > { %v765_v5 = vrot.slane %v3914_v10, 5  ;;  %v2945_v45 = vcombine.low %v4081_v19, %v4087_v25  ;;  %v1994_v1 = vshrl.u32 %v4304_v17, 16  ;;  %v1997_v40 = vshll.u32 %v4304_v17, 16  ;;  %v4470_v10 = vld [vmem:[%s3902_s6 + $0x60] sm:$0xf] }
  0x65   : > { %v2959_v15 = vrot.slane %v3995_v22, 9  ;;  %v786_v50 = vrot.slane %v4055_v41, 5  ;;  %v2961_v41 = vrot.slane %v4081_v19, 9  ;;  %v2948_v19 = vcombine.low %v4171_v46, %v4178_v48  ;;  %5135 = vst [vmem:[#allocation19_spill] sm:$0xff] %v4470_v10 }
  0x66   : > { %3368 = vmatmul.mubr.msk.bf16.gmra.mrb[8].mxu0 %vm459_vm3, %v3053_v18  ;;  %v771_v18 = vrot.slane %v769_v42, 4  ;;  %v797_v54 = vrot.slane %v4108_v11, 5  ;;  %v5139_v28 = vshrl.u32 %v4320_v58, 16 }
  0x67   : > { %3288 = vmatmul.mubr.msk.bf16.vlgmr.msra.gmra.mrb[0].mxu1 %vm459_vm3, %v2942_v60  ;;  %3371 = vmatprep.mubr.msk.bf16.mxu0 %vm459_vm3, %v3054_v21  ;;  %v2958_v60 = vrot.slane %v3944_v33, 9  ;;  %v2946_v33 = vcombine.low %v4104_v56, %v4108_v11  ;;  %v4378_v21 = vld [vmem:[%s3902_s6 + $0x3c] sm:$0xf] }
  0x68   : > { %3304 = vmatpush3.bf16.msra.mxu1 %v866_v29  ;;  %3291 = vmatprep.mubr.msk.bf16.mxu1 %vm459_vm3, %v2943_v20  ;;  %v3092_v20 = vcombine.low %v4317_v4, %v4320_v58  ;;  %v4347_v29 = vsel %vm4114_vm7, %v771_v18, %v772_v49  ;;  %v2239_v49 = vsel %vm484_vm0, %v2213_v27, 0  ;;  %5131 = vst [vmem:[#allocation16_spill] sm:$0xff] %v4378_v21  ;;  %v790_v27 = vrot.slane %v4087_v25, 5  ;;  %v4423_v25 = vld [vmem:[%s3902_s6 + $0x48] sm:$0xf] }
  0x69   : > { %3562 = vmatprep.subr.msk.bf16.mxu1 %vm484_vm0, %v5092_v51  ;;  %v4336_v16 = vsel %vm4114_vm7, %v2958_v60, %v769_v42  ;;  %v4354_v42 = vld [vmem:[%s3902_s6 + $0x34] sm:$0xf]  ;;  %v776_v60 = vrot.slane %v4000_v26, 5  ;;  %v779_v51 = vrot.slane %v4007_v31, 5  ;;  %v2960_v26 = vrot.slane %v4038_v12, 9 }
  0x6a   : > { %v783_v31 = vrot.slane %v4048_v23, 5  ;;  %v792_v22 = vrot.slane %v790_v27, 4  ;;  %v2033_v57 = vrot.slane %v5139_v28, 4  ;;  %v5140_v28 = vshrl.u32 %v4343_v6, 16 }
  0x6b   : > { %v4368_v18 = vsel %vm4114_vm7, %v2959_v15, %v776_v60 }
  0x6c   : > { %v4387_v12 = vsel %vm4114_vm7, %v2960_v26, %v783_v31  ;;  %v785_v23 = vrot.slane %v783_v31, 4  ;;  %v2003_v31 = vshll.u32 %v4307_v47, 16 }
  0x6e   : > { %3372 = vmatmul.mubr.msk.bf16.gmra.mrb[12].mxu0 %vm459_vm3, %v3055_v38  ;;  %v778_v38 = vrot.slane %v776_v60, 4  ;;  %v4390_v60 = vld [vmem:[%s3902_s6 + $0x40] sm:$0xf]  ;;  %v4400_v26 = vsel %vm4114_vm7, %v785_v23, %v786_v50  ;;  %v4415_v50 = vld [vmem:[%s5089_s1 + $0x10] sm:$0x3] }
  0x6f   : > { %3292 = vmatmul.mubr.msk.bf16.gmra.mrb[4].mxu1 %vm459_vm3, %v2944_v43  ;;  %3377 = vmatprep.mubr.msk.bf16.mxu0 %vm459_vm3, %v3091_v34  ;;  %v2947_v43 = vcombine.low %v4140_v59, %v4147_v24  ;;  %v762_v34 = vrot.slane %v3911_v9, 5  ;;  %v2957_v9 = vrot.slane %v3908_v8, 9  ;;  %5132 = vst [vmem:[#allocation17_spill] sm:$0xff] %v4390_v60  ;;  %v793_v8 = vrot.slane %v4096_v44, 5 }
  0x70   : > { %3295 = vmatprep.mubr.msk.bf16.mxu1 %vm459_vm3, %v2945_v45  ;;  %v3093_v45 = vcombine.low %v4343_v6, %v4354_v42  ;;  %v4383_v15 = vsel %vm4114_vm7, %v778_v38, %v779_v51  ;;  %v4410_v44 = vsel %vm4114_vm7, %v2961_v41, %v790_v27  ;;  %v1996_v41 = vrot.slane %v1994_v1, 4  ;;  %v4429_v51 = vld [vmem:[%s3902_s6 + $0x4c] sm:$0xf]  ;;  %v4467_v1 = vld [vmem:[%s3902_s6 + $0x58] sm:$0xf] }
  0x71   : > { %v764_v38 = vrot.slane %v762_v34, 4  ;;  %v763_v23 = vsel %vm4114_vm7, %v2957_v9, %v762_v34  ;;  %v2962_v27 = vrot.slane %v4104_v56, 9  ;;  %v800_v34 = vrot.slane %v4123_v32, 5 }
  0x72   : > { %v799_v9 = vrot.slane %v797_v54, 4 }
  0x73   : > { %v766_v56 = vsel %vm4114_vm7, %v764_v38, %v765_v5  ;;  %v4455_v5 = vld [vmem:[%s3902_s6 + $0x54] sm:$0xf]  ;;  %v3095_v38 = vcombine.low %v4423_v25, %v4429_v51 }
  0x74   : > { %5134 = vst [vmem:[#allocation18_spill] sm:$0xff] %v4455_v5  ;;  %v2965_v32 = vcombine.low %v763_v23, %v766_v56  ;;  %v2963_v23 = vrot.slane %v4140_v59, 9  ;;  %v3096_v59 = vcombine.low %v4455_v5, %v4467_v1 }
  0x76   : > { %3378 = vmatmul.mubr.msk.bf16.vlgmr.msra.gmra.mrb[0].mxu0 %vm459_vm3, %v3092_v20  ;;  %v3094_v20 = vcombine.low %v4378_v21, %v4390_v60 }
  0x77   : > { %3296 = vmatmul.mubr.msk.bf16.gmra.mrb[8].mxu1 %vm459_vm3, %v2946_v33  ;;  %3394 = vmatpush3.bf16.msra.mxu0 %v2239_v49  ;;  %v4433_v33 = vsel %vm4114_vm7, %v792_v22, %v793_v8  ;;  %v1999_v49 = vrot.slane %v1997_v40, 5  ;;  %v4446_v22 = vrot.slane %v2003_v31, 5  ;;  %v5133_v40 = vshrl.u32 %v4307_v47, 16 }
  0x78   : > { %3299 = vmatprep.mubr.msk.bf16.mxu1 %vm459_vm3, %v2947_v43  ;;  %3381 = vmatprep.mubr.msk.bf16.mxu0 %vm459_vm3, %v3093_v45  ;;  %v4444_v43 = vld [vmem:[%s3902_s6 + $0x20] sm:$0x1]  ;;  %v4459_v45 = vsel %vm4114_vm7, %v2962_v27, %v797_v54  ;;  %v4478_v8 = vsel %vm4114_vm7, %v799_v9, %v800_v34  ;;  %v5138_v34 = vshll.u32 %v4317_v4, 16  ;;  %v807_v31 = vrot.slane %v4157_v7, 5 }
  0x79   : > { %v2009_v11 = vrot.slane %v5133_v40, 4  ;;  %3568 = vmatprep.subr.msk.bf16.mxu0 %vm484_vm0, %v4415_v50  ;;  %v2000_v27 = vor.u32 %v1999_v49, %v1996_v41  ;;  %v2013_v54 = vshll.u32 %v4444_v43, 16  ;;  %v2027_v40 = vshll.u32 %v4320_v58, 16  ;;  %v4488_v41 = vld [vmem:[%s3902_s6 + $0x2c] sm:$0x1] }
  0x7a   : > { %5136 = vst [vmem:[#allocation20_spill] sm:$0xff] %v4488_v41  ;;  %v5137_v49 = vshrl.u32 %v4317_v4, 16  ;;  %v2023_v9 = vrot.slane %v5138_v34, 5  ;;  %v2037_v7 = vshll.u32 %v4488_v41, 16  ;;  %v814_v41 = vrot.slane %v4183_v63, 5 }
  0x7b   : > { %v2010_v62 = vor.u32 %v2009_v11, %v4446_v22  ;;  %v804_v11 = vrot.slane %v4147_v24, 5  ;;  %v2001_v34 = vrot.slane %v2000_v27, 4  ;;  %v2015_v24 = vrot.slane %v2013_v54, 5 }
  0x7c   : > { %v2020_v52 = vrot.slane %v5137_v49, 4  ;;  %v2051_v49 = vshll.u32 %v4354_v42, 16  ;;  %v4508_v2 = vrot.slane %v2027_v40, 5  ;;  %v2964_v27 = vrot.slane %v4171_v46, 9 }
  0x7d   : > { %v2011_v56 = vrot.slane %v2010_v62, 4  ;;  %v811_v54 = vrot.slane %v4178_v48, 5  ;;  %v4523_v62 = vld [vmem:[%s3902_s6 + $0x70] sm:$0xf]  ;;  %v5143_v40 = vrot.slane %v4293_v36, 2  ;;  %v2075_v36 = vshll.u32 %v4390_v60, 16 }
  0x7e   : > { %3382 = vmatmul.mubr.msk.bf16.gmra.mrb[4].mxu0 %vm459_vm3, %v3094_v20  ;;  %v3097_v20 = vcombine.low %v4470_v10, %v4473_v53  ;;  %v2024_v4 = vor.u32 %v2023_v9, %v2020_v52  ;;  %v4531_v9 = vrot.slane %v2051_v49, 5  ;;  %v2034_v49 = vor.u32 %v2033_v57, %v4508_v2 }
  0x7f   : > { %3300 = vmatmul.mubr.msk.bf16.gmra.mrb[12].mxu1 %vm459_vm3, %v2948_v19  ;;  %3385 = vmatprep.mubr.msk.bf16.mxu0 %vm459_vm3, %v3095_v38  ;;  %v4506_v19 = vsel %vm4114_vm7, %v2963_v23, %v804_v11  ;;  %v806_v38 = vrot.slane %v804_v11, 4  ;;  %v2044_v23 = vrot.slane %v5140_v28, 4  ;;  %v5141_v11 = vshll.u32 %v4343_v6, 16  ;;  %v4547_v6 = vld [vmem:[%s3902_s6 + $0x38] sm:$0x1] }
  0x80   : > { %3305 = vmatprep.mubr.msk.bf16.mxu1 %vm459_vm3, %v2965_v32  ;;  %v4537_v46 = vsel %vm4114_vm7, %v2964_v27, %v811_v54  ;;  %v813_v48 = vrot.slane %v811_v54, 4  ;;  %v1079_v55 = vsel %vm484_vm0, %v5143_v40, 0  ;;  %v2114_v28 = vshrl.u32 %v4455_v5, 16  ;;  %5144 = vst [vmem:[#allocation21_spill] sm:$0xff] %v4547_v6 }
  0x81   : > { %v4518_v32 = vsel %vm4114_vm7, %v806_v38, %v807_v31  ;;  %v2047_v52 = vrot.slane %v5141_v11, 5  ;;  %v5142_v31 = vshrl.u32 %v4354_v42, 16  ;;  %v2117_v11 = vshll.u32 %v4455_v5, 16  ;;  %v4598_v5 = vld [vmem:[%s3902_s6 + $0x50] sm:$0x1] }
  0x82   : > { %v2127_v27 = vshrl.u32 %v4467_v1, 16  ;;  %v3098_v54 = vcombine.low %v4514_v37, %v4523_v62  ;;  %v4555_v63 = vsel %vm4114_vm7, %v813_v48, %v814_v41  ;;  %v5145_v40 = vcombine.low %v4336_v16, %v4347_v29 }
  0x83   : > { %v2057_v38 = vrot.slane %v5142_v31, 4  ;;  %v2006_v57 = vsel %vm3951_vm4, %v2001_v34, %v4446_v22  ;;  %v2039_v31 = vrot.slane %v2037_v7, 5  ;;  %v5146_v16 = vcombine.low %v4368_v18, %v4383_v15  ;;  %v4586_v18 = vld [vmem:[%s3902_s6 + $0x44] sm:$0x1] }
  0x84   : > { %v2025_v29 = vrot.slane %v2024_v4, 4  ;;  %v2061_v22 = vshll.u32 %v4547_v6, 16  ;;  %v2035_v34 = vrot.slane %v2034_v49, 4  ;;  %v5148_v7 = vshll.u32 %v4378_v21, 16 }
  0x85   : > { %v2058_v48 = vor.u32 %v2057_v38, %v4531_v9  ;;  %v2099_v4 = vshll.u32 %v4429_v51, 16  ;;  %v4588_v15 = vrot.slane %v2075_v36, 5  ;;  %v5150_v38 = vshrl.u32 %v4423_v25, 16 }
  0x86   : > { %3386 = vmatmul.mubr.msk.bf16.gmra.mrb[8].mxu0 %vm459_vm3, %v3096_v59  ;;  %v2016_v59 = vsel %vm3951_vm4, %v2011_v56, %v2015_v24  ;;  %v5147_v56 = vshrl.u32 %v4378_v21, 16  ;;  %v5152_v21 = vshrl.u32 %v4429_v51, 16  ;;  %v2141_v6 = vshll.u32 %v4470_v10, 16 }
  0x87   : > { %3306 = vmatmul.mubr.msk.bf16.vlgmr.msra.gmra.mrb[0].mxu1 %vm459_vm3, %v5145_v40  ;;  %3389 = vmatprep.mubr.msk.bf16.mxu0 %vm459_vm3, %v3097_v20  ;;  %v2048_v20 = vor.u32 %v2047_v52, %v2044_v23  ;;  %v2071_v40 = vrot.slane %v5148_v7, 5  ;;  %v5149_v23 = vshrl.u32 %v4390_v60, 16  ;;  %v2092_v49 = vrot.slane %v5150_v38, 4 }
  0x88   : > { %3322 = vmatpush3.bf16.msra.mxu1 %v1079_v55  ;;  %3309 = vmatprep.mubr.msk.bf16.mxu1 %vm459_vm3, %v5146_v16  ;;  %v2068_v24 = vrot.slane %v5147_v56, 4  ;;  %v3670_v55 = vld [vmem:[%s5089_s1 + $0x8] sm:$0x3]  ;;  %v5151_v16 = vshll.u32 %v4423_v25, 16  ;;  %v2138_v7 = vshrl.u32 %v4470_v10, 16  ;;  %v3107_v41 = vcombine.low %v2006_v57, %v2016_v59 }
  0x89   : > { %3564 = vmatprep.subr.msk.bf16.mxu1 %vm484_vm0, %v3670_v55  ;;  %v2081_v52 = vrot.slane %v5149_v23, 4  ;;  %v4600_v55 = vrot.slane %v2099_v4, 5  ;;  %v2105_v36 = vrot.slane %v5152_v21, 4  ;;  %v2049_v60 = vrot.slane %v2048_v20, 4 }
  0x8a   : > { %v2095_v56 = vrot.slane %v5151_v16, 5  ;;  %v2059_v23 = vrot.slane %v2058_v48, 4  ;;  %v2063_v3 = vrot.slane %v2061_v22, 5  ;;  %v2030_v38 = vsel %vm3951_vm4, %v2025_v29, %v4508_v2 }
  0x8b   : > { %v2040_v16 = vsel %vm3951_vm4, %v2035_v34, %v2039_v31  ;;  %v2072_v57 = vor.u32 %v2071_v40, %v2068_v24  ;;  %v2085_v59 = vshll.u32 %v4586_v18, 16  ;;  %v2151_v4 = vshrl.u32 %v4473_v53, 16 }
  0x8c   : > { %v2082_v21 = vor.u32 %v2081_v52, %v4588_v15  ;;  %v2096_v10 = vor.u32 %v2095_v56, %v2092_v49  ;;  %v2109_v20 = vshll.u32 %v4598_v5, 16  ;;  %v5153_v48 = vcombine.low %v4387_v12, %v4400_v26 }
  0x8d   : > { %v2162_v2 = vshrl.u32 %v4514_v37, 16  ;;  %v2165_v31 = vshll.u32 %v4514_v37, 16  ;;  %v2106_v29 = vor.u32 %v2105_v36, %v4600_v55  ;;  %v5154_v22 = vcombine.low %v4410_v44, %v4433_v33 }
  0x8e   : > { %3390 = vmatmul.mubr.msk.bf16.gmra.mrb[12].mxu0 %vm459_vm3, %v3098_v54  ;;  %v2123_v54 = vshll.u32 %v4467_v1, 16  ;;  %v3108_v34 = vcombine.low %v2030_v38, %v2040_v16  ;;  %v2054_v12 = vsel %vm3951_vm4, %v2049_v60, %v4531_v9  ;;  %v2064_v26 = vsel %vm3951_vm4, %v2059_v23, %v2063_v3  ;;  %v4635_v38 = vld [vmem:[%s3902_s6 + $0x5c] sm:$0x1] }
  0x8f   : > { %3310 = vmatmul.mubr.msk.bf16.gmra.mrb[4].mxu1 %vm459_vm3, %v5153_v48  ;;  %3395 = vmatprep.mubr.msk.bf16.mxu0 %vm459_vm3, %v3107_v41  ;;  %v2147_v41 = vshll.u32 %v4473_v53, 16  ;;  %v2073_v24 = vrot.slane %v2072_v57, 4  ;;  %v2087_v40 = vrot.slane %v2085_v59, 5  ;;  %v2116_v52 = vrot.slane %v2114_v28, 4 }
  0x90   : > { %3313 = vmatprep.mubr.msk.bf16.mxu1 %vm459_vm3, %v5154_v22  ;;  %v2119_v49 = vrot.slane %v2117_v11, 5  ;;  %v2083_v56 = vrot.slane %v2082_v21, 4  ;;  %v2097_v36 = vrot.slane %v2096_v10, 4  ;;  %v2111_v44 = vrot.slane %v2109_v20, 5  ;;  %v4642_v22 = vld [vmem:[%s3902_s6 + $0x68] sm:$0x1] }
  0x91   : > { %v2129_v33 = vrot.slane %v2127_v27, 4  ;;  %v2107_v48 = vrot.slane %v2106_v29, 4  ;;  %v4637_v16 = vrot.slane %v2123_v54, 5  ;;  %v2140_v60 = vrot.slane %v2138_v7, 4 }
  0x92   : > { %v2143_v9 = vrot.slane %v2141_v6, 5  ;;  %v2468_v3 = vsel %vm484_vm0, %v4415_v50, 0  ;;  %v3109_v23 = vcombine.low %v2054_v12, %v2064_v26  ;;  %v4644_v57 = vrot.slane %v2147_v41, 5 }
  0x93   : > { %v2153_v28 = vrot.slane %v2151_v4, 4  ;;  %v2175_v10 = vshrl.u32 %v4523_v62, 16  ;;  %v2078_v11 = vsel %vm3951_vm4, %v2073_v24, %v4588_v15  ;;  %v2120_v27 = vor.u32 %v2119_v49, %v2116_v52  ;;  %v3671_v24 = vld [vmem:[%s3902_s6 + $0xc] sm:$0xf] }
  0x94   : > { %v2088_v6 = vsel %vm3951_vm4, %v2083_v56, %v2087_v40  ;;  %v2102_v50 = vsel %vm3951_vm4, %v2097_v36, %v4600_v55  ;;  %v2133_v7 = vshll.u32 %v4635_v38, 16  ;;  %v2171_v59 = vshll.u32 %v4523_v62, 16  ;;  %v3672_v40 = vld [vmem:[%s3902_s6 + $0x10] sm:$0xf] }
  0x95   : > { %v5155_v4 = vcombine.low %v4459_v45, %v4478_v8  ;;  %v2112_v15 = vsel %vm3951_vm4, %v2107_v48, %v2111_v44  ;;  %v2130_v21 = vor.u32 %v2129_v33, %v4637_v16  ;;  %v2144_v20 = vor.u32 %v2143_v9, %v2140_v60 }
  0x96   : > { %3396 = vmatmul.mubr.msk.bf16.vlgmr.msra.gmra.mrb[0].mxu0 %vm459_vm3, %v3108_v34  ;;  %v2157_v55 = vshll.u32 %v4642_v22, 16  ;;  %v5156_v29 = vcombine.low %v4506_v19, %v4518_v32  ;;  %v2154_v45 = vor.u32 %v2153_v28, %v4644_v57  ;;  %v2164_v8 = vrot.slane %v2162_v2, 4  ;;  %v4681_v2 = vld [vmem:[%s3902_s6 + $0x74] sm:$0x1] }
  0x97   : > { %3314 = vmatmul.mubr.msk.bf16.gmra.mrb[8].mxu1 %vm459_vm3, %v5155_v4  ;;  %3412 = vmatpush3.bf16.msra.mxu0 %v2468_v3  ;;  %v2167_v54 = vrot.slane %v2165_v31, 5  ;;  %v3012_v34 = vcombine.low %v4227_v61, %v4230_v0  ;;  %v1315_v12 = vshrl.u32 %v4227_v61, 16  ;;  %v1318_v26 = vshll.u32 %v4227_v61, 16 }
  0x98   : > { %3317 = vmatprep.mubr.msk.bf16.mxu1 %vm459_vm3, %v5156_v29  ;;  %3399 = vmatprep.mubr.msk.bf16.mxu0 %vm459_vm3, %v3109_v23  ;;  %v3110_v41 = vcombine.low %v2078_v11, %v2088_v6  ;;  %v3007_v19 = vcombine.low %v3671_v24, %v3672_v40  ;;  %v4678_v32 = vrot.slane %v2171_v59, 5  ;;  %v2177_v52 = vrot.slane %v2175_v10, 4 }
  0x99   : > { %v3111_v49 = vcombine.low %v2102_v50, %v2112_v15  ;;  %v2121_v56 = vrot.slane %v2120_v27, 4  ;;  %v2131_v36 = vrot.slane %v2130_v21, 4  ;;  %v2135_v44 = vrot.slane %v2133_v7, 5 }
  0x9a   : > { %v2145_v31 = vrot.slane %v2144_v20, 4  ;;  %v2155_v33 = vrot.slane %v2154_v45, 4  ;;  %v2159_v48 = vrot.slane %v2157_v55, 5  ;;  %v2168_v60 = vor.u32 %v2167_v54, %v2164_v8  ;;  %v3673_v45 = vld [vmem:[%s3902_s6 + $0x18] sm:$0xf] }
  0x9b   : > { %v1324_v9 = vshll.u32 %v4230_v0, 16  ;;  %v1328_v3 = vshrl.u32 %v4230_v0, 16  ;;  %v2364_v23 = vrot.slane %v4307_v47, 5  ;;  %v1317_v28 = vrot.slane %v1315_v12, 4  ;;  %v3674_v8 = vld [vmem:[%s3902_s6 + $0x1c] sm:$0xf] }
  0x9c   : > { %v2178_v10 = vor.u32 %v2177_v52, %v4678_v32  ;;  %v2181_v11 = vshll.u32 %v4681_v2, 16  ;;  %v1320_v27 = vrot.slane %v1318_v26, 5  ;;  %v1334_v6 = vshll.u32 %v4233_v14, 16  ;;  %v3675_v26 = vld [vmem:[%s3902_s6 + $0x24] sm:$0xf] }
  0x9d   : > { %v5157_v50 = vcombine.low %v4537_v46, %v4555_v63  ;;  %v2126_v47 = vsel %vm3951_vm4, %v2121_v56, %v4637_v16  ;;  %v2136_v7 = vsel %vm3951_vm4, %v2131_v36, %v2135_v44  ;;  %v2150_v14 = vsel %vm3951_vm4, %v2145_v31, %v4644_v57 }
  0x9e   : > { %3400 = vmatmul.mubr.msk.bf16.gmra.mrb[4].mxu0 %vm459_vm3, %v3110_v41  ;;  %v2160_v46 = vsel %vm3951_vm4, %v2155_v33, %v2159_v48  ;;  %v2169_v63 = vrot.slane %v2168_v60, 4  ;;  %v3124_v59 = vrot.slane %v4304_v17, 9  ;;  %v1326_v4 = vrot.slane %v1324_v9, 5  ;;  %v3676_v41 = vld [vmem:[%s3902_s6 + $0x28] sm:$0xf] }
  0x9f   : > { %3318 = vmatmul.mubr.msk.bf16.gmra.mrb[12].mxu1 %vm459_vm3, %v5157_v50  ;;  %3403 = vmatprep.mubr.msk.bf16.mxu0 %vm459_vm3, %v3111_v49  ;;  %v1330_v15 = vrot.slane %v1328_v3, 4  ;;  %v2366_v16 = vrot.slane %v2364_v23, 4  ;;  %v2367_v21 = vrot.slane %v4444_v43, 5  ;;  %v3112_v20 = vcombine.low %v2126_v47, %v2136_v7  ;;  %v5158_v60 = vld [vmem:[#allocation5_spill] sm:$0xff]  ;;  %v3677_v9 = vld [vmem:[%s3902_s6 + $0x30] sm:$0xf] }
  0xa0   : > { %3323 = vmatprep.mubr.msk.bf16.mxu1 %vm459_vm3, %v3007_v19  ;;  %v2179_v55 = vrot.slane %v2178_v10, 4  ;;  %v2183_v29 = vrot.slane %v2181_v11, 5  ;;  %v3008_v54 = vcombine.low %v3673_v45, %v3674_v8  ;;  %v3113_v57 = vcombine.low %v2150_v14, %v2160_v46  ;;  %v5161_v10 = vld [vmem:[#allocation20_spill] sm:$0xff]  ;;  %s2918_s6 = sshll.u32 %s3756_s15, 4 }
  0xa1   : > { %v1336_v12 = vrot.slane %v1334_v6, 5  ;;  %v3009_v24 = vcombine.low %v3675_v26, %v3676_v41  ;;  %v2174_v17 = vsel %vm3951_vm4, %v2169_v63, %v4678_v32  ;;  %v2365_v40 = vsel %vm4114_vm7, %v3124_v59, %v2364_v23  ;;  %v5160_v23 = vld [vmem:[#allocation14_spill] sm:$0xff]  ;;  %v5163_v59 = vld [vmem:[#allocation21_spill] sm:$0xff]  ;;  %v5165_v26 = vld [vmem:[#allocation7_spill] sm:$0xff]  ;;  %p198_p13 = scmp.lt.s32.totalorder %s2918_s6, 31 }
  0xa2   : > { %v2368_v43 = vsel %vm4114_vm7, %v2366_v16, %v2367_v21  ;;  %v2371_v19 = vrot.slane %v4320_v58, 5  ;;  %v1321_v52 = vor.u32 %v1320_v27, %v1317_v28  ;;  %v1331_v49 = vor.u32 %v1330_v15, %v1326_v4  ;;  %v5162_v27 = vld [vmem:[#allocation15_spill] sm:$0xff] }
  0xa3   : > { %v2184_v56 = vsel %vm3951_vm4, %v2179_v55, %v2183_v29  ;;  %v2378_v36 = vrot.slane %v4354_v42, 5  ;;  %v1291_v32 = vshrl.u32 %v4200_v39, 16  ;;  %v1294_v44 = vshll.u32 %v4200_v39, 16  ;;  %v5159_v42 = vld [vmem:[#allocation6_spill] sm:$0xff]  ;;  %s5189_s6 = smov (!%p198_p13, %s2918_s6), 31 }
  0xa4   : > { %v1300_v58 = vshll.u32 %v4205_v30, 16  ;;  %v1304_v31 = vshrl.u32 %v4205_v30, 16  ;;  %v1322_v33 = vrot.slane %v1321_v52, 4  ;;  %v1332_v48 = vrot.slane %v1331_v49, 4  ;;  %v5167_v49 = vld [vmem:[#allocation8_spill] sm:$0xff]  ;;  %s201_s11 = sadd.s32 %s2919_s10, %s5189_s6 }
  0xa5   : > { %v3010_v3 = vcombine.low %v3677_v9, %v5159_v42  ;;  %v3125_v28 = vrot.slane %v5160_v23, 9  ;;  %v2374_v11 = vrot.slane %v5161_v10, 5  ;;  %v3126_v6 = vrot.slane %v5162_v27, 9  ;;  %v5169_v23 = vld [vmem:[#allocation11_spill] sm:$0xff]  ;;  %s2920_s20 = sshll.u32 %s201_s11, 2 }
  0xa6   : > { %3404 = vmatmul.mubr.msk.bf16.gmra.mrb[8].mxu0 %vm459_vm3, %v3112_v20  ;;  %v3132_v50 = vcombine.low %v2365_v40, %v2368_v43  ;;  %v2373_v47 = vrot.slane %v2371_v19, 4  ;;  %v1327_v7 = vsel %vm3951_vm4, %v1322_v33, %v1326_v4  ;;  %v1337_v14 = vsel %vm3951_vm4, %v1332_v48, %v1336_v12  ;;  %v5166_v43 = vld [vmem:[#allocation16_spill] sm:$0xff]  ;;  %s4845_s27 = scalar_lea.vmem %s5090_s2, %s2920_s20 }
  0xa7   : > { %3324 = vmatmul.mubr.msk.bf16.vlgmr.msra.gmra.mrb[0].mxu1 %vm459_vm3, %v3008_v54  ;;  %3407 = vmatprep.mubr.msk.bf16.mxu0 %vm459_vm3, %v3113_v57  ;;  %v3114_v46 = vcombine.low %v2174_v17, %v2184_v56  ;;  %v2380_v63 = vrot.slane %v2378_v36, 4  ;;  %v2381_v15 = vrot.slane %v5163_v59, 5  ;;  %v4742_v16 = vcombine.low %v1327_v7, %v1337_v14  ;;  %v5164_v57 = vld [vmem:[#allocation17_spill] sm:$0xff] }
  0xa8   : > { %3430 = vmatpush3.bf16.msra.mxu1 %v5158_v60  ;;  %3327 = vmatprep.mubr.msk.bf16.mxu1 %vm459_vm3, %v3009_v24  ;;  %v1293_v21 = vrot.slane %v1291_v32, 4  ;;  %v1296_v20 = vrot.slane %v1294_v44, 5  ;;  %v1302_v55 = vrot.slane %v1300_v58, 5  ;;  %v1306_v29 = vrot.slane %v1304_v31, 4  ;;  %v5168_v32 = vld [vmem:[#allocation9_spill] sm:$0xff] }
  0xa9   : > { %v3011_v45 = vcombine.low %v4200_v39, %v4205_v30  ;;  %v2372_v8 = vsel %vm4114_vm7, %v3125_v28, %v2371_v19  ;;  %v2375_v4 = vsel %vm4114_vm7, %v2373_v47, %v2374_v11  ;;  %v2379_v54 = vsel %vm4114_vm7, %v3126_v6, %v2378_v36  ;;  %v5170_v28 = vld [vmem:[#allocation12_spill] sm:$0xff] }
  0xaa   : > { %v2385_v12 = vrot.slane %v5164_v57, 5  ;;  %v1310_v41 = vshll.u32 %v5165_v26, 16  ;;  %v2382_v39 = vsel %vm4114_vm7, %v2380_v63, %v2381_v15  ;;  %v1297_v30 = vor.u32 %v1296_v20, %v1293_v21 }
  0xab   : > { %v1307_v24 = vor.u32 %v1306_v29, %v1302_v55  ;;  %v2392_v17 = vrot.slane %v4429_v51, 5  ;;  %v3133_v40 = vcombine.low %v2372_v8, %v2375_v4  ;;  %v3127_v19 = vrot.slane %v5166_v43, 9  ;;  %v5172_v8 = vld [vmem:[#allocation18_spill] sm:$0xff] }
  0xac   : > { %v2388_v52 = vrot.slane %v4586_v18, 5  ;;  %v1339_v56 = vshrl.u32 %v5167_v49, 16  ;;  %v1342_v36 = vshll.u32 %v5167_v49, 16  ;;  %v1348_v44 = vshll.u32 %v5168_v32, 16 }
  0xad   : > { %v1352_v58 = vshrl.u32 %v5168_v32, 16  ;;  %v3134_v31 = vcombine.low %v2379_v54, %v2382_v39  ;;  %v2387_v33 = vrot.slane %v2385_v12, 4  ;;  %v1312_v48 = vrot.slane %v1310_v41, 5 }
  0xae   : > { %3408 = vmatmul.mubr.msk.bf16.gmra.mrb[12].mxu0 %vm459_vm3, %v3114_v46  ;;  %v3128_v51 = vrot.slane %v4423_v25, 9  ;;  %v1298_v60 = vrot.slane %v1297_v30, 4  ;;  %v1308_v9 = vrot.slane %v1307_v24, 4  ;;  %v2394_v42 = vrot.slane %v2392_v17, 4 }
  0xaf   : > { %3328 = vmatmul.mubr.msk.bf16.gmra.mrb[4].mxu1 %vm459_vm3, %v3010_v3  ;;  %3413 = vmatprep.mubr.msk.bf16.mxu0 %vm459_vm3, %v3132_v50  ;;  %v2395_v3 = vrot.slane %v4598_v5, 5  ;;  %v3013_v18 = vcombine.low %v5167_v49, %v5168_v32  ;;  %v3014_v10 = vcombine.low %v5170_v28, %v5169_v23  ;;  %v1341_v11 = vrot.slane %v1339_v56, 4 }
  0xb0   : > { %3331 = vmatprep.mubr.msk.bf16.mxu1 %vm459_vm3, %v3011_v45  ;;  %v1344_v27 = vrot.slane %v1342_v36, 5  ;;  %v1350_v6 = vrot.slane %v1348_v44, 5  ;;  %v1354_v50 = vrot.slane %v1352_v58, 4  ;;  %v2386_v25 = vsel %vm4114_vm7, %v3127_v19, %v2385_v12  ;;  %v5173_v12 = vld [vmem:[#allocation19_spill] sm:$0xff]  ;;  %v5174_v58 = vld [vmem:[#allocation13_spill] sm:$0xff] }
  0xb1   : > { %v2389_v47 = vsel %vm4114_vm7, %v2387_v33, %v2388_v52  ;;  %v2393_v5 = vsel %vm4114_vm7, %v3128_v51, %v2392_v17  ;;  %v2399_v7 = vrot.slane %v4467_v1, 5  ;;  %v1303_v14 = vsel %vm3951_vm4, %v1298_v60, %v1302_v55  ;;  %v5171_v55 = vld [vmem:[#allocation10_spill] sm:$0xff] }
  0xb2   : > { %v1313_v46 = vsel %vm3951_vm4, %v1308_v9, %v1312_v48  ;;  %v2396_v63 = vsel %vm4114_vm7, %v2394_v42, %v2395_v3  ;;  %v2406_v59 = vrot.slane %v4473_v53, 5  ;;  %v1363_v1 = vshrl.u32 %v5170_v28, 16 }
  0xb3   : > { %v1366_v61 = vshll.u32 %v5170_v28, 16  ;;  %v1372_v0 = vshll.u32 %v5169_v23, 16  ;;  %v3135_v15 = vcombine.low %v2386_v25, %v2389_v47  ;;  %v1345_v21 = vor.u32 %v1344_v27, %v1341_v11 }
  0xb4   : > { %v1355_v20 = vor.u32 %v1354_v50, %v1350_v6  ;;  %v1358_v29 = vshll.u32 %v5171_v55, 16  ;;  %v3136_v45 = vcombine.low %v2393_v5, %v2396_v63  ;;  %v3129_v4 = vrot.slane %v5172_v8, 9 }
  0xb5   : > { %v2401_v54 = vrot.slane %v2399_v7, 4  ;;  %v2402_v53 = vrot.slane %v4635_v38, 5  ;;  %v3028_v57 = vcombine.low %v1303_v14, %v1313_v46  ;;  %v3130_v26 = vrot.slane %v5173_v12, 9 }
  0xb6   : > { %3414 = vmatmul.mubr.msk.bf16.vlgmr.msra.gmra.mrb[0].mxu0 %vm459_vm3, %v3133_v40  ;;  %v2408_v41 = vrot.slane %v2406_v59, 4  ;;  %v2409_v39 = vrot.slane %v4642_v22, 5  ;;  %v1365_v30 = vrot.slane %v1363_v1, 4  ;;  %v1368_v24 = vrot.slane %v1366_v61, 5 }
  0xb7   : > { %3332 = vmatmul.mubr.msk.bf16.gmra.mrb[8].mxu1 %vm459_vm3, %v3012_v34  ;;  %3417 = vmatprep.mubr.msk.bf16.mxu0 %vm459_vm3, %v3134_v31  ;;  %v1376_v34 = vshrl.u32 %v5169_v23, 16  ;;  %v1374_v17 = vrot.slane %v1372_v0, 5  ;;  %v1346_v43 = vrot.slane %v1345_v21, 4  ;;  %v1356_v19 = vrot.slane %v1355_v20, 4 }
  0xb8   : > { %3335 = vmatprep.mubr.msk.bf16.mxu1 %vm459_vm3, %v3013_v18  ;;  %v1360_v52 = vrot.slane %v1358_v29, 5  ;;  %v2400_v38 = vsel %vm4114_vm7, %v3129_v4, %v2399_v7  ;;  %v2403_v49 = vsel %vm4114_vm7, %v2401_v54, %v2402_v53  ;;  %v2407_v22 = vsel %vm4114_vm7, %v3130_v26, %v2406_v59 }
  0xb9   : > { %v1378_v40 = vrot.slane %v1376_v34, 4  ;;  %v2413_v56 = vrot.slane %v4523_v62, 5  ;;  %v2410_v36 = vsel %vm4114_vm7, %v2408_v41, %v2409_v39  ;;  %v1369_v32 = vor.u32 %v1368_v24, %v1365_v30 }
  0xba   : > { %v1382_v31 = vshll.u32 %v5174_v58, 16  ;;  %v1351_v33 = vsel %vm3951_vm4, %v1346_v43, %v1350_v6  ;;  %v1361_v48 = vsel %vm3951_vm4, %v1356_v19, %v1360_v52  ;;  %v3137_v51 = vcombine.low %v2400_v38, %v2403_v49 }
  0xbb   : > { %v1379_v44 = vor.u32 %v1378_v40, %v1374_v17  ;;  %v3138_v60 = vcombine.low %v2407_v22, %v2410_v36  ;;  %v3131_v9 = vrot.slane %v4514_v37, 9  ;;  %v2415_v62 = vrot.slane %v2413_v56, 4 }
  0xbc   : > { %v2416_v42 = vrot.slane %v4681_v2, 5  ;;  %v3030_v3 = vcombine.low %v1351_v33, %v1361_v48  ;;  %v1370_v18 = vrot.slane %v1369_v32, 4  ;;  %v1384_v28 = vrot.slane %v1382_v31, 5 }
  0xbd   : > { %v1380_v23 = vrot.slane %v1379_v44, 4 }
  0xbe   : > { %3418 = vmatmul.mubr.msk.bf16.gmra.mrb[4].mxu0 %vm459_vm3, %v3135_v15  ;;  %v2417_v37 = vsel %vm4114_vm7, %v2415_v62, %v2416_v42  ;;  %v1375_v2 = vsel %vm3951_vm4, %v1370_v18, %v1374_v17 }
  0xbf   : > { %3336 = vmatmul.mubr.msk.bf16.gmra.mrb[12].mxu1 %vm459_vm3, %v3014_v10  ;;  %3421 = vmatprep.mubr.msk.bf16.mxu0 %vm459_vm3, %v3136_v45  ;;  %v2414_v10 = vsel %vm4114_vm7, %v3131_v9, %v2413_v56  ;;  %v1385_v11 = vsel %vm3951_vm4, %v1380_v23, %v1384_v28 }
  0xc0   : > { %3349 = vmatprep.mubr.msk.bf16.mxu1 %vm459_vm3, %v3028_v57  ;;  %v3139_v27 = vcombine.low %v2414_v10, %v2417_v37  ;;  %v3031_v6 = vcombine.low %v1375_v2, %v1385_v11 }
  0xc6   : > { %3422 = vmatmul.mubr.msk.bf16.gmra.mrb[8].mxu0 %vm459_vm3, %v3137_v51 }
  0xc7   : > { %3350 = vmatmul.mubr.msk.bf16.vlgmr.msra.gmra.mrb[8].mxu1 %vm459_vm3, %v4742_v16  ;;  %3425 = vmatprep.mubr.msk.bf16.mxu0 %vm459_vm3, %v3138_v60 }
  0xc8   : > { %3353 = vmatprep.mubr.msk.bf16.mxu1 %vm459_vm3, %v3030_v3 }
  0xce   : > { %3426 = vmatmul.mubr.msk.bf16.gmra.mrb[12].mxu0 %vm459_vm3, %v3139_v27 }
  0xcf   : > { %3354 = vmatmul.mubr.msk.bf16.gmra.mrb[12].mxu1 %vm459_vm3, %v3031_v6 }
 0x17a   : > { %v3325_v16 = vpop.f32.mrb[0].mxu1 }
 0x17b   : > { %v1115_v50 = vpop.f32.mrb[1].mxu1 }
 0x17c   : > { %v3326_v13 = vpop.f32.mrb[2].mxu1 }
 0x17d   : > { %v1118_v25 = vpop.f32.mrb[3].mxu1 }
 0x182   : > { %v3329_v47 = vpop.f32.mrb[4].mxu1 }
 0x183   : > { %v1131_v5 = vpop.f32.mrb[5].mxu1 }
 0x184   : > { %v3330_v7 = vpop.f32.mrb[6].mxu1 }
 0x185   : > { %v1134_v14 = vpop.f32.mrb[7].mxu1 }
 0x189   : > { %v3415_v35 = vpop.f32.mrb[0].mxu0 }
 0x18a   : > { %v4840_v46 = vadd.f32 %v3415_v35, %v3325_v16  ;;  %v2504_v63 = vpop.f32.mrb[1].mxu0  ;;  %v3774_v16 = vmov (!%p3164_p0), 0.0  }
 0x18b   : > { %v4847_v59 = vadd.f32 %v2504_v63, %v1115_v50  ;;  %v3416_v1 = vpop.f32.mrb[2].mxu0  ;;  %2669 = vst.msk [vmem:[%s4942_s9] sm:$0x3] (!%p3164_p0), %vm2668_vm9, %v3774_v16 }
 0x18c   : > { %v3172_v61 = vpack.c.bf16 %v4840_v46, %v4840_v46  ;;  %v4851_v0 = vadd.f32 %v3416_v1, %v3326_v13  ;;  %v2507_v34 = vpop.f32.mrb[3].mxu0 }
 0x18d   : > { %v3170_v15 = vpack.c.bf16 %v4847_v59, %v4847_v59  ;;  %v4855_v21 = vadd.f32 %v2507_v34, %v1118_v25 }
 0x18e   : > { %2650 = vst.msk [vmem:[%s4845_s27 + $0x8] sm:$0xf] %vm2647_vm8, %v3172_v61  ;;  %v3173_v20 = vpack.c.bf16 %v4851_v0, %v4851_v0 }
 0x18f   : > { %2648 = vst.msk [vmem:[%s4845_s27] sm:$0xf] %vm2647_vm8, %v3170_v15  ;;  %v3171_v55 = vpack.c.bf16 %v4855_v21, %v4855_v21 }
 0x190   : > { %2651 = vst.msk [vmem:[%s4845_s27 + $0xc] sm:$0xf] %vm2647_vm8, %v3173_v20 }
 0x191   : > { %2649 = vst.msk [vmem:[%s4845_s27 + $0x4] sm:$0xf] %vm2647_vm8, %v3171_v55  ;;  %v3419_v29 = vpop.f32.mrb[4].mxu0 }
 0x192   : > { %v4869_v45 = vadd.f32 %v3419_v29, %v3329_v47  ;;  %v2520_v8 = vpop.f32.mrb[5].mxu0 }
 0x193   : > { %v4871_v4 = vadd.f32 %v2520_v8, %v1131_v5  ;;  %v3420_v54 = vpop.f32.mrb[6].mxu0 }
 0x194   : > { %v3176_v53 = vpack.c.bf16 %v4869_v45, %v4869_v45  ;;  %v4875_v57 = vadd.f32 %v3420_v54, %v3330_v7  ;;  %v2523_v12 = vpop.f32.mrb[7].mxu0 }
 0x195   : > { %v3174_v26 = vpack.c.bf16 %v4871_v4, %v4871_v4  ;;  %v4879_v41 = vadd.f32 %v2523_v12, %v1134_v14 }
 0x196   : > { %2654 = vst.msk [vmem:[%s4845_s27 + $0x18] sm:$0xf] %vm2647_vm8, %v3176_v53  ;;  %v3177_v39 = vpack.c.bf16 %v4875_v57, %v4875_v57 }
 0x197   : > { %2652 = vst.msk [vmem:[%s4845_s27 + $0x10] sm:$0xf] %vm2647_vm8, %v3174_v26  ;;  %v3175_v30 = vpack.c.bf16 %v4879_v41, %v4879_v41 }
 0x198   : > { %2655 = vst.msk [vmem:[%s4845_s27 + $0x1c] sm:$0xf] %vm2647_vm8, %v3177_v39 }
 0x199   : > { %2653 = vst.msk [vmem:[%s4845_s27 + $0x14] sm:$0xf] %vm2647_vm8, %v3175_v30  ;;  %v3423_v24 = vpop.f32.mrb[8].mxu0 }
 0x19a   : > { %v3351_v17 = vpop.f32.mrb[8].mxu1  ;;  %v2536_v40 = vpop.f32.mrb[9].mxu0 }
 0x19b   : > { %v4893_v43 = vadd.f32 %v3423_v24, %v3351_v17  ;;  %v1504_v19 = vpop.f32.mrb[9].mxu1  ;;  %v3424_v52 = vpop.f32.mrb[10].mxu0 }
 0x19c   : > { %v4895_v38 = vadd.f32 %v2536_v40, %v1504_v19  ;;  %v3352_v49 = vpop.f32.mrb[10].mxu1  ;;  %v2539_v22 = vpop.f32.mrb[11].mxu0 }
 0x19d   : > { %v3180_v56 = vpack.c.bf16 %v4893_v43, %v4893_v43  ;;  %v4899_v36 = vadd.f32 %v3424_v52, %v3352_v49  ;;  %v1507_v32 = vpop.f32.mrb[11].mxu1 }
 0x19e   : > { %v3178_v44 = vpack.c.bf16 %v4895_v38, %v4895_v38  ;;  %v4903_v58 = vadd.f32 %v2539_v22, %v1507_v32 }
 0x19f   : > { %2658 = vst.msk [vmem:[%s4845_s27 + $0x28] sm:$0xf] %vm2647_vm8, %v3180_v56  ;;  %v3181_v31 = vpack.c.bf16 %v4899_v36, %v4899_v36 }
 0x1a0   : > { %2656 = vst.msk [vmem:[%s4845_s27 + $0x20] sm:$0xf] %vm2647_vm8, %v3178_v44  ;;  %v3179_v33 = vpack.c.bf16 %v4903_v58, %v4903_v58 }
 0x1a1   : > { %2659 = vst.msk [vmem:[%s4845_s27 + $0x2c] sm:$0xf] %vm2647_vm8, %v3181_v31  ;;  %v3427_v48 = vpop.f32.mrb[12].mxu0 }
 0x1a2   : > { %2657 = vst.msk [vmem:[%s4845_s27 + $0x24] sm:$0xf] %vm2647_vm8, %v3179_v33  ;;  %v3355_v51 = vpop.f32.mrb[12].mxu1  ;;  %v2552_v60 = vpop.f32.mrb[13].mxu0 }
 0x1a3   : > { %v4917_v9 = vadd.f32 %v3427_v48, %v3355_v51  ;;  %v1520_v62 = vpop.f32.mrb[13].mxu1  ;;  %v3428_v42 = vpop.f32.mrb[14].mxu0 }
 0x1a4   : > { %v4919_v3 = vadd.f32 %v2552_v60, %v1520_v62  ;;  %v3356_v18 = vpop.f32.mrb[14].mxu1  ;;  %v2555_v23 = vpop.f32.mrb[15].mxu0  ;;  %2667 = sbr.rel (%p3164_p0) target bundleno = 427 (0x1ab), region = 32 }
 0x1a5   : > { %v3184_v28 = vpack.c.bf16 %v4917_v9, %v4917_v9  ;;  %v4923_v10 = vadd.f32 %v3428_v42, %v3356_v18  ;;  %v1523_v37 = vpop.f32.mrb[15].mxu1 }
 0x1a6   : > { %v3182_v2 = vpack.c.bf16 %v4919_v3, %v4919_v3  ;;  %v4927_v11 = vadd.f32 %v2555_v23, %v1523_v37 }
 0x1a7   : > { %2662 = vst.msk [vmem:[%s4845_s27 + $0x38] sm:$0xf] %vm2647_vm8, %v3184_v28  ;;  %v3185_v27 = vpack.c.bf16 %v4923_v10, %v4923_v10 }
 0x1a8   : > { %2660 = vst.msk [vmem:[%s4845_s27 + $0x30] sm:$0xf] %vm2647_vm8, %v3182_v2  ;;  %v3183_v6 = vpack.c.bf16 %v4927_v11, %v4927_v11 }
 0x1a9   : > { %2663 = vst.msk [vmem:[%s4845_s27 + $0x3c] sm:$0xf] %vm2647_vm8, %v3185_v27 }
 0x1aa   : > { %2661 = vst.msk [vmem:[%s4845_s27 + $0x34] sm:$0xf] %vm2647_vm8, %v3183_v6 }
 0x1ab PF: > { %vm2671_vm10 = vcmask 64512   ;;  %v2709_v35 = vmul.f32 %v4847_v59, %v4847_v59  ;;  %v2710_v63 = vmul.f32 %v4855_v21, %v4855_v21  ;;  %v2711_v1 = vmul.f32 %v4840_v46, %v4840_v46  ;;  %s3166_s15 = sshll.u32 %s3760_s16, 5  ;;  %s2794_s5 = sshll.u32 %s4942_s9, 4  ;;  %s5034_s5 = int_to_ptr.vmem [resolvable:$true] %s2794_s5 }
 0x1ac   : > { %v2672_v50 = vsel %vm2671_vm10, %v4847_v59, 0.0  ;;  %v2673_v13 = vsel %vm2671_vm10, %v4855_v21, 0.0  ;;  %v2675_v25 = vsel %vm2671_vm10, %v4840_v46, 0.0  ;;  %v2677_v5 = vsel %vm2671_vm10, %v4851_v0, 0.0  ;;  %s5032_s7 = scalar_lea.hbm %s5091_s3, %s3166_s15  ;;  %s2777_s8 = scalar_lea.sflag [#allocation3], %s187_s29 }
 0x1ad   : > { %v2674_v47 = vadd.f32 %v2673_v13, %v2672_v50  ;;  %v2679_v14 = vsel %vm2671_vm10, %v4871_v4, 0.0  ;;  %v2681_v34 = vsel %vm2671_vm10, %v4879_v41, 0.0  ;;  %v2712_v15 = vmul.f32 %v4851_v0, %v4851_v0  ;;  %s3678_s6 = scalar_lea.vmem %s5034_s5, 32  ;;  %s3775_s16 = smov [#allocation2]  }
 0x1ae   : > { %v2683_v55 = vsel %vm2671_vm10, %v4869_v45, 0.0  ;;  %v2713_v59 = vmul.f32 %v4871_v4, %v4871_v4  ;;  %v2725_v29 = vsel %vm2671_vm10, %v2709_v35, 0.0  ;;  %v2726_v21 = vsel %vm2671_vm10, %v2710_v63, 0.0  ;;  %p3679_p1 = scmp.ne.s32.totalorder %s5034_s5, %s3678_s6  ;;  %s3682_s10 = sshll.u32 %s3775_s16, 4  ;;  %s3683_s10 = int_to_ptr.vmem [resolvable:$false] %s3682_s10 }
 0x1af   : > { %v2676_v7 = vadd.f32 %v2675_v25, %v2674_v47  ;;  %v2728_v46 = vsel %vm2671_vm10, %v2711_v1, 0.0  ;;  %v2727_v54 = vadd.f32 %v2726_v21, %v2725_v29  ;;  %v2685_v53 = vsel %vm2671_vm10, %v4875_v57, 0.0  ;;  %s3684_s11 = scalar_lea.vmem %s3683_s10, 64  ;;  %p3685_p5 = scmp.lt.s32.totalorder %s5034_s5, %s3683_s10 }
 0x1b0   : > { %v2714_v0 = vmul.f32 %v4879_v41, %v4879_v41  ;;  %v2730_v12 = vsel %vm2671_vm10, %v2712_v15, 0.0  ;;  %v2687_v4 = vsel %vm2671_vm10, %v4895_v38, 0.0  ;;  %v2715_v30 = vmul.f32 %v4869_v45, %v4869_v45  ;;  %p3680_p2 = pnand %p3679_p1, %p3845_p3  ;;  %p3686_p6 = scmp.lt.s32.totalorder %s3684_s11, %s3678_s6 }
 0x1b1   : > { %v2678_v61 = vadd.f32 %v2677_v5, %v2676_v7  ;;  %v2729_v39 = vadd.f32 %v2728_v46, %v2727_v54  ;;  %v2732_v24 = vsel %vm2671_vm10, %v2713_v59, 0.0  ;;  %v2689_v19 = vsel %vm2671_vm10, %v4903_v58, 0.0 }
 0x1b2   : > { %v2716_v41 = vmul.f32 %v4875_v57, %v4875_v57  ;;  %v2734_v52 = vsel %vm2671_vm10, %v2714_v0, 0.0  ;;  %v2691_v56 = vsel %vm2671_vm10, %v4893_v43, 0.0  ;;  %v2717_v45 = vmul.f32 %v4895_v38, %v4895_v38  ;;  %p3681_p4 = pneg %p3680_p2  ;;  %p3687_p7 = por %p3686_p6, %p3685_p5 }
 0x1b3   : > { %v2680_v20 = vadd.f32 %v2679_v14, %v2678_v61  ;;  %v2731_v40 = vadd.f32 %v2730_v12, %v2729_v39  ;;  %v2736_v32 = vsel %vm2671_vm10, %v2715_v30, 0.0  ;;  %v2693_v33 = vsel %vm2671_vm10, %v4899_v36, 0.0  ;;  %v2670_v39 = vld [vmem:[%s4942_s9] sm:$0x3] }
 0x1b4   : > { %v2718_v57 = vmul.f32 %v4903_v58, %v4903_v58  ;;  %v2738_v48 = vsel %vm2671_vm10, %v2716_v41, 0.0  ;;  %v2695_v62 = vsel %vm2671_vm10, %v4919_v3, 0.0  ;;  %v2719_v38 = vmul.f32 %v4893_v43, %v4893_v43  ;;  %p3688_p8 = pnand %p3687_p7, %p3681_p4 }
 0x1b5   : > { %v2682_v8 = vadd.f32 %v2681_v34, %v2680_v20  ;;  %v2733_v22 = vadd.f32 %v2732_v24, %v2731_v40  ;;  %v2740_v42 = vsel %vm2671_vm10, %v2717_v45, 0.0  ;;  %v2697_v28 = vsel %vm2671_vm10, %v4927_v11, 0.0 }
 0x1b6   : > { %v2720_v58 = vmul.f32 %v4899_v36, %v4899_v36  ;;  %v2742_v37 = vsel %vm2671_vm10, %v2718_v57, 0.0  ;;  %v2699_v6 = vsel %vm2671_vm10, %v4917_v9, 0.0  ;;  %v2721_v43 = vmul.f32 %v4919_v3, %v4919_v3 }
 0x1b7   : > { %v2684_v26 = vadd.f32 %v2683_v55, %v2682_v8  ;;  %v2735_v31 = vadd.f32 %v2734_v52, %v2733_v22  ;;  %v2744_v16 = vsel %vm2671_vm10, %v2719_v38, 0.0  ;;  %v2701_v25 = vsel %vm2671_vm10, %v4923_v10, 0.0 }
 0x1b8   : > { %v2722_v36 = vmul.f32 %v4927_v11, %v4927_v11  ;;  %v2746_v47 = vsel %vm2671_vm10, %v2720_v58, 0.0  ;;  %v2723_v14 = vmul.f32 %v4917_v9, %v4917_v9  ;;  %v2748_v35 = vsel %vm2671_vm10, %v2721_v43, 0.0 }
 0x1b9   : > { %v2686_v17 = vadd.f32 %v2685_v53, %v2684_v26  ;;  %v2737_v60 = vadd.f32 %v2736_v32, %v2735_v31  ;;  %v2724_v1 = vmul.f32 %v4923_v10, %v4923_v10  ;;  %vm2762_vm11 = vcmask 1040384  }
 0x1ba   : > { %v2750_v61 = vsel %vm2671_vm10, %v2722_v36, 0.0  ;;  %v2752_v11 = vsel %vm2671_vm10, %v2723_v14, 0.0  ;;  %vm2765_vm12 = vcmask 58368  }
 0x1bb   : > { %v2688_v49 = vadd.f32 %v2687_v4, %v2686_v17  ;;  %v2739_v23 = vadd.f32 %v2738_v48, %v2737_v60  ;;  %v2754_v59 = vsel %vm2671_vm10, %v2724_v1, 0.0 }
 0x1bd   : > { %v2690_v44 = vadd.f32 %v2689_v19, %v2688_v49  ;;  %v2741_v27 = vadd.f32 %v2740_v42, %v2739_v23 }
 0x1bf   : > { %v2692_v51 = vadd.f32 %v2691_v56, %v2690_v44  ;;  %v2743_v13 = vadd.f32 %v2742_v37, %v2741_v27 }
 0x1c1   : > { %v2694_v18 = vadd.f32 %v2693_v33, %v2692_v51  ;;  %v2745_v7 = vadd.f32 %v2744_v16, %v2743_v13 }
 0x1c3   : > { %v2696_v2 = vadd.f32 %v2695_v62, %v2694_v18  ;;  %v2747_v63 = vadd.f32 %v2746_v47, %v2745_v7 }
 0x1c5   : > { %v2698_v50 = vadd.f32 %v2697_v28, %v2696_v2  ;;  %v2749_v15 = vadd.f32 %v2748_v35, %v2747_v63 }
 0x1c7   : > { %v2700_v5 = vadd.f32 %v2699_v6, %v2698_v50  ;;  %v2751_v55 = vadd.f32 %v2750_v61, %v2749_v15 }
 0x1c9   : > { %v2702_v3 = vadd.f32 %v2701_v25, %v2700_v5  ;;  %v2753_v29 = vadd.f32 %v2752_v11, %v2751_v55 }
 0x1cb   : > { %v2703_v34 = vrot.slane %v2702_v3, 4  ;;  %v2755_v21 = vadd.f32 %v2754_v59, %v2753_v29 }
 0x1cd   : > { %v2704_v20 = vadd.f32 %v2703_v34, %v2702_v3  ;;  %v2756_v8 = vrot.slane %v2755_v21, 4 }
 0x1cf   : > { %v2705_v9 = vrot.slane %v2704_v20, 2  ;;  %v2757_v54 = vadd.f32 %v2756_v8, %v2755_v21 }
 0x1d1   : > { %v2706_v46 = vadd.f32 %v2705_v9, %v2704_v20  ;;  %v2758_v53 = vrot.slane %v2757_v54, 2 }
 0x1d3   : > { %v2707_v10 = vrot.slane %v2706_v46, 1  ;;  %v2759_v0 = vadd.f32 %v2758_v53, %v2757_v54 }
 0x1d5   : > { %v2708_v12 = vadd.f32 %v2707_v10, %v2706_v46  ;;  %v2760_v26 = vrot.slane %v2759_v0, 1 }
 0x1d7   : > { %v2761_v4 = vadd.f32 %v2760_v26, %v2759_v0 }
 0x1d9   : > { %v2763_v30 = vsel %vm2762_vm11, %v2708_v12, %v2761_v4 }
 0x1da   : > { %v2764_v24 = vadd.f32 %v2763_v30, %v2670_v39 }
 0x1dc   : > { %2766 = vst.msk [vmem:[%s4942_s9] sm:$0x3] %vm2765_vm12, %v2764_v24 }
 0x1dd   : > { %3691 = shalt.err (!%p3688_p8)
}
 0x1de   : > { %s3692_s29 = scalar_lea.hbm %s5032_s7, 32  ;;  %s3696_s26 = scalar_lea.hbm %s5091_s3, 64 }
 0x1df   : > { %p3693_p10 = scmp.ne.s32.totalorder %s5032_s7, %s3692_s29  ;;  %p3697_p13 = scmp.lt.u32.totalorder %s5032_s7, %s5091_s3 }
 0x1e0   : > { %p3698_p0 = scmp.lt.u32.totalorder %s3696_s26, %s3692_s29  ;;  %p3700_p2 = scmp.lt.u32.totalorder %s3692_s29, %s5032_s7 }
 0x1e1   : > { %p3694_p11 = pnand %p3693_p10, %p3845_p3 }
 0x1e2   : > { %p3699_p1 = por %p3698_p0, %p3697_p13 }
 0x1e3   : > { %p3695_p12 = pneg %p3694_p11 }
 0x1e4   : > { %p3701_p4 = por %p3700_p2, %p3699_p1 }
 0x1e6   : > { %p3702_p5 = pnand %p3701_p4, %p3695_p12 }
 0x1e8   : > { %3705 = shalt.err (!%p3702_p5)
}
 0x1e9   : > { %3570 = dma.vmem_to_hbm [thread:$0]  (%p3845_p3), %s5034_s5, 32, %s5032_s7, %s2777_s8  }
 0x1ea PF: > { %p3576_p6 = scmp.ge.s32.totalorder %s3772_s19, 2  ;;  %s2818_s15 = sand.u32 1, %s3744_s12  }
 0x1eb   : > { %s2819_s30 = scalar_lea.sflag [#allocation3], %s2818_s15 }
 0x1ec   : > { %p3573_p7 = pnand %p3576_p6, %p3855_p9 }
 0x1ee   : > { %3739 = dma.done.wait (!%p3573_p7), %s2819_s30, 32  }
 0x1ef   : > { %3741 = vsyncadd (!%p3573_p7), %s2819_s30, 4294967264  ;;  %s17_s19 = sadd.s32 1, %s3772_s19   ;;  %s5175_s12 = smov %s3748_s13 }
 0x1f0   : > { %p14_p8 = scmp.ge.s32.totalorder %s17_s19, 6   ;;  %s5176_s13 = smov %s3752_s14 }
 0x1f1   : > { %s5177_s14 = smov %s3863_s28  ;;  %s5178_s15 = smov %s3764_s17 }
 0x1f2   : > { %s5179_s16 = smov %s3768_s18  ;;  %s5180_s17 = smov %s5183_s22 }
 0x1f3   : > { %s5181_s18 = smov %s5187_s23  ;;  %16 = sbr.rel (!%p14_p8) target bundleno = 5 (0x5), region = 82 }
 0x1fa   :  { %2824 = vsyncpa [#allocation3], 1 }
 0x1fb   :  { %2826 = vsyncpa [#allocation3 + $0x1], 1 }

</bundles_post_ra>
